<compile_context>
chip_gen: v7x
topology: tpu7x:2x2x1
jax: 0.10.0
libtpu: 0.0.40
codegen_flags: <defaults>
</compile_context>

<pallas_src>
import jax
import jax.numpy as jnp
from jax.experimental import pallas as pl
from jax.experimental.pallas import tpu as pltpu

LANES = 128


# ----------------------------------------------------------------------------
# Small helpers
# ----------------------------------------------------------------------------
def _round_up(v, m):
    return (v + m - 1) // m * m


def _full_spec(shape):
    ndim = len(shape)
    return pl.BlockSpec(shape, lambda: (0,) * ndim)


def _pick_tile(m, cap=512):
    """Largest multiple of 16 that divides m and is <= cap (falls back to m)."""
    for cand in range(min(m, cap), 0, -1):
        if m % cand == 0 and cand % 16 == 0:
            return cand
    return m


# ----------------------------------------------------------------------------
# Pallas kernels
# ----------------------------------------------------------------------------
def _conv_relu_pool_block(p, w, b):
    """relu(maxpool2x2(conv)) for one row-tile, via im2col matmul.

    p: (4, tm, kd) bf16 patches, one slab per 2x2 pool offset.
    w: (kd, 128) bf16 conv weight (im2col layout, lane-padded Cout).
    b: (1, 128) f32 bias (lane-padded).
    Returns (tm, 128) f32.
    """
    _, tm, kd = p.shape
    if tm % 16 == 0:
        # Single MXU pass over all 4 pool offsets (layout-preserving row merge for bf16).
        y = jnp.dot(p.reshape(4 * tm, kd), w, preferred_element_type=jnp.float32)
        r = jnp.maximum(jnp.maximum(y[0 * tm:1 * tm], y[1 * tm:2 * tm]),
                        jnp.maximum(y[2 * tm:3 * tm], y[3 * tm:4 * tm]))
    else:
        ys = [jnp.dot(p[i], w, preferred_element_type=jnp.float32) for i in range(4)]
        r = jnp.maximum(jnp.maximum(ys[0], ys[1]), jnp.maximum(ys[2], ys[3]))
    # Bias + ReLU hoisted out of the 4-way pool max: relu(max_i y_i + b) == max_i relu(y_i + b).
    return jnp.maximum(r + b, 0.0)


def conv_pool_kernel(p_ref, w_ref, b_ref, o_ref):
    """One conv(5x5, s=1, 'same') + ReLU + maxpool(2,2) row-tile."""
    o_ref[...] = _conv_relu_pool_block(
        p_ref[...], w_ref[...], b_ref[...]).astype(o_ref.dtype)


def conv_fc_softmax_kernel(p_ref, w4_ref, b4_ref, w1_ref, b1_ref, w2_ref, b2_ref,
                           w3_ref, b3_ref, o_ref):
    """Last conv+ReLU+pool stage fused with the whole fc_model (eval mode) + softmax."""
    # y rows are ordered (spatial position j, sample n); lanes are lane-padded channels.
    y = _conv_relu_pool_block(p_ref[...], w4_ref[...], b4_ref[...])   # (J*N, 128) f32
    yb = y.astype(jnp.bfloat16)

    j_blocks = w1_ref.shape[0]
    n = y.shape[0] // j_blocks
    # fc1: PyTorch's NCHW .view(N,-1) flatten is folded into w1 (one (128,128) block per
    # spatial position j), so no activation transpose / reshape is needed.
    acc = jnp.dot(yb[0:n], w1_ref[0], preferred_element_type=jnp.float32)
    for j in range(1, j_blocks):
        acc = acc + jnp.dot(yb[j * n:(j + 1) * n], w1_ref[j],
                            preferred_element_type=jnp.float32)
    h1 = jnp.maximum(acc + b1_ref[...], 0.0)
    h2 = jnp.maximum(
        jnp.dot(h1.astype(jnp.bfloat16), w2_ref[...],
                preferred_element_type=jnp.float32) + b2_ref[...], 0.0)
    logits = jnp.dot(h2.astype(jnp.bfloat16), w3_ref[...],
                     preferred_element_type=jnp.float32) + b3_ref[...]
    # b3 is -1e30 on padded class lanes, so they contribute exp(-inf)=0 to the softmax.
    m = jnp.max(logits, axis=-1, keepdims=True)
    e = jnp.exp(logits - m)
    s = jnp.sum(e, axis=-1, keepdims=True)
    o_ref[...] = e * pl.reciprocal(s, approx=True)


# ----------------------------------------------------------------------------
# Wrapper glue: im2col patch extraction (plain XLA), pallas_call plumbing
# ----------------------------------------------------------------------------
def _im2col_pool_patches(x_nhwc, k, pad, hwn_order=False):
    """Patches for conv(k, s=1, 'same') followed by maxpool(2,2), one slab per pool offset.

    Returns (patches, (n, ho, wo)); patches has shape (4, M, k*k*Cin) with rows ordered
    (n, ho, wo), or (ho, wo, n) if hwn_order (used by the fused final stage).
    """
    n, h, w, c = x_nhwc.shape
    xp = jnp.pad(x_nhwc, ((0, 0), (pad, pad), (pad, pad), (0, 0)))
    taps = [xp[:, kh:kh + h, kw:kw + w, :] for kh in range(k) for kw in range(k)]
    t = jnp.concatenate(taps, axis=-1)                     # (N, H, W, k*k*C)
    ho, wo = h // 2, w // 2
    offs = []
    for dy in range(2):
        for dx in range(2):
            s = t[:, dy::2, dx::2, :]                      # (N, Ho, Wo, Kd)
            if hwn_order:
                s = jnp.transpose(s, (1, 2, 0, 3)).reshape(ho * wo * n, -1)
            else:
                s = s.reshape(n * ho * wo, -1)
            offs.append(s)
    return jnp.stack(offs, axis=0), (n, ho, wo)


def conv_relu_maxpool(x_nhwc, w_oihw, b):
    """One conv+ReLU+pool stage.  x: (N,H,W,Cin) bf16; w: (Cout,Cin,K,K); b: (Cout,)."""
    cout, cin, k, _ = w_oihw.shape
    patches, (n, ho, wo) = _im2col_pool_patches(x_nhwc, k, k // 2)
    m, kd = patches.shape[1], patches.shape[2]
    kdp = _round_up(kd, LANES)
    patches = jnp.pad(patches, ((0, 0), (0, 0), (0, kdp - kd))).astype(jnp.bfloat16)
    wmat = jnp.transpose(w_oihw, (2, 3, 1, 0)).reshape(kd, cout)
    wmat = jnp.pad(wmat, ((0, kdp - kd), (0, LANES - cout))).astype(jnp.bfloat16)
    bvec = jnp.pad(b, (0, LANES - cout)).reshape(1, LANES).astype(jnp.float32)

    tm = _pick_tile(m)
    out = pl.pallas_call(
        conv_pool_kernel,
        out_shape=jax.ShapeDtypeStruct((m, LANES), jnp.bfloat16),
        grid=(m // tm,),
        in_specs=[pl.BlockSpec((4, tm, kdp), lambda i: (0, i, 0)),
                  pl.BlockSpec((kdp, LANES), lambda i: (0, 0)),
                  pl.BlockSpec((1, LANES), lambda i: (0, 0))],
        out_specs=pl.BlockSpec((tm, LANES), lambda i: (i, 0)),
        compiler_params=pltpu.CompilerParams(dimension_semantics=("parallel",)),
    )(patches, wmat, bvec)
    # Kernel stores are lane-dense (128); drop zero-padded channels for the next stage.
    return out.reshape(n, ho, wo, LANES)[:, :, :, :cout]


def conv_fc_softmax(x_nhwc, w4_oihw, b4, fc_params):
    """Fused last conv stage + flatten + fc_model + softmax.  Returns (N, num_classes)."""
    (w1, b1), (w2, b2), (w3, b3) = fc_params
    cout, cin, k, _ = w4_oihw.shape
    patches, (n, ho, wo) = _im2col_pool_patches(x_nhwc, k, k // 2, hwn_order=True)
    _, kd = patches.shape[1], patches.shape[2]
    kdp = _round_up(kd, LANES)
    patches = jnp.pad(patches, ((0, 0), (0, 0), (0, kdp - kd))).astype(jnp.bfloat16)
    w4m = jnp.transpose(w4_oihw, (2, 3, 1, 0)).reshape(kd, cout)
    w4m = jnp.pad(w4m, ((0, kdp - kd), (0, LANES - cout))).astype(jnp.bfloat16)
    b4v = jnp.pad(b4, (0, LANES - cout)).reshape(1, LANES).astype(jnp.float32)

    j_blocks = ho * wo
    d1 = w1.shape[0]
    # Fold PyTorch's NCHW flatten (feature index f = c*J + j) into w1: one block per j.
    w1p = jnp.transpose(w1).reshape(cout, j_blocks, d1).transpose(1, 0, 2)   # (J, cout, d1)
    w1p = jnp.pad(w1p, ((0, 0), (0, LANES - cout), (0, 0))).astype(jnp.bfloat16)
    b1v = b1.reshape(1, d1).astype(jnp.float32)
    w2t = jnp.transpose(w2).astype(jnp.bfloat16)
    b2v = b2.reshape(1, -1).astype(jnp.float32)
    nc = w3.shape[0]
    ncp = _round_up(nc, LANES)
    w3t = jnp.pad(jnp.transpose(w3), ((0, 0), (0, ncp - nc))).astype(jnp.bfloat16)
    b3v = jnp.pad(b3.astype(jnp.float32), (0, ncp - nc),
                  constant_values=-1e30).reshape(1, ncp)

    out = pl.pallas_call(
        conv_fc_softmax_kernel,
        out_shape=jax.ShapeDtypeStruct((n, ncp), jnp.float32),
        in_specs=[_full_spec(patches.shape),
                  _full_spec(w4m.shape), _full_spec(b4v.shape),
                  _full_spec(w1p.shape), _full_spec(b1v.shape),
                  _full_spec(w2t.shape), _full_spec(b2v.shape),
                  _full_spec(w3t.shape), _full_spec(b3v.shape)],
        out_specs=_full_spec((n, ncp)),
    )(patches, w4m, b4v, w1p, b1v, w2t, b2v, w3t, b3v)
    return out[:, :nc]


# ----------------------------------------------------------------------------
# Parameter construction (deterministic, PyTorch-default-style fan-in uniform)
# ----------------------------------------------------------------------------
def _uniform(key, shape, fan_in):
    bound = 1.0 / jnp.sqrt(jnp.float32(fan_in))
    return jax.random.uniform(key, shape, jnp.float32, -bound, bound)


def init_params(key, num_classes, flat_size):
    conv_cfg = [(1, 8, 5), (8, 16, 5), (16, 32, 5), (32, 64, 5)]
    conv_params = []
    for cin, cout, k in conv_cfg:
        key, kw, kb = jax.random.split(key, 3)
        fan_in = cin * k * k
        conv_params.append((_uniform(kw, (cout, cin, k, k), fan_in),
                            _uniform(kb, (cout,), fan_in)))
    fc_cfg = [(flat_size, 128), (128, 256), (256, num_classes)]
    fc_params = []
    for fin, fout in fc_cfg:
        key, kw, kb = jax.random.split(key, 3)
        fc_params.append((_uniform(kw, (fout, fin), fin),
                          _uniform(kb, (fout,), fin)))
    return conv_params, fc_params


# ----------------------------------------------------------------------------
# Forward pass (convClassifier.forward, eval mode)
# ----------------------------------------------------------------------------
@jax.jit
def conv_classifier_forward(x_nchw, conv_params, fc_params):
    # NCHW -> NHWC; activations are bf16 matmul operands, accumulation stays f32 in-kernel.
    x = jnp.transpose(x_nchw, (0, 2, 3, 1)).astype(jnp.bfloat16)
    for w, b in conv_params[:-1]:
        x = conv_relu_maxpool(x, w, b)
    w4, b4 = conv_params[-1]
    # TODO(synk): nn.Dropout(p=0.2) layers are identity in eval mode; training-mode dropout
    # is not implemented.
    return conv_fc_softmax(x, w4, b4, fc_params)


if __name__ == "__main__":
    # Small shapes consistent with the module: 4 conv+pool stages need spatial divisible by 16.
    N, C, H, W = 2, 1, 32, 32
    NUM_CLASSES = 86
    FLAT = 64 * (H // 16) * (W // 16)  # 64 channels * 2 * 2 = 256

    key = jax.random.PRNGKey(0)
    key, kx = jax.random.split(key)
    x = jax.random.normal(kx, (N, C, H, W), jnp.float32)

    conv_params, fc_params = init_params(key, NUM_CLASSES, FLAT)

    y = conv_classifier_forward(x, conv_params, fc_params)
    y = jax.block_until_ready(y)

    assert y.shape == (N, NUM_CLASSES), y.shape
    # Softmax output: rows sum to ~1 (bf16 matmul operands + approximate reciprocal).
    assert jnp.allclose(jnp.sum(y, axis=-1), 1.0, atol=1e-2)
    print("KERNEL_OK")
</pallas_src>

<mosaic_0001>
module attributes {stable_mosaic.version = 11 : i64} {
  func.func @conv_pool_kernel(%arg0: i32, %arg1: memref<4x512x128xbf16, #tpu.memory_space<vmem>>, %arg2: memref<128x128xbf16, #tpu.memory_space<vmem>>, %arg3: memref<1x128xf32, #tpu.memory_space<vmem>>, %arg4: memref<512x128xbf16, #tpu.memory_space<vmem>>) attributes {dimension_semantics = [#tpu.dimension_semantics<parallel>], iteration_bounds = array<i64: 1>, scalar_prefetch = 0 : i64, scratch_operands = 0 : i64, tpu.core_type = #tpu.core_type<tc>, window_params = [{transform_indices = @transform_0, window_bounds = array<i64: 4, 512, 128>}, {pipeline_mode = #tpu.pipeline_mode<synchronous>, transform_indices = @transform_1, window_bounds = array<i64: 128, 128>}, {pipeline_mode = #tpu.pipeline_mode<synchronous>, transform_indices = @transform_2, window_bounds = array<i64: 1, 128>}, {transform_indices = @transform_3, window_bounds = array<i64: 512, 128>}]} {
    %c0 = arith.constant 0 : index
    %c0_0 = arith.constant 0 : index
    %c0_1 = arith.constant 0 : index
    %0 = vector.load %arg1[%c0, %c0_0, %c0_1] : memref<4x512x128xbf16, #tpu.memory_space<vmem>>, vector<4x512x128xbf16>
    %c0_2 = arith.constant 0 : index
    %c0_3 = arith.constant 0 : index
    %1 = vector.load %arg2[%c0_2, %c0_3] : memref<128x128xbf16, #tpu.memory_space<vmem>>, vector<128x128xbf16>
    %c0_4 = arith.constant 0 : index
    %c0_5 = arith.constant 0 : index
    %2 = vector.load %arg3[%c0_4, %c0_5] : memref<1x128xf32, #tpu.memory_space<vmem>>, vector<1x128xf32>
    %3 = vector.shape_cast %0 : vector<4x512x128xbf16> to vector<2048x128xbf16>
    %cst = arith.constant dense<0.000000e+00> : vector<2048x128xf32>
    %4 = tpu.matmul %3, %1, %cst {dimension_numbers = #tpu.dot_dimension_numbers<[1], [0], [0], [1], [0, 0, 1, 1], [], []>} : vector<2048x128xbf16>, vector<128x128xbf16>, vector<2048x128xf32> -> vector<2048x128xf32>
    %5 = vector.extract_strided_slice %4 {offsets = [0, 0], sizes = [512, 128], strides = [1, 1]} : vector<2048x128xf32> to vector<512x128xf32>
    %6 = vector.extract_strided_slice %4 {offsets = [512, 0], sizes = [512, 128], strides = [1, 1]} : vector<2048x128xf32> to vector<512x128xf32>
    %7 = arith.maximumf %5, %6 : vector<512x128xf32>
    %8 = vector.extract_strided_slice %4 {offsets = [1024, 0], sizes = [512, 128], strides = [1, 1]} : vector<2048x128xf32> to vector<512x128xf32>
    %9 = vector.extract_strided_slice %4 {offsets = [1536, 0], sizes = [512, 128], strides = [1, 1]} : vector<2048x128xf32> to vector<512x128xf32>
    %10 = arith.maximumf %8, %9 : vector<512x128xf32>
    %11 = arith.maximumf %7, %10 : vector<512x128xf32>
    %12 = vector.broadcast %2 : vector<1x128xf32> to vector<512x128xf32>
    %13 = arith.addf %11, %12 : vector<512x128xf32>
    %cst_6 = arith.constant 0.000000e+00 : f32
    %14 = vector.broadcast %cst_6 : f32 to vector<512x128xf32>
    %15 = arith.maximumf %13, %14 : vector<512x128xf32>
    %16 = arith.truncf %15 : vector<512x128xf32> to vector<512x128xbf16>
    %c0_7 = arith.constant 0 : index
    %c0_8 = arith.constant 0 : index
    %17 = vector.load %arg4[%c0_7, %c0_8] : memref<512x128xbf16, #tpu.memory_space<vmem>>, vector<512x128xbf16>
    tpu.vector_store %arg4[%c0_7, %c0_8], %16 {strides = array<i32>} : memref<512x128xbf16, #tpu.memory_space<vmem>>, vector<512x128xbf16>,
    return
  }
  func.func @transform_0(%arg0: i32) -> (i32, i32, i32) {
    %c0_i32 = arith.constant 0 : i32
    %c0_i32_0 = arith.constant 0 : i32
    %c0_i32_1 = arith.constant 0 : i32
    return %c0_i32, %arg0, %c0_i32_0 : i32, i32, i32
  }
  func.func @transform_1(%arg0: i32) -> (i32, i32) {
    %c0_i32 = arith.constant 0 : i32
    %c0_i32_0 = arith.constant 0 : i32
    %c0_i32_1 = arith.constant 0 : i32
    return %c0_i32, %c0_i32_0 : i32, i32
  }
  func.func @transform_2(%arg0: i32) -> (i32, i32) {
    %c0_i32 = arith.constant 0 : i32
    %c0_i32_0 = arith.constant 0 : i32
    %c0_i32_1 = arith.constant 0 : i32
    return %c0_i32, %c0_i32_0 : i32, i32
  }
  func.func @transform_3(%arg0: i32) -> (i32, i32) {
    %c0_i32 = arith.constant 0 : i32
    %c0_i32_0 = arith.constant 0 : i32
    return %arg0, %c0_i32 : i32, i32
  }
}

module attributes {stable_mosaic.version = 11 : i64} {
  func.func @conv_pool_kernel(%arg0: i32, %arg1: memref<4x128x256xbf16, #tpu.memory_space<vmem>>, %arg2: memref<256x128xbf16, #tpu.memory_space<vmem>>, %arg3: memref<1x128xf32, #tpu.memory_space<vmem>>, %arg4: memref<128x128xbf16, #tpu.memory_space<vmem>>) attributes {dimension_semantics = [#tpu.dimension_semantics<parallel>], iteration_bounds = array<i64: 1>, scalar_prefetch = 0 : i64, scratch_operands = 0 : i64, tpu.core_type = #tpu.core_type<tc>, window_params = [{transform_indices = @transform_0, window_bounds = array<i64: 4, 128, 256>}, {pipeline_mode = #tpu.pipeline_mode<synchronous>, transform_indices = @transform_1, window_bounds = array<i64: 256, 128>}, {pipeline_mode = #tpu.pipeline_mode<synchronous>, transform_indices = @transform_2, window_bounds = array<i64: 1, 128>}, {transform_indices = @transform_3, window_bounds = array<i64: 128, 128>}]} {
    %c0 = arith.constant 0 : index
    %c0_0 = arith.constant 0 : index
    %c0_1 = arith.constant 0 : index
    %0 = vector.load %arg1[%c0, %c0_0, %c0_1] : memref<4x128x256xbf16, #tpu.memory_space<vmem>>, vector<4x128x256xbf16>
    %c0_2 = arith.constant 0 : index
    %c0_3 = arith.constant 0 : index
    %1 = vector.load %arg2[%c0_2, %c0_3] : memref<256x128xbf16, #tpu.memory_space<vmem>>, vector<256x128xbf16>
    %c0_4 = arith.constant 0 : index
    %c0_5 = arith.constant 0 : index
    %2 = vector.load %arg3[%c0_4, %c0_5] : memref<1x128xf32, #tpu.memory_space<vmem>>, vector<1x128xf32>
    %3 = vector.shape_cast %0 : vector<4x128x256xbf16> to vector<512x256xbf16>
    %cst = arith.constant dense<0.000000e+00> : vector<512x128xf32>
    %4 = tpu.matmul %3, %1, %cst {dimension_numbers = #tpu.dot_dimension_numbers<[1], [0], [0], [1], [0, 0, 1, 1], [], []>} : vector<512x256xbf16>, vector<256x128xbf16>, vector<512x128xf32> -> vector<512x128xf32>
    %5 = vector.extract_strided_slice %4 {offsets = [0, 0], sizes = [128, 128], strides = [1, 1]} : vector<512x128xf32> to vector<128x128xf32>
    %6 = vector.extract_strided_slice %4 {offsets = [128, 0], sizes = [128, 128], strides = [1, 1]} : vector<512x128xf32> to vector<128x128xf32>
    %7 = arith.maximumf %5, %6 : vector<128x128xf32>
    %8 = vector.extract_strided_slice %4 {offsets = [256, 0], sizes = [128, 128], strides = [1, 1]} : vector<512x128xf32> to vector<128x128xf32>
    %9 = vector.extract_strided_slice %4 {offsets = [384, 0], sizes = [128, 128], strides = [1, 1]} : vector<512x128xf32> to vector<128x128xf32>
    %10 = arith.maximumf %8, %9 : vector<128x128xf32>
    %11 = arith.maximumf %7, %10 : vector<128x128xf32>
    %12 = vector.broadcast %2 : vector<1x128xf32> to vector<128x128xf32>
    %13 = arith.addf %11, %12 : vector<128x128xf32>
    %cst_6 = arith.constant 0.000000e+00 : f32
    %14 = vector.broadcast %cst_6 : f32 to vector<128x128xf32>
    %15 = arith.maximumf %13, %14 : vector<128x128xf32>
    %16 = arith.truncf %15 : vector<128x128xf32> to vector<128x128xbf16>
    %c0_7 = arith.constant 0 : index
    %c0_8 = arith.constant 0 : index
    %17 = vector.load %arg4[%c0_7, %c0_8] : memref<128x128xbf16, #tpu.memory_space<vmem>>, vector<128x128xbf16>
    tpu.vector_store %arg4[%c0_7, %c0_8], %16 {strides = array<i32>} : memref<128x128xbf16, #tpu.memory_space<vmem>>, vector<128x128xbf16>,
    return
  }
  func.func @transform_0(%arg0: i32) -> (i32, i32, i32) {
    %c0_i32 = arith.constant 0 : i32
    %c0_i32_0 = arith.constant 0 : i32
    %c0_i32_1 = arith.constant 0 : i32
    return %c0_i32, %arg0, %c0_i32_0 : i32, i32, i32
  }
  func.func @transform_1(%arg0: i32) -> (i32, i32) {
    %c0_i32 = arith.constant 0 : i32
    %c0_i32_0 = arith.constant 0 : i32
    %c0_i32_1 = arith.constant 0 : i32
    return %c0_i32, %c0_i32_0 : i32, i32
  }
  func.func @transform_2(%arg0: i32) -> (i32, i32) {
    %c0_i32 = arith.constant 0 : i32
    %c0_i32_0 = arith.constant 0 : i32
    %c0_i32_1 = arith.constant 0 : i32
    return %c0_i32, %c0_i32_0 : i32, i32
  }
  func.func @transform_3(%arg0: i32) -> (i32, i32) {
    %c0_i32 = arith.constant 0 : i32
    %c0_i32_0 = arith.constant 0 : i32
    return %arg0, %c0_i32 : i32, i32
  }
}

module attributes {stable_mosaic.version = 11 : i64} {
  func.func @conv_pool_kernel(%arg0: i32, %arg1: memref<4x32x512xbf16, #tpu.memory_space<vmem>>, %arg2: memref<512x128xbf16, #tpu.memory_space<vmem>>, %arg3: memref<1x128xf32, #tpu.memory_space<vmem>>, %arg4: memref<32x128xbf16, #tpu.memory_space<vmem>>) attributes {dimension_semantics = [#tpu.dimension_semantics<parallel>], iteration_bounds = array<i64: 1>, scalar_prefetch = 0 : i64, scratch_operands = 0 : i64, tpu.core_type = #tpu.core_type<tc>, window_params = [{transform_indices = @transform_0, window_bounds = array<i64: 4, 32, 512>}, {pipeline_mode = #tpu.pipeline_mode<synchronous>, transform_indices = @transform_1, window_bounds = array<i64: 512, 128>}, {pipeline_mode = #tpu.pipeline_mode<synchronous>, transform_indices = @transform_2, window_bounds = array<i64: 1, 128>}, {transform_indices = @transform_3, window_bounds = array<i64: 32, 128>}]} {
    %c0 = arith.constant 0 : index
    %c0_0 = arith.constant 0 : index
    %c0_1 = arith.constant 0 : index
    %0 = vector.load %arg1[%c0, %c0_0, %c0_1] : memref<4x32x512xbf16, #tpu.memory_space<vmem>>, vector<4x32x512xbf16>
    %c0_2 = arith.constant 0 : index
    %c0_3 = arith.constant 0 : index
    %1 = vector.load %arg2[%c0_2, %c0_3] : memref<512x128xbf16, #tpu.memory_space<vmem>>, vector<512x128xbf16>
    %c0_4 = arith.constant 0 : index
    %c0_5 = arith.constant 0 : index
    %2 = vector.load %arg3[%c0_4, %c0_5] : memref<1x128xf32, #tpu.memory_space<vmem>>, vector<1x128xf32>
    %3 = vector.shape_cast %0 : vector<4x32x512xbf16> to vector<128x512xbf16>
    %cst = arith.constant dense<0.000000e+00> : vector<128x128xf32>
    %4 = tpu.matmul %3, %1, %cst {dimension_numbers = #tpu.dot_dimension_numbers<[1], [0], [0], [1], [0, 0, 1, 1], [], []>} : vector<128x512xbf16>, vector<512x128xbf16>, vector<128x128xf32> -> vector<128x128xf32>
    %5 = vector.extract_strided_slice %4 {offsets = [0, 0], sizes = [32, 128], strides = [1, 1]} : vector<128x128xf32> to vector<32x128xf32>
    %6 = vector.extract_strided_slice %4 {offsets = [32, 0], sizes = [32, 128], strides = [1, 1]} : vector<128x128xf32> to vector<32x128xf32>
    %7 = arith.maximumf %5, %6 : vector<32x128xf32>
    %8 = vector.extract_strided_slice %4 {offsets = [64, 0], sizes = [32, 128], strides = [1, 1]} : vector<128x128xf32> to vector<32x128xf32>
    %9 = vector.extract_strided_slice %4 {offsets = [96, 0], sizes = [32, 128], strides = [1, 1]} : vector<128x128xf32> to vector<32x128xf32>
    %10 = arith.maximumf %8, %9 : vector<32x128xf32>
    %11 = arith.maximumf %7, %10 : vector<32x128xf32>
    %12 = vector.broadcast %2 : vector<1x128xf32> to vector<32x128xf32>
    %13 = arith.addf %11, %12 : vector<32x128xf32>
    %cst_6 = arith.constant 0.000000e+00 : f32
    %14 = vector.broadcast %cst_6 : f32 to vector<32x128xf32>
    %15 = arith.maximumf %13, %14 : vector<32x128xf32>
    %16 = arith.truncf %15 : vector<32x128xf32> to vector<32x128xbf16>
    %c0_7 = arith.constant 0 : index
    %c0_8 = arith.constant 0 : index
    %17 = vector.load %arg4[%c0_7, %c0_8] : memref<32x128xbf16, #tpu.memory_space<vmem>>, vector<32x128xbf16>
    tpu.vector_store %arg4[%c0_7, %c0_8], %16 {strides = array<i32>} : memref<32x128xbf16, #tpu.memory_space<vmem>>, vector<32x128xbf16>,
    return
  }
  func.func @transform_0(%arg0: i32) -> (i32, i32, i32) {
    %c0_i32 = arith.constant 0 : i32
    %c0_i32_0 = arith.constant 0 : i32
    %c0_i32_1 = arith.constant 0 : i32
    return %c0_i32, %arg0, %c0_i32_0 : i32, i32, i32
  }
  func.func @transform_1(%arg0: i32) -> (i32, i32) {
    %c0_i32 = arith.constant 0 : i32
    %c0_i32_0 = arith.constant 0 : i32
    %c0_i32_1 = arith.constant 0 : i32
    return %c0_i32, %c0_i32_0 : i32, i32
  }
  func.func @transform_2(%arg0: i32) -> (i32, i32) {
    %c0_i32 = arith.constant 0 : i32
    %c0_i32_0 = arith.constant 0 : i32
    %c0_i32_1 = arith.constant 0 : i32
    return %c0_i32, %c0_i32_0 : i32, i32
  }
  func.func @transform_3(%arg0: i32) -> (i32, i32) {
    %c0_i32 = arith.constant 0 : i32
    %c0_i32_0 = arith.constant 0 : i32
    return %arg0, %c0_i32 : i32, i32
  }
}

module attributes {stable_mosaic.version = 11 : i64} {
  func.func @conv_fc_softmax_kernel(%arg0: memref<4x8x896xbf16, #tpu.memory_space<vmem>>, %arg1: memref<896x128xbf16, #tpu.memory_space<vmem>>, %arg2: memref<1x128xf32, #tpu.memory_space<vmem>>, %arg3: memref<4x128x128xbf16, #tpu.memory_space<vmem>>, %arg4: memref<1x128xf32, #tpu.memory_space<vmem>>, %arg5: memref<128x256xbf16, #tpu.memory_space<vmem>>, %arg6: memref<1x256xf32, #tpu.memory_space<vmem>>, %arg7: memref<256x128xbf16, #tpu.memory_space<vmem>>, %arg8: memref<1x128xf32, #tpu.memory_space<vmem>>, %arg9: memref<2x128xf32, #tpu.memory_space<vmem>>) attributes {dimension_semantics = [], scalar_prefetch = 0 : i64, scratch_operands = 0 : i64, tpu.core_type = #tpu.core_type<tc>} {
    %c0 = arith.constant 0 : index
    %c0_0 = arith.constant 0 : index
    %c0_1 = arith.constant 0 : index
    %0 = vector.load %arg0[%c0, %c0_0, %c0_1] : memref<4x8x896xbf16, #tpu.memory_space<vmem>>, vector<4x8x896xbf16>
    %c0_2 = arith.constant 0 : index
    %c0_3 = arith.constant 0 : index
    %1 = vector.load %arg1[%c0_2, %c0_3] : memref<896x128xbf16, #tpu.memory_space<vmem>>, vector<896x128xbf16>
    %c0_4 = arith.constant 0 : index
    %c0_5 = arith.constant 0 : index
    %2 = vector.load %arg2[%c0_4, %c0_5] : memref<1x128xf32, #tpu.memory_space<vmem>>, vector<1x128xf32>
    %3 = vector.extract_strided_slice %0 {offsets = [0, 0, 0], sizes = [1, 8, 896], strides = [1, 1, 1]} : vector<4x8x896xbf16> to vector<1x8x896xbf16>
    %4 = vector.shape_cast %3 : vector<1x8x896xbf16> to vector<8x896xbf16>
    %cst = arith.constant dense<0.000000e+00> : vector<8x128xf32>
    %5 = tpu.matmul %4, %1, %cst {dimension_numbers = #tpu.dot_dimension_numbers<[1], [0], [0], [1], [0, 0, 1, 1], [], []>} : vector<8x896xbf16>, vector<896x128xbf16>, vector<8x128xf32> -> vector<8x128xf32>
    %6 = vector.extract_strided_slice %0 {offsets = [1, 0, 0], sizes = [1, 8, 896], strides = [1, 1, 1]} : vector<4x8x896xbf16> to vector<1x8x896xbf16>
    %7 = vector.shape_cast %6 : vector<1x8x896xbf16> to vector<8x896xbf16>
    %cst_6 = arith.constant dense<0.000000e+00> : vector<8x128xf32>
    %8 = tpu.matmul %7, %1, %cst_6 {dimension_numbers = #tpu.dot_dimension_numbers<[1], [0], [0], [1], [0, 0, 1, 1], [], []>} : vector<8x896xbf16>, vector<896x128xbf16>, vector<8x128xf32> -> vector<8x128xf32>
    %9 = vector.extract_strided_slice %0 {offsets = [2, 0, 0], sizes = [1, 8, 896], strides = [1, 1, 1]} : vector<4x8x896xbf16> to vector<1x8x896xbf16>
    %10 = vector.shape_cast %9 : vector<1x8x896xbf16> to vector<8x896xbf16>
    %cst_7 = arith.constant dense<0.000000e+00> : vector<8x128xf32>
    %11 = tpu.matmul %10, %1, %cst_7 {dimension_numbers = #tpu.dot_dimension_numbers<[1], [0], [0], [1], [0, 0, 1, 1], [], []>} : vector<8x896xbf16>, vector<896x128xbf16>, vector<8x128xf32> -> vector<8x128xf32>
    %12 = vector.extract_strided_slice %0 {offsets = [3, 0, 0], sizes = [1, 8, 896], strides = [1, 1, 1]} : vector<4x8x896xbf16> to vector<1x8x896xbf16>
    %13 = vector.shape_cast %12 : vector<1x8x896xbf16> to vector<8x896xbf16>
    %cst_8 = arith.constant dense<0.000000e+00> : vector<8x128xf32>
    %14 = tpu.matmul %13, %1, %cst_8 {dimension_numbers = #tpu.dot_dimension_numbers<[1], [0], [0], [1], [0, 0, 1, 1], [], []>} : vector<8x896xbf16>, vector<896x128xbf16>, vector<8x128xf32> -> vector<8x128xf32>
    %15 = arith.maximumf %5, %8 : vector<8x128xf32>
    %16 = arith.maximumf %11, %14 : vector<8x128xf32>
    %17 = arith.maximumf %15, %16 : vector<8x128xf32>
    %18 = vector.broadcast %2 : vector<1x128xf32> to vector<8x128xf32>
    %19 = arith.addf %17, %18 : vector<8x128xf32>
    %cst_9 = arith.constant 0.000000e+00 : f32
    %20 = vector.broadcast %cst_9 : f32 to vector<8x128xf32>
    %21 = arith.maximumf %19, %20 : vector<8x128xf32>
    %22 = arith.truncf %21 : vector<8x128xf32> to vector<8x128xbf16>
    %23 = vector.extract_strided_slice %22 {offsets = [0, 0], sizes = [2, 128], strides = [1, 1]} : vector<8x128xbf16> to vector<2x128xbf16>
    %c0_10 = arith.constant 0 : index
    %c0_11 = arith.constant 0 : index
    %c0_12 = arith.constant 0 : index
    %24 = vector.load %arg3[%c0_10, %c0_11, %c0_12] : memref<4x128x128xbf16, #tpu.memory_space<vmem>>, vector<1x128x128xbf16>
    %25 = vector.shape_cast %24 : vector<1x128x128xbf16> to vector<128x128xbf16>
    %cst_13 = arith.constant dense<0.000000e+00> : vector<2x128xf32>
    %26 = tpu.matmul %23, %25, %cst_13 {dimension_numbers = #tpu.dot_dimension_numbers<[1], [0], [0], [1], [0, 0, 1, 1], [], []>} : vector<2x128xbf16>, vector<128x128xbf16>, vector<2x128xf32> -> vector<2x128xf32>
    %27 = vector.extract_strided_slice %22 {offsets = [2, 0], sizes = [2, 128], strides = [1, 1]} : vector<8x128xbf16> to vector<2x128xbf16>
    %c1 = arith.constant 1 : index
    %c0_14 = arith.constant 0 : index
    %c0_15 = arith.constant 0 : index
    %28 = vector.load %arg3[%c1, %c0_14, %c0_15] : memref<4x128x128xbf16, #tpu.memory_space<vmem>>, vector<1x128x128xbf16>
    %29 = vector.shape_cast %28 : vector<1x128x128xbf16> to vector<128x128xbf16>
    %cst_16 = arith.constant dense<0.000000e+00> : vector<2x128xf32>
    %30 = tpu.matmul %27, %29, %cst_16 {dimension_numbers = #tpu.dot_dimension_numbers<[1], [0], [0], [1], [0, 0, 1, 1], [], []>} : vector<2x128xbf16>, vector<128x128xbf16>, vector<2x128xf32> -> vector<2x128xf32>
    %31 = arith.addf %26, %30 : vector<2x128xf32>
    %32 = vector.extract_strided_slice %22 {offsets = [4, 0], sizes = [2, 128], strides = [1, 1]} : vector<8x128xbf16> to vector<2x128xbf16>
    %c2 = arith.constant 2 : index
    %c0_17 = arith.constant 0 : index
    %c0_18 = arith.constant 0 : index
    %33 = vector.load %arg3[%c2, %c0_17, %c0_18] : memref<4x128x128xbf16, #tpu.memory_space<vmem>>, vector<1x128x128xbf16>
    %34 = vector.shape_cast %33 : vector<1x128x128xbf16> to vector<128x128xbf16>
    %cst_19 = arith.constant dense<0.000000e+00> : vector<2x128xf32>
    %35 = tpu.matmul %32, %34, %cst_19 {dimension_numbers = #tpu.dot_dimension_numbers<[1], [0], [0], [1], [0, 0, 1, 1], [], []>} : vector<2x128xbf16>, vector<128x128xbf16>, vector<2x128xf32> -> vector<2x128xf32>
    %36 = arith.addf %31, %35 : vector<2x128xf32>
    %37 = vector.extract_strided_slice %22 {offsets = [6, 0], sizes = [2, 128], strides = [1, 1]} : vector<8x128xbf16> to vector<2x128xbf16>
    %c3 = arith.constant 3 : index
    %c0_20 = arith.constant 0 : index
    %c0_21 = arith.constant 0 : index
    %38 = vector.load %arg3[%c3, %c0_20, %c0_21] : memref<4x128x128xbf16, #tpu.memory_space<vmem>>, vector<1x128x128xbf16>
    %39 = vector.shape_cast %38 : vector<1x128x128xbf16> to vector<128x128xbf16>
    %cst_22 = arith.constant dense<0.000000e+00> : vector<2x128xf32>
    %40 = tpu.matmul %37, %39, %cst_22 {dimension_numbers = #tpu.dot_dimension_numbers<[1], [0], [0], [1], [0, 0, 1, 1], [], []>} : vector<2x128xbf16>, vector<128x128xbf16>, vector<2x128xf32> -> vector<2x128xf32>
    %41 = arith.addf %36, %40 : vector<2x128xf32>
    %c0_23 = arith.constant 0 : index
    %c0_24 = arith.constant 0 : index
    %42 = vector.load %arg4[%c0_23, %c0_24] : memref<1x128xf32, #tpu.memory_space<vmem>>, vector<1x128xf32>
    %43 = vector.broadcast %42 : vector<1x128xf32> to vector<2x128xf32>
    %44 = arith.addf %41, %43 : vector<2x128xf32>
    %cst_25 = arith.constant 0.000000e+00 : f32
    %45 = vector.broadcast %cst_25 : f32 to vector<2x128xf32>
    %46 = arith.maximumf %44, %45 : vector<2x128xf32>
    %47 = arith.truncf %46 : vector<2x128xf32> to vector<2x128xbf16>
    %c0_26 = arith.constant 0 : index
    %c0_27 = arith.constant 0 : index
    %48 = vector.load %arg5[%c0_26, %c0_27] : memref<128x256xbf16, #tpu.memory_space<vmem>>, vector<128x256xbf16>
    %cst_28 = arith.constant dense<0.000000e+00> : vector<2x256xf32>
    %49 = tpu.matmul %47, %48, %cst_28 {dimension_numbers = #tpu.dot_dimension_numbers<[1], [0], [0], [1], [0, 0, 1, 1], [], []>} : vector<2x128xbf16>, vector<128x256xbf16>, vector<2x256xf32> -> vector<2x256xf32>
    %c0_29 = arith.constant 0 : index
    %c0_30 = arith.constant 0 : index
    %50 = vector.load %arg6[%c0_29, %c0_30] : memref<1x256xf32, #tpu.memory_space<vmem>>, vector<1x256xf32>
    %51 = vector.broadcast %50 : vector<1x256xf32> to vector<2x256xf32>
    %52 = arith.addf %49, %51 : vector<2x256xf32>
    %cst_31 = arith.constant 0.000000e+00 : f32
    %53 = vector.broadcast %cst_31 : f32 to vector<2x256xf32>
    %54 = arith.maximumf %52, %53 : vector<2x256xf32>
    %55 = arith.truncf %54 : vector<2x256xf32> to vector<2x256xbf16>
    %c0_32 = arith.constant 0 : index
    %c0_33 = arith.constant 0 : index
    %56 = vector.load %arg7[%c0_32, %c0_33] : memref<256x128xbf16, #tpu.memory_space<vmem>>, vector<256x128xbf16>
    %cst_34 = arith.constant dense<0.000000e+00> : vector<2x128xf32>
    %57 = tpu.matmul %55, %56, %cst_34 {dimension_numbers = #tpu.dot_dimension_numbers<[1], [0], [0], [1], [0, 0, 1, 1], [], []>} : vector<2x256xbf16>, vector<256x128xbf16>, vector<2x128xf32> -> vector<2x128xf32>
    %c0_35 = arith.constant 0 : index
    %c0_36 = arith.constant 0 : index
    %58 = vector.load %arg8[%c0_35, %c0_36] : memref<1x128xf32, #tpu.memory_space<vmem>>, vector<1x128xf32>
    %59 = vector.broadcast %58 : vector<1x128xf32> to vector<2x128xf32>
    %60 = arith.addf %57, %59 : vector<2x128xf32>
    %cst_37 = arith.constant dense<0xFF800000> : vector<2xf32>
    %61 = vector.multi_reduction <maximumf>, %60, %cst_37 [1] : vector<2x128xf32> to vector<2xf32>
    %62 = vector.shape_cast %61 : vector<2xf32> to vector<2x1xf32>
    %63 = vector.broadcast %62 : vector<2x1xf32> to vector<2x128xf32>
    %64 = arith.subf %60, %63 : vector<2x128xf32>
    %65 = math.exp %64 : vector<2x128xf32>
    %cst_38 = arith.constant dense<0.000000e+00> : vector<2xf32>
    %66 = vector.multi_reduction <add>, %65, %cst_38 [1] : vector<2x128xf32> to vector<2xf32>
    %67 = vector.shape_cast %66 : vector<2xf32> to vector<2x1xf32>
    %68 = tpu.reciprocal %67 {approx = true} : vector<2x1xf32> -> vector<2x1xf32>
    %69 = vector.broadcast %68 : vector<2x1xf32> to vector<2x128xf32>
    %70 = arith.mulf %65, %69 : vector<2x128xf32>
    %c0_39 = arith.constant 0 : index
    %c0_40 = arith.constant 0 : index
    %71 = vector.load %arg9[%c0_39, %c0_40] : memref<2x128xf32, #tpu.memory_space<vmem>>, vector<2x128xf32>
    tpu.vector_store %arg9[%c0_39, %c0_40], %70 {strides = array<i32>} : memref<2x128xf32, #tpu.memory_space<vmem>>, vector<2x128xf32>,
    return
  }
}

</mosaic_0001>

<bundles_post_ra>
// kernel: conv_classifier_forward.4
= control target key start
LH: loop header
LB: loop body
LE: loop exit
PB: predicated region body
PF: predicated region fallthrough
CT: control target
= control target key end

     0   :  { %s4804_s1 = inlined_call_operand.vmem [shape: bf16[128,128], index: 1, kind: input, shape index: {}]   ;;  %s4805_s0 = inlined_call_operand.vmem [shape: bf16[4,512,128], index: 0, kind: input, shape index: {}]   ;;  %s4806_s2 = inlined_call_operand.vmem [shape: f32[1,128], index: 2, kind: input, shape index: {}]   ;;  %s4807_s3 = inlined_call_operand.vmem [shape: bf16[512,128], index: 3, kind: output, shape index: {}]  }
   0x1   :  { %v3691_v0 = vld [vmem:[%s4804_s1] sm:$0xff]   ;;  %v3692_v1 = vld [vmem:[%s4804_s1 + $0x8] sm:$0xff]   ;;  %v3693_v2 = vld [vmem:[%s4804_s1 + $0x10] sm:$0xff]  }
   0x2   :  { %3403 = vmatprep.subr.bf16.mxu0 %v3691_v0  ;;  %3675 = vmatprep.subr.bf16.mxu1 %v3691_v0  ;;  %v3694_v3 = vld [vmem:[%s4804_s1 + $0x18] sm:$0xff]   ;;  %v3699_v4 = vld [vmem:[%s4805_s0] sm:$0xff]   ;;  %v3696_v7 = vld [vmem:[%s4804_s1 + $0x28] sm:$0xff]  }
   0x3   :  { %3404 = vmatpush3.bf16.msra.mxu0 %v3691_v0  ;;  %3683 = vmatpush3.bf16.msra.mxu1 %v3691_v0  ;;  %v3700_v5 = vld [vmem:[%s4805_s0 + $0x200] sm:$0xff]   ;;  %v3697_v8 = vld [vmem:[%s4804_s1 + $0x30] sm:$0xff]   ;;  %v3698_v9 = vld [vmem:[%s4804_s1 + $0x38] sm:$0xff]  }
   0x4   :  { %3405 = vmatprep.subr.bf16.mxu0 %v3692_v1  ;;  %3676 = vmatprep.subr.bf16.mxu1 %v3692_v1  ;;  %v3695_v6 = vld [vmem:[%s4804_s1 + $0x20] sm:$0xff]   ;;  %v3701_v10 = vld [vmem:[%s4805_s0 + $0x8] sm:$0xff]   ;;  %v3703_v12 = vld [vmem:[%s4805_s0 + $0x10] sm:$0xff]  }
   0x5   :  { %3419 = vmatprep.mubr.bf16.mxu0 %v3699_v4  ;;  %3547 = vmatprep.mubr.bf16.mxu1 %v3700_v5  ;;  %v3702_v11 = vld [vmem:[%s4805_s0 + $0x208] sm:$0xff]   ;;  %v3704_v13 = vld [vmem:[%s4805_s0 + $0x210] sm:$0xff]   ;;  %v3705_v14 = vld [vmem:[%s4805_s0 + $0x18] sm:$0xff]  }
   0x6   :  { %v3706_v15 = vld [vmem:[%s4805_s0 + $0x218] sm:$0xff]   ;;  %v3707_v16 = vld [vmem:[%s4805_s0 + $0x20] sm:$0xff]   ;;  %v3709_v18 = vld [vmem:[%s4805_s0 + $0x28] sm:$0xff]  }
   0x7   :  { %3406 = vmatpush3.bf16.msra.mxu0 %v3692_v1  ;;  %3684 = vmatpush3.bf16.msra.mxu1 %v3692_v1  ;;  %v3708_v17 = vld [vmem:[%s4805_s0 + $0x220] sm:$0xff]   ;;  %v3710_v19 = vld [vmem:[%s4805_s0 + $0x228] sm:$0xff]   ;;  %v3711_v20 = vld [vmem:[%s4805_s0 + $0x30] sm:$0xff]  }
   0x8   :  { %3407 = vmatprep.subr.bf16.mxu0 %v3693_v2  ;;  %3677 = vmatprep.subr.bf16.mxu1 %v3693_v2  ;;  %v3712_v21 = vld [vmem:[%s4805_s0 + $0x230] sm:$0xff]   ;;  %v3713_v22 = vld [vmem:[%s4805_s0 + $0x38] sm:$0xff]   ;;  %v3715_v24 = vld [vmem:[%s4805_s0 + $0x40] sm:$0xff]  }
   0x9   :  { %v3714_v23 = vld [vmem:[%s4805_s0 + $0x238] sm:$0xff]   ;;  %v3716_v25 = vld [vmem:[%s4805_s0 + $0x240] sm:$0xff]   ;;  %v3717_v26 = vld [vmem:[%s4805_s0 + $0x48] sm:$0xff]  }
   0xa   :  { %v3718_v27 = vld [vmem:[%s4805_s0 + $0x248] sm:$0xff]   ;;  %v3719_v28 = vld [vmem:[%s4805_s0 + $0x50] sm:$0xff]   ;;  %v3721_v30 = vld [vmem:[%s4805_s0 + $0x58] sm:$0xff]  }
   0xb   :  { %3408 = vmatpush3.bf16.msra.mxu0 %v3693_v2  ;;  %3685 = vmatpush3.bf16.msra.mxu1 %v3693_v2  ;;  %v3720_v29 = vld [vmem:[%s4805_s0 + $0x250] sm:$0xff]   ;;  %v3722_v31 = vld [vmem:[%s4805_s0 + $0x258] sm:$0xff]   ;;  %v3723_v32 = vld [vmem:[%s4805_s0 + $0x60] sm:$0xff]  }
   0xc   :  { %3409 = vmatprep.subr.bf16.mxu0 %v3694_v3  ;;  %3678 = vmatprep.subr.bf16.mxu1 %v3694_v3  ;;  %v3724_v33 = vld [vmem:[%s4805_s0 + $0x260] sm:$0xff]   ;;  %v3725_v34 = vld [vmem:[%s4805_s0 + $0x68] sm:$0xff]   ;;  %v3727_v36 = vld [vmem:[%s4805_s0 + $0x70] sm:$0xff]  }
   0xd   :  { %v3726_v35 = vld [vmem:[%s4805_s0 + $0x268] sm:$0xff]   ;;  %v3728_v37 = vld [vmem:[%s4805_s0 + $0x270] sm:$0xff]   ;;  %v3729_v38 = vld [vmem:[%s4805_s0 + $0x78] sm:$0xff]  }
   0xe   :  { %v3730_v39 = vld [vmem:[%s4805_s0 + $0x278] sm:$0xff]   ;;  %v3731_v40 = vld [vmem:[%s4805_s0 + $0x80] sm:$0xff]   ;;  %v3733_v42 = vld [vmem:[%s4805_s0 + $0x88] sm:$0xff]  }
   0xf   :  { %3410 = vmatpush3.bf16.msra.mxu0 %v3694_v3  ;;  %3686 = vmatpush3.bf16.msra.mxu1 %v3694_v3  ;;  %v3732_v41 = vld [vmem:[%s4805_s0 + $0x280] sm:$0xff]   ;;  %v3734_v43 = vld [vmem:[%s4805_s0 + $0x288] sm:$0xff]   ;;  %v3735_v44 = vld [vmem:[%s4805_s0 + $0x90] sm:$0xff]  }
  0x10   :  { %3411 = vmatprep.subr.bf16.mxu0 %v3695_v6  ;;  %3679 = vmatprep.subr.bf16.mxu1 %v3695_v6  ;;  %v3736_v45 = vld [vmem:[%s4805_s0 + $0x290] sm:$0xff]   ;;  %v3737_v46 = vld [vmem:[%s4805_s0 + $0x98] sm:$0xff]   ;;  %v3739_v48 = vld [vmem:[%s4805_s0 + $0xa0] sm:$0xff]  }
  0x11   :  { %v3738_v47 = vld [vmem:[%s4805_s0 + $0x298] sm:$0xff]   ;;  %v3740_v49 = vld [vmem:[%s4805_s0 + $0x2a0] sm:$0xff]   ;;  %v3741_v50 = vld [vmem:[%s4805_s0 + $0xa8] sm:$0xff]  }
  0x12   :  { %v3742_v51 = vld [vmem:[%s4805_s0 + $0x2a8] sm:$0xff]   ;;  %v3743_v52 = vld [vmem:[%s4805_s0 + $0xb0] sm:$0xff]   ;;  %v3745_v54 = vld [vmem:[%s4805_s0 + $0xb8] sm:$0xff]  }
  0x13   :  { %3412 = vmatpush3.bf16.msra.mxu0 %v3695_v6  ;;  %3687 = vmatpush3.bf16.msra.mxu1 %v3695_v6  ;;  %v3744_v53 = vld [vmem:[%s4805_s0 + $0x2b0] sm:$0xff]   ;;  %v3746_v55 = vld [vmem:[%s4805_s0 + $0x2b8] sm:$0xff]   ;;  %v3747_v56 = vld [vmem:[%s4805_s0 + $0xc0] sm:$0xff]  }
  0x14   :  { %3413 = vmatprep.subr.bf16.mxu0 %v3696_v7  ;;  %3680 = vmatprep.subr.bf16.mxu1 %v3696_v7  ;;  %v3748_v57 = vld [vmem:[%s4805_s0 + $0x2c0] sm:$0xff]   ;;  %v3749_v58 = vld [vmem:[%s4805_s0 + $0xc8] sm:$0xff]   ;;  %v3751_v60 = vld [vmem:[%s4805_s0 + $0xd0] sm:$0xff]  }
  0x15   :  { %v3750_v59 = vld [vmem:[%s4805_s0 + $0x2c8] sm:$0xff]   ;;  %v3752_v61 = vld [vmem:[%s4805_s0 + $0x2d0] sm:$0xff]   ;;  %v3753_v62 = vld [vmem:[%s4805_s0 + $0xd8] sm:$0xff]  }
  0x16   :  { %v3754_v63 = vld [vmem:[%s4805_s0 + $0x2d8] sm:$0xff]   ;;  %v3755_v0 = vld [vmem:[%s4805_s0 + $0xe0] sm:$0xff]   ;;  %v3757_v2 = vld [vmem:[%s4805_s0 + $0xe8] sm:$0xff]  }
  0x17   :  { %3414 = vmatpush3.bf16.msra.mxu0 %v3696_v7  ;;  %3688 = vmatpush3.bf16.msra.mxu1 %v3696_v7  ;;  %v3756_v1 = vld [vmem:[%s4805_s0 + $0x2e0] sm:$0xff]   ;;  %v3758_v3 = vld [vmem:[%s4805_s0 + $0x2e8] sm:$0xff]   ;;  %v3759_v4 = vld [vmem:[%s4805_s0 + $0xf0] sm:$0xff]  }
  0x18   :  { %3415 = vmatprep.subr.bf16.mxu0 %v3697_v8  ;;  %3681 = vmatprep.subr.bf16.mxu1 %v3697_v8  ;;  %v3760_v5 = vld [vmem:[%s4805_s0 + $0x2f0] sm:$0xff]   ;;  %v3761_v6 = vld [vmem:[%s4805_s0 + $0xf8] sm:$0xff]  }
  0x19   :  { %v3762_v7 = vld [vmem:[%s4805_s0 + $0x2f8] sm:$0xff]  }
  0x1b   :  { %3416 = vmatpush3.bf16.msra.mxu0 %v3697_v8  ;;  %3689 = vmatpush3.bf16.msra.mxu1 %v3697_v8  ;;  %v3763_v8 = vld [vmem:[%s4805_s0 + $0x100] sm:$0xff]  }
  0x1c   :  { %3417 = vmatprep.subr.bf16.mxu0 %v3698_v9  ;;  %3682 = vmatprep.subr.bf16.mxu1 %v3698_v9 }
  0x1f   :  { %3418 = vmatpush3.bf16.msra.mxu0 %v3698_v9  ;;  %3690 = vmatpush3.bf16.msra.mxu1 %v3698_v9  ;;  %v3764_v9 = vld [vmem:[%s4805_s0 + $0x300] sm:$0xff]  }
  0x22   :  { %3420 = vmatmul.mubr.bf16.vlgmr.msra.gmra.mrb[0].mxu0 %v3701_v10  ;;  %3548 = vmatmul.mubr.bf16.vlgmr.msra.gmra.mrb[0].mxu1 %v3702_v11  ;;  %v3765_v10 = vld [vmem:[%s4805_s0 + $0x108] sm:$0xff]  }
  0x23   :  { %3423 = vmatprep.mubr.bf16.mxu0 %v3703_v12  ;;  %3551 = vmatprep.mubr.bf16.mxu1 %v3704_v13  ;;  %v3766_v11 = vld [vmem:[%s4805_s0 + $0x308] sm:$0xff]   ;;  %v3767_v12 = vld [vmem:[%s4805_s0 + $0x110] sm:$0xff]  }
  0x24   :  { %v3768_v13 = vld [vmem:[%s4805_s0 + $0x310] sm:$0xff]  }
  0x2a   :  { %3424 = vmatmul.mubr.bf16.gmra.mrb[4].mxu0 %v3705_v14  ;;  %3552 = vmatmul.mubr.bf16.gmra.mrb[4].mxu1 %v3706_v15  ;;  %v3769_v14 = vld [vmem:[%s4805_s0 + $0x118] sm:$0xff]  }
  0x2b   :  { %3427 = vmatprep.mubr.bf16.mxu0 %v3707_v16  ;;  %3555 = vmatprep.mubr.bf16.mxu1 %v3708_v17  ;;  %v3770_v15 = vld [vmem:[%s4805_s0 + $0x318] sm:$0xff]   ;;  %v3771_v16 = vld [vmem:[%s4805_s0 + $0x120] sm:$0xff]  }
  0x2c   :  { %v3772_v17 = vld [vmem:[%s4805_s0 + $0x320] sm:$0xff]  }
  0x32   :  { %3428 = vmatmul.mubr.bf16.gmra.mrb[8].mxu0 %v3709_v18  ;;  %3556 = vmatmul.mubr.bf16.gmra.mrb[8].mxu1 %v3710_v19  ;;  %v3773_v18 = vld [vmem:[%s4805_s0 + $0x128] sm:$0xff]  }
  0x33   :  { %3431 = vmatprep.mubr.bf16.mxu0 %v3711_v20  ;;  %3559 = vmatprep.mubr.bf16.mxu1 %v3712_v21  ;;  %v3774_v19 = vld [vmem:[%s4805_s0 + $0x328] sm:$0xff]   ;;  %v3775_v20 = vld [vmem:[%s4805_s0 + $0x130] sm:$0xff]  }
  0x34   :  { %v3776_v21 = vld [vmem:[%s4805_s0 + $0x330] sm:$0xff]  }
  0x3a   :  { %3432 = vmatmul.mubr.bf16.gmra.mrb[12].mxu0 %v3713_v22  ;;  %3560 = vmatmul.mubr.bf16.gmra.mrb[12].mxu1 %v3714_v23  ;;  %v3777_v22 = vld [vmem:[%s4805_s0 + $0x138] sm:$0xff]  }
  0x3b   :  { %3435 = vmatprep.mubr.bf16.mxu0 %v3715_v24  ;;  %3563 = vmatprep.mubr.bf16.mxu1 %v3716_v25  ;;  %v3778_v23 = vld [vmem:[%s4805_s0 + $0x338] sm:$0xff]   ;;  %v3779_v24 = vld [vmem:[%s4805_s0 + $0x140] sm:$0xff]  }
  0x3c   :  { %v3780_v25 = vld [vmem:[%s4805_s0 + $0x340] sm:$0xff]  }
  0x42   :  { %3436 = vmatmul.mubr.bf16.gmra.mrb[16].mxu0 %v3717_v26  ;;  %3564 = vmatmul.mubr.bf16.gmra.mrb[16].mxu1 %v3718_v27  ;;  %v3781_v26 = vld [vmem:[%s4805_s0 + $0x148] sm:$0xff]  }
  0x43   :  { %3439 = vmatprep.mubr.bf16.mxu0 %v3719_v28  ;;  %3567 = vmatprep.mubr.bf16.mxu1 %v3720_v29  ;;  %v3782_v27 = vld [vmem:[%s4805_s0 + $0x348] sm:$0xff]   ;;  %v3783_v28 = vld [vmem:[%s4805_s0 + $0x150] sm:$0xff]  }
  0x44   :  { %v3784_v29 = vld [vmem:[%s4805_s0 + $0x350] sm:$0xff]  }
  0x4a   :  { %3440 = vmatmul.mubr.bf16.gmra.mrb[20].mxu0 %v3721_v30  ;;  %3568 = vmatmul.mubr.bf16.gmra.mrb[20].mxu1 %v3722_v31  ;;  %v3785_v30 = vld [vmem:[%s4805_s0 + $0x158] sm:$0xff]  }
  0x4b   :  { %3443 = vmatprep.mubr.bf16.mxu0 %v3723_v32  ;;  %3571 = vmatprep.mubr.bf16.mxu1 %v3724_v33  ;;  %v3786_v31 = vld [vmem:[%s4805_s0 + $0x358] sm:$0xff]   ;;  %v3787_v32 = vld [vmem:[%s4805_s0 + $0x160] sm:$0xff]  }
  0x4c   :  { %v3788_v33 = vld [vmem:[%s4805_s0 + $0x360] sm:$0xff]  }
  0x52   :  { %3444 = vmatmul.mubr.bf16.gmra.mrb[24].mxu0 %v3725_v34  ;;  %3572 = vmatmul.mubr.bf16.gmra.mrb[24].mxu1 %v3726_v35  ;;  %v3789_v34 = vld [vmem:[%s4805_s0 + $0x168] sm:$0xff]  }
  0x53   :  { %3447 = vmatprep.mubr.bf16.mxu0 %v3727_v36  ;;  %3575 = vmatprep.mubr.bf16.mxu1 %v3728_v37  ;;  %v3790_v35 = vld [vmem:[%s4805_s0 + $0x368] sm:$0xff]   ;;  %v3791_v36 = vld [vmem:[%s4805_s0 + $0x170] sm:$0xff]  }
  0x54   :  { %v3792_v37 = vld [vmem:[%s4805_s0 + $0x370] sm:$0xff]  }
  0x5a   :  { %3448 = vmatmul.mubr.bf16.gmra.mrb[28].mxu0 %v3729_v38  ;;  %3576 = vmatmul.mubr.bf16.gmra.mrb[28].mxu1 %v3730_v39  ;;  %v3793_v38 = vld [vmem:[%s4805_s0 + $0x178] sm:$0xff]  }
  0x5b   :  { %3451 = vmatprep.mubr.bf16.mxu0 %v3731_v40  ;;  %3579 = vmatprep.mubr.bf16.mxu1 %v3732_v41  ;;  %v3794_v39 = vld [vmem:[%s4805_s0 + $0x378] sm:$0xff]   ;;  %v3795_v40 = vld [vmem:[%s4805_s0 + $0x180] sm:$0xff]  }
  0x5c   :  { %v3796_v41 = vld [vmem:[%s4805_s0 + $0x380] sm:$0xff]  }
  0x62   :  { %3452 = vmatmul.mubr.bf16.gmra.mrb[32].mxu0 %v3733_v42  ;;  %3580 = vmatmul.mubr.bf16.gmra.mrb[32].mxu1 %v3734_v43  ;;  %v3797_v42 = vld [vmem:[%s4805_s0 + $0x188] sm:$0xff]  }
  0x63   :  { %3455 = vmatprep.mubr.bf16.mxu0 %v3735_v44  ;;  %3583 = vmatprep.mubr.bf16.mxu1 %v3736_v45  ;;  %v3798_v43 = vld [vmem:[%s4805_s0 + $0x388] sm:$0xff]   ;;  %v3799_v44 = vld [vmem:[%s4805_s0 + $0x190] sm:$0xff]  }
  0x64   :  { %v3800_v45 = vld [vmem:[%s4805_s0 + $0x390] sm:$0xff]  }
  0x6a   :  { %3456 = vmatmul.mubr.bf16.gmra.mrb[36].mxu0 %v3737_v46  ;;  %3584 = vmatmul.mubr.bf16.gmra.mrb[36].mxu1 %v3738_v47  ;;  %v3801_v46 = vld [vmem:[%s4805_s0 + $0x198] sm:$0xff]  }
  0x6b   :  { %3459 = vmatprep.mubr.bf16.mxu0 %v3739_v48  ;;  %3587 = vmatprep.mubr.bf16.mxu1 %v3740_v49  ;;  %v3802_v47 = vld [vmem:[%s4805_s0 + $0x398] sm:$0xff]   ;;  %v3803_v48 = vld [vmem:[%s4805_s0 + $0x1a0] sm:$0xff]  }
  0x6c   :  { %v3804_v49 = vld [vmem:[%s4805_s0 + $0x3a0] sm:$0xff]  }
  0x72   :  { %3460 = vmatmul.mubr.bf16.gmra.mrb[40].mxu0 %v3741_v50  ;;  %3588 = vmatmul.mubr.bf16.gmra.mrb[40].mxu1 %v3742_v51  ;;  %v3805_v50 = vld [vmem:[%s4805_s0 + $0x1a8] sm:$0xff]  }
  0x73   :  { %3463 = vmatprep.mubr.bf16.mxu0 %v3743_v52  ;;  %3591 = vmatprep.mubr.bf16.mxu1 %v3744_v53  ;;  %v3806_v51 = vld [vmem:[%s4805_s0 + $0x3a8] sm:$0xff]   ;;  %v3807_v52 = vld [vmem:[%s4805_s0 + $0x1b0] sm:$0xff]  }
  0x74   :  { %v3808_v53 = vld [vmem:[%s4805_s0 + $0x3b0] sm:$0xff]  }
  0x7a   :  { %3464 = vmatmul.mubr.bf16.gmra.mrb[44].mxu0 %v3745_v54  ;;  %3592 = vmatmul.mubr.bf16.gmra.mrb[44].mxu1 %v3746_v55 }
  0x7b   :  { %3467 = vmatprep.mubr.bf16.mxu0 %v3747_v56  ;;  %3595 = vmatprep.mubr.bf16.mxu1 %v3748_v57 }
  0x82   :  { %3468 = vmatmul.mubr.bf16.gmra.mrb[48].mxu0 %v3749_v58  ;;  %3596 = vmatmul.mubr.bf16.gmra.mrb[48].mxu1 %v3750_v59  ;;  %v3809_v58 = vld [vmem:[%s4805_s0 + $0x1b8] sm:$0xff]  }
  0x83   :  { %3471 = vmatprep.mubr.bf16.mxu0 %v3751_v60  ;;  %3599 = vmatprep.mubr.bf16.mxu1 %v3752_v61  ;;  %v3810_v59 = vld [vmem:[%s4805_s0 + $0x3b8] sm:$0xff]  }
  0x8a   :  { %3472 = vmatmul.mubr.bf16.gmra.mrb[52].mxu0 %v3753_v62  ;;  %3600 = vmatmul.mubr.bf16.gmra.mrb[52].mxu1 %v3754_v63  ;;  %v3811_v62 = vld [vmem:[%s4805_s0 + $0x1c0] sm:$0xff]  }
  0x8b   :  { %3475 = vmatprep.mubr.bf16.mxu0 %v3755_v0  ;;  %3603 = vmatprep.mubr.bf16.mxu1 %v3756_v1  ;;  %v3812_v63 = vld [vmem:[%s4805_s0 + $0x3c0] sm:$0xff]  }
  0x92   :  { %3476 = vmatmul.mubr.bf16.gmra.mrb[56].mxu0 %v3757_v2  ;;  %3604 = vmatmul.mubr.bf16.gmra.mrb[56].mxu1 %v3758_v3 }
  0x93   :  { %3479 = vmatprep.mubr.bf16.mxu0 %v3759_v4  ;;  %3607 = vmatprep.mubr.bf16.mxu1 %v3760_v5 }
  0x9a   :  { %3480 = vmatmul.mubr.bf16.gmra.mrb[60].mxu0 %v3761_v6  ;;  %3608 = vmatmul.mubr.bf16.gmra.mrb[60].mxu1 %v3762_v7  ;;  %v3813_v6 = vld [vmem:[%s4805_s0 + $0x1c8] sm:$0xff]  }
  0x9b   :  { %3483 = vmatprep.mubr.bf16.mxu0 %v3763_v8  ;;  %3611 = vmatprep.mubr.bf16.mxu1 %v3764_v9  ;;  %v3814_v7 = vld [vmem:[%s4805_s0 + $0x3c8] sm:$0xff]  }
  0xa2   :  { %3484 = vmatmul.mubr.bf16.gmra.mrb[64].mxu0 %v3765_v10  ;;  %3612 = vmatmul.mubr.bf16.gmra.mrb[64].mxu1 %v3766_v11  ;;  %v3815_v10 = vld [vmem:[%s4805_s0 + $0x1d0] sm:$0xff]  }
  0xa3   :  { %3487 = vmatprep.mubr.bf16.mxu0 %v3767_v12  ;;  %3615 = vmatprep.mubr.bf16.mxu1 %v3768_v13  ;;  %v3816_v11 = vld [vmem:[%s4805_s0 + $0x3d0] sm:$0xff]  }
  0xaa   :  { %3488 = vmatmul.mubr.bf16.gmra.mrb[68].mxu0 %v3769_v14  ;;  %3616 = vmatmul.mubr.bf16.gmra.mrb[68].mxu1 %v3770_v15 }
  0xab   :  { %3491 = vmatprep.mubr.bf16.mxu0 %v3771_v16  ;;  %3619 = vmatprep.mubr.bf16.mxu1 %v3772_v17 }
  0xb2   :  { %3492 = vmatmul.mubr.bf16.gmra.mrb[72].mxu0 %v3773_v18  ;;  %3620 = vmatmul.mubr.bf16.gmra.mrb[72].mxu1 %v3774_v19  ;;  %v3817_v18 = vld [vmem:[%s4805_s0 + $0x1d8] sm:$0xff]  }
  0xb3   :  { %3495 = vmatprep.mubr.bf16.mxu0 %v3775_v20  ;;  %3623 = vmatprep.mubr.bf16.mxu1 %v3776_v21  ;;  %v3818_v19 = vld [vmem:[%s4805_s0 + $0x3d8] sm:$0xff]  }
  0xba   :  { %3496 = vmatmul.mubr.bf16.gmra.mrb[76].mxu0 %v3777_v22  ;;  %3624 = vmatmul.mubr.bf16.gmra.mrb[76].mxu1 %v3778_v23  ;;  %v3819_v22 = vld [vmem:[%s4805_s0 + $0x1e0] sm:$0xff]  }
  0xbb   :  { %3499 = vmatprep.mubr.bf16.mxu0 %v3779_v24  ;;  %3627 = vmatprep.mubr.bf16.mxu1 %v3780_v25  ;;  %v3820_v23 = vld [vmem:[%s4805_s0 + $0x3e0] sm:$0xff]  }
  0xc2   :  { %3500 = vmatmul.mubr.bf16.gmra.mrb[80].mxu0 %v3781_v26  ;;  %3628 = vmatmul.mubr.bf16.gmra.mrb[80].mxu1 %v3782_v27 }
  0xc3   :  { %3503 = vmatprep.mubr.bf16.mxu0 %v3783_v28  ;;  %3631 = vmatprep.mubr.bf16.mxu1 %v3784_v29 }
  0xca   :  { %3504 = vmatmul.mubr.bf16.gmra.mrb[84].mxu0 %v3785_v30  ;;  %3632 = vmatmul.mubr.bf16.gmra.mrb[84].mxu1 %v3786_v31  ;;  %v3821_v30 = vld [vmem:[%s4805_s0 + $0x1e8] sm:$0xff]  }
  0xcb   :  { %3507 = vmatprep.mubr.bf16.mxu0 %v3787_v32  ;;  %3635 = vmatprep.mubr.bf16.mxu1 %v3788_v33  ;;  %v3822_v31 = vld [vmem:[%s4805_s0 + $0x3e8] sm:$0xff]  }
  0xd2   :  { %3508 = vmatmul.mubr.bf16.gmra.mrb[88].mxu0 %v3789_v34  ;;  %3636 = vmatmul.mubr.bf16.gmra.mrb[88].mxu1 %v3790_v35  ;;  %v3823_v34 = vld [vmem:[%s4805_s0 + $0x1f0] sm:$0xff]  }
  0xd3   :  { %3511 = vmatprep.mubr.bf16.mxu0 %v3791_v36  ;;  %3639 = vmatprep.mubr.bf16.mxu1 %v3792_v37  ;;  %v3824_v35 = vld [vmem:[%s4805_s0 + $0x3f0] sm:$0xff]  }
  0xda   :  { %3512 = vmatmul.mubr.bf16.gmra.mrb[92].mxu0 %v3793_v38  ;;  %3640 = vmatmul.mubr.bf16.gmra.mrb[92].mxu1 %v3794_v39 }
  0xdb   :  { %3515 = vmatprep.mubr.bf16.mxu0 %v3795_v40  ;;  %3643 = vmatprep.mubr.bf16.mxu1 %v3796_v41 }
  0xe2   :  { %3516 = vmatmul.mubr.bf16.gmra.mrb[96].mxu0 %v3797_v42  ;;  %3644 = vmatmul.mubr.bf16.gmra.mrb[96].mxu1 %v3798_v43  ;;  %v3825_v42 = vld [vmem:[%s4805_s0 + $0x1f8] sm:$0xff]  }
  0xe3   :  { %3519 = vmatprep.mubr.bf16.mxu0 %v3799_v44  ;;  %3647 = vmatprep.mubr.bf16.mxu1 %v3800_v45  ;;  %v3826_v43 = vld [vmem:[%s4805_s0 + $0x3f8] sm:$0xff]  }
  0xea   :  { %3520 = vmatmul.mubr.bf16.gmra.mrb[100].mxu0 %v3801_v46  ;;  %3648 = vmatmul.mubr.bf16.gmra.mrb[100].mxu1 %v3802_v47 }
  0xeb   :  { %3523 = vmatprep.mubr.bf16.mxu0 %v3803_v48  ;;  %3651 = vmatprep.mubr.bf16.mxu1 %v3804_v49 }
  0xf2   :  { %3524 = vmatmul.mubr.bf16.gmra.mrb[104].mxu0 %v3805_v50  ;;  %3652 = vmatmul.mubr.bf16.gmra.mrb[104].mxu1 %v3806_v51 }
  0xf3   :  { %3527 = vmatprep.mubr.bf16.mxu0 %v3807_v52  ;;  %3655 = vmatprep.mubr.bf16.mxu1 %v3808_v53 }
  0xf5   :  { %v4201_v54 = vpop.f32.mrb[0].mxu0  ;;  %v4203_v55 = vpop.f32.mrb[0].mxu1 }
  0xf6   :  { %v4205_v56 = vpop.f32.mrb[1].mxu0  ;;  %v4207_v57 = vpop.f32.mrb[1].mxu1 }
  0xf7   :  { %v4215_v60 = vpop.f32.mrb[2].mxu0  ;;  %v4217_v61 = vpop.f32.mrb[2].mxu1 }
  0xf8   :  { %v4225_v0 = vpop.f32.mrb[3].mxu0  ;;  %v4227_v1 = vpop.f32.mrb[3].mxu1 }
  0xfa   :  { %3528 = vmatmul.mubr.bf16.gmra.mrb[108].mxu0 %v3809_v58  ;;  %3656 = vmatmul.mubr.bf16.gmra.mrb[108].mxu1 %v3810_v59 }
  0xfb   :  { %3531 = vmatprep.mubr.bf16.mxu0 %v3811_v62  ;;  %3659 = vmatprep.mubr.bf16.mxu1 %v3812_v63 }
  0xfd   :  { %v4229_v2 = vpop.f32.mrb[4].mxu0  ;;  %v4231_v3 = vpop.f32.mrb[4].mxu1 }
  0xfe   :  { %v4233_v4 = vpop.f32.mrb[5].mxu0  ;;  %v4235_v5 = vpop.f32.mrb[5].mxu1 }
  0xff   :  { %v4243_v8 = vpop.f32.mrb[6].mxu0  ;;  %v4245_v9 = vpop.f32.mrb[6].mxu1 }
 0x100   :  { %v4253_v12 = vpop.f32.mrb[7].mxu0  ;;  %v4255_v13 = vpop.f32.mrb[7].mxu1 }
 0x102   :  { %3532 = vmatmul.mubr.bf16.gmra.mrb[112].mxu0 %v3813_v6  ;;  %3660 = vmatmul.mubr.bf16.gmra.mrb[112].mxu1 %v3814_v7 }
 0x103   :  { %3535 = vmatprep.mubr.bf16.mxu0 %v3815_v10  ;;  %3663 = vmatprep.mubr.bf16.mxu1 %v3816_v11 }
 0x105   :  { %v4257_v14 = vpop.f32.mrb[8].mxu0  ;;  %v4259_v15 = vpop.f32.mrb[8].mxu1 }
 0x106   :  { %v4261_v16 = vpop.f32.mrb[9].mxu0  ;;  %v4263_v17 = vpop.f32.mrb[9].mxu1 }
 0x107   :  { %v4271_v20 = vpop.f32.mrb[10].mxu0  ;;  %v4273_v21 = vpop.f32.mrb[10].mxu1 }
 0x108   :  { %v4281_v24 = vpop.f32.mrb[11].mxu0  ;;  %v4283_v25 = vpop.f32.mrb[11].mxu1 }
 0x10a   :  { %3536 = vmatmul.mubr.bf16.gmra.mrb[116].mxu0 %v3817_v18  ;;  %3664 = vmatmul.mubr.bf16.gmra.mrb[116].mxu1 %v3818_v19 }
 0x10b   :  { %3539 = vmatprep.mubr.bf16.mxu0 %v3819_v22  ;;  %3667 = vmatprep.mubr.bf16.mxu1 %v3820_v23 }
 0x10d   :  { %v4285_v26 = vpop.f32.mrb[12].mxu0  ;;  %v4287_v27 = vpop.f32.mrb[12].mxu1 }
 0x10e   :  { %v4289_v28 = vpop.f32.mrb[13].mxu0  ;;  %v4291_v29 = vpop.f32.mrb[13].mxu1 }
 0x10f   :  { %v4299_v32 = vpop.f32.mrb[14].mxu0  ;;  %v4301_v33 = vpop.f32.mrb[14].mxu1 }
 0x110   :  { %v4309_v36 = vpop.f32.mrb[15].mxu0  ;;  %v4311_v37 = vpop.f32.mrb[15].mxu1 }
 0x112   :  { %3540 = vmatmul.mubr.bf16.gmra.mrb[120].mxu0 %v3821_v30  ;;  %3668 = vmatmul.mubr.bf16.gmra.mrb[120].mxu1 %v3822_v31 }
 0x113   :  { %3543 = vmatprep.mubr.bf16.mxu0 %v3823_v34  ;;  %3671 = vmatprep.mubr.bf16.mxu1 %v3824_v35 }
 0x115   :  { %v4313_v38 = vpop.f32.mrb[16].mxu0  ;;  %v4315_v39 = vpop.f32.mrb[16].mxu1 }
 0x116   :  { %v4317_v40 = vpop.f32.mrb[17].mxu0  ;;  %v4319_v41 = vpop.f32.mrb[17].mxu1 }
 0x117   :  { %v4327_v44 = vpop.f32.mrb[18].mxu0  ;;  %v4329_v45 = vpop.f32.mrb[18].mxu1 }
 0x118   :  { %v4331_v46 = vpop.f32.mrb[19].mxu0  ;;  %v4333_v47 = vpop.f32.mrb[19].mxu1 }
 0x11a   :  { %3544 = vmatmul.mubr.bf16.gmra.mrb[124].mxu0 %v3825_v42  ;;  %3672 = vmatmul.mubr.bf16.gmra.mrb[124].mxu1 %v3826_v43 }
 0x11d   :  { %v4335_v48 = vpop.f32.mrb[20].mxu0  ;;  %v4337_v49 = vpop.f32.mrb[20].mxu1 }
 0x11e   :  { %v4339_v50 = vpop.f32.mrb[21].mxu0  ;;  %v4341_v51 = vpop.f32.mrb[21].mxu1 }
 0x11f   :  { %v4343_v52 = vpop.f32.mrb[22].mxu0  ;;  %v4345_v53 = vpop.f32.mrb[22].mxu1 }
 0x120   :  { %v4347_v58 = vpop.f32.mrb[23].mxu0  ;;  %v4349_v59 = vpop.f32.mrb[23].mxu1 }
 0x121   :  { %4808 = vst [vmem:[#allocation2_spill] sm:$0xff] %v4349_v59 }
 0x125   :  { %v4351_v62 = vpop.f32.mrb[24].mxu0  ;;  %v4353_v63 = vpop.f32.mrb[24].mxu1 }
 0x126   :  { %4809 = vst [vmem:[#allocation3_spill] sm:$0xff] %v4351_v62  ;;  %4810 = vst [vmem:[#allocation4_spill] sm:$0xff] %v4353_v63  ;;  %v4355_v6 = vpop.f32.mrb[25].mxu0  ;;  %v4357_v7 = vpop.f32.mrb[25].mxu1 }
 0x127   :  { %4811 = vst [vmem:[#allocation5_spill] sm:$0xff] %v4355_v6  ;;  %4812 = vst [vmem:[#allocation6_spill] sm:$0xff] %v4357_v7  ;;  %v4359_v10 = vpop.f32.mrb[26].mxu0  ;;  %v4361_v11 = vpop.f32.mrb[26].mxu1 }
 0x128   :  { %4813 = vst [vmem:[#allocation7_spill] sm:$0xff] %v4359_v10  ;;  %4814 = vst [vmem:[#allocation8_spill] sm:$0xff] %v4361_v11  ;;  %v4363_v18 = vpop.f32.mrb[27].mxu0  ;;  %v4365_v19 = vpop.f32.mrb[27].mxu1 }
 0x129   :  { %4815 = vst [vmem:[#allocation9_spill] sm:$0xff] %v4363_v18  ;;  %4816 = vst [vmem:[#allocation10_spill] sm:$0xff] %v4365_v19 }
 0x12d   :  { %v4367_v22 = vpop.f32.mrb[28].mxu0  ;;  %v4369_v23 = vpop.f32.mrb[28].mxu1 }
 0x12e   :  { %4817 = vst [vmem:[#allocation11_spill] sm:$0xff] %v4367_v22  ;;  %4818 = vst [vmem:[#allocation12_spill] sm:$0xff] %v4369_v23  ;;  %v4371_v30 = vpop.f32.mrb[29].mxu0  ;;  %v4373_v31 = vpop.f32.mrb[29].mxu1 }
 0x12f   :  { %4819 = vst [vmem:[#allocation13_spill] sm:$0xff] %v4371_v30  ;;  %4820 = vst [vmem:[#allocation14_spill] sm:$0xff] %v4373_v31  ;;  %v4375_v34 = vpop.f32.mrb[30].mxu0  ;;  %v4377_v35 = vpop.f32.mrb[30].mxu1 }
 0x130   :  { %4821 = vst [vmem:[#allocation15_spill] sm:$0xff] %v4375_v34  ;;  %4822 = vst [vmem:[#allocation16_spill] sm:$0xff] %v4377_v35  ;;  %v4379_v42 = vpop.f32.mrb[31].mxu0  ;;  %v4381_v43 = vpop.f32.mrb[31].mxu1 }
 0x131   :  { %4823 = vst [vmem:[#allocation17_spill] sm:$0xff] %v4379_v42  ;;  %4824 = vst [vmem:[#allocation18_spill] sm:$0xff] %v4381_v43 }
 0x135   :  { %v4383_v11 = vpop.f32.mrb[32].mxu0  ;;  %v4385_v18 = vpop.f32.mrb[32].mxu1 }
 0x136   :  { %4825 = vst [vmem:[#allocation19_spill] sm:$0xff] %v4383_v11  ;;  %4826 = vst [vmem:[#allocation20_spill] sm:$0xff] %v4385_v18  ;;  %v4387_v19 = vpop.f32.mrb[33].mxu0  ;;  %v4389_v22 = vpop.f32.mrb[33].mxu1 }
 0x137   :  { %4827 = vst [vmem:[#allocation21_spill] sm:$0xff] %v4387_v19  ;;  %4828 = vst [vmem:[#allocation22_spill] sm:$0xff] %v4389_v22  ;;  %v4391_v23 = vpop.f32.mrb[34].mxu0  ;;  %v4393_v30 = vpop.f32.mrb[34].mxu1 }
 0x138   :  { %4829 = vst [vmem:[#allocation23_spill] sm:$0xff] %v4391_v23  ;;  %4830 = vst [vmem:[#allocation24_spill] sm:$0xff] %v4393_v30  ;;  %v4395_v31 = vpop.f32.mrb[35].mxu0  ;;  %v4397_v34 = vpop.f32.mrb[35].mxu1 }
 0x139   :  { %4831 = vst [vmem:[#allocation25_spill] sm:$0xff] %v4395_v31  ;;  %4832 = vst [vmem:[#allocation26_spill] sm:$0xff] %v4397_v34 }
 0x13d   :  { %v4399_v35 = vpop.f32.mrb[36].mxu0  ;;  %v4401_v42 = vpop.f32.mrb[36].mxu1 }
 0x13e   :  { %4833 = vst [vmem:[#allocation27_spill] sm:$0xff] %v4399_v35  ;;  %4834 = vst [vmem:[#allocation28_spill] sm:$0xff] %v4401_v42  ;;  %v4403_v43 = vpop.f32.mrb[37].mxu0  ;;  %v4405_v11 = vpop.f32.mrb[37].mxu1 }
 0x13f   :  { %4835 = vst [vmem:[#allocation29_spill] sm:$0xff] %v4403_v43  ;;  %4836 = vst [vmem:[#allocation30_spill] sm:$0xff] %v4405_v11  ;;  %v4407_v18 = vpop.f32.mrb[38].mxu0  ;;  %v4409_v19 = vpop.f32.mrb[38].mxu1 }
 0x140   :  { %4837 = vst [vmem:[#allocation31_spill] sm:$0xff] %v4407_v18  ;;  %4838 = vst [vmem:[#allocation32_spill] sm:$0xff] %v4409_v19  ;;  %v4411_v22 = vpop.f32.mrb[39].mxu0  ;;  %v4413_v23 = vpop.f32.mrb[39].mxu1 }
 0x141   :  { %4839 = vst [vmem:[#allocation33_spill] sm:$0xff] %v4411_v22  ;;  %4840 = vst [vmem:[#allocation34_spill] sm:$0xff] %v4413_v23 }
 0x145   :  { %v4415_v30 = vpop.f32.mrb[40].mxu0  ;;  %v4417_v31 = vpop.f32.mrb[40].mxu1 }
 0x146   :  { %4841 = vst [vmem:[#allocation35_spill] sm:$0xff] %v4415_v30  ;;  %4842 = vst [vmem:[#allocation36_spill] sm:$0xff] %v4417_v31  ;;  %v4419_v34 = vpop.f32.mrb[41].mxu0  ;;  %v4421_v35 = vpop.f32.mrb[41].mxu1 }
 0x147   :  { %4843 = vst [vmem:[#allocation37_spill] sm:$0xff] %v4419_v34  ;;  %4844 = vst [vmem:[#allocation38_spill] sm:$0xff] %v4421_v35  ;;  %v4423_v42 = vpop.f32.mrb[42].mxu0  ;;  %v4425_v43 = vpop.f32.mrb[42].mxu1 }
 0x148   :  { %4845 = vst [vmem:[#allocation39_spill] sm:$0xff] %v4423_v42  ;;  %4846 = vst [vmem:[#allocation40_spill] sm:$0xff] %v4425_v43  ;;  %v4427_v11 = vpop.f32.mrb[43].mxu0  ;;  %v4429_v18 = vpop.f32.mrb[43].mxu1 }
 0x149   :  { %4847 = vst [vmem:[#allocation41_spill] sm:$0xff] %v4427_v11  ;;  %4848 = vst [vmem:[#allocation42_spill] sm:$0xff] %v4429_v18 }
 0x14d   :  { %v4431_v19 = vpop.f32.mrb[44].mxu0  ;;  %v4433_v22 = vpop.f32.mrb[44].mxu1 }
 0x14e   :  { %4849 = vst [vmem:[#allocation43_spill] sm:$0xff] %v4431_v19  ;;  %4850 = vst [vmem:[#allocation44_spill] sm:$0xff] %v4433_v22  ;;  %v4435_v23 = vpop.f32.mrb[45].mxu0  ;;  %v4437_v30 = vpop.f32.mrb[45].mxu1 }
 0x14f   :  { %4851 = vst [vmem:[#allocation45_spill] sm:$0xff] %v4435_v23  ;;  %4852 = vst [vmem:[#allocation46_spill] sm:$0xff] %v4437_v30  ;;  %v4439_v31 = vpop.f32.mrb[46].mxu0  ;;  %v4441_v34 = vpop.f32.mrb[46].mxu1 }
 0x150   :  { %4853 = vst [vmem:[#allocation47_spill] sm:$0xff] %v4439_v31  ;;  %4854 = vst [vmem:[#allocation48_spill] sm:$0xff] %v4441_v34  ;;  %v4443_v35 = vpop.f32.mrb[47].mxu0  ;;  %v4445_v42 = vpop.f32.mrb[47].mxu1 }
 0x151   :  { %4855 = vst [vmem:[#allocation49_spill] sm:$0xff] %v4443_v35  ;;  %4856 = vst [vmem:[#allocation50_spill] sm:$0xff] %v4445_v42 }
 0x155   :  { %v4447_v43 = vpop.f32.mrb[48].mxu0  ;;  %v4449_v11 = vpop.f32.mrb[48].mxu1 }
 0x156   :  { %4857 = vst [vmem:[#allocation51_spill] sm:$0xff] %v4447_v43  ;;  %4858 = vst [vmem:[#allocation52_spill] sm:$0xff] %v4449_v11  ;;  %v4451_v18 = vpop.f32.mrb[49].mxu0  ;;  %v4453_v19 = vpop.f32.mrb[49].mxu1 }
 0x157   :  { %4859 = vst [vmem:[#allocation53_spill] sm:$0xff] %v4451_v18  ;;  %4860 = vst [vmem:[#allocation54_spill] sm:$0xff] %v4453_v19  ;;  %v4455_v22 = vpop.f32.mrb[50].mxu0  ;;  %v4457_v23 = vpop.f32.mrb[50].mxu1 }
 0x158   :  { %4861 = vst [vmem:[#allocation55_spill] sm:$0xff] %v4455_v22  ;;  %4862 = vst [vmem:[#allocation56_spill] sm:$0xff] %v4457_v23  ;;  %v4459_v30 = vpop.f32.mrb[51].mxu0  ;;  %v4461_v31 = vpop.f32.mrb[51].mxu1 }
 0x159   :  { %4863 = vst [vmem:[#allocation57_spill] sm:$0xff] %v4459_v30  ;;  %4864 = vst [vmem:[#allocation58_spill] sm:$0xff] %v4461_v31 }
 0x15d   :  { %v4463_v34 = vpop.f32.mrb[52].mxu0  ;;  %v4465_v35 = vpop.f32.mrb[52].mxu1 }
 0x15e   :  { %4865 = vst [vmem:[#allocation59_spill] sm:$0xff] %v4463_v34  ;;  %4866 = vst [vmem:[#allocation60_spill] sm:$0xff] %v4465_v35  ;;  %v4467_v42 = vpop.f32.mrb[53].mxu0  ;;  %v4469_v43 = vpop.f32.mrb[53].mxu1 }
 0x15f   :  { %4867 = vst [vmem:[#allocation61_spill] sm:$0xff] %v4467_v42  ;;  %4868 = vst [vmem:[#allocation62_spill] sm:$0xff] %v4469_v43  ;;  %v4471_v11 = vpop.f32.mrb[54].mxu0  ;;  %v4473_v18 = vpop.f32.mrb[54].mxu1 }
 0x160   :  { %4869 = vst [vmem:[#allocation63_spill] sm:$0xff] %v4471_v11  ;;  %4870 = vst [vmem:[#allocation64_spill] sm:$0xff] %v4473_v18  ;;  %v4475_v19 = vpop.f32.mrb[55].mxu0  ;;  %v4477_v22 = vpop.f32.mrb[55].mxu1 }
 0x161   :  { %4871 = vst [vmem:[#allocation65_spill] sm:$0xff] %v4475_v19  ;;  %4872 = vst [vmem:[#allocation66_spill] sm:$0xff] %v4477_v22 }
 0x165   :  { %v4479_v23 = vpop.f32.mrb[56].mxu0  ;;  %v4481_v30 = vpop.f32.mrb[56].mxu1 }
 0x166   :  { %4873 = vst [vmem:[#allocation67_spill] sm:$0xff] %v4479_v23  ;;  %4874 = vst [vmem:[#allocation68_spill] sm:$0xff] %v4481_v30  ;;  %v4483_v31 = vpop.f32.mrb[57].mxu0  ;;  %v4485_v34 = vpop.f32.mrb[57].mxu1 }
 0x167   :  { %4875 = vst [vmem:[#allocation69_spill] sm:$0xff] %v4483_v31  ;;  %4876 = vst [vmem:[#allocation70_spill] sm:$0xff] %v4485_v34  ;;  %v4487_v35 = vpop.f32.mrb[58].mxu0  ;;  %v4489_v42 = vpop.f32.mrb[58].mxu1 }
 0x168   :  { %4877 = vst [vmem:[#allocation71_spill] sm:$0xff] %v4487_v35  ;;  %4878 = vst [vmem:[#allocation72_spill] sm:$0xff] %v4489_v42  ;;  %v4491_v43 = vpop.f32.mrb[59].mxu0  ;;  %v4493_v11 = vpop.f32.mrb[59].mxu1 }
 0x169   :  { %4879 = vst [vmem:[#allocation73_spill] sm:$0xff] %v4491_v43  ;;  %4880 = vst [vmem:[#allocation74_spill] sm:$0xff] %v4493_v11 }
 0x16d   :  { %v4495_v18 = vpop.f32.mrb[60].mxu0  ;;  %v4497_v19 = vpop.f32.mrb[60].mxu1 }
 0x16e   :  { %4881 = vst [vmem:[#allocation75_spill] sm:$0xff] %v4495_v18  ;;  %4882 = vst [vmem:[#allocation76_spill] sm:$0xff] %v4497_v19  ;;  %v4499_v22 = vpop.f32.mrb[61].mxu0  ;;  %v4501_v23 = vpop.f32.mrb[61].mxu1 }
 0x16f   :  { %4883 = vst [vmem:[#allocation77_spill] sm:$0xff] %v4499_v22  ;;  %4884 = vst [vmem:[#allocation78_spill] sm:$0xff] %v4501_v23  ;;  %v4503_v30 = vpop.f32.mrb[62].mxu0  ;;  %v4505_v31 = vpop.f32.mrb[62].mxu1  ;;  %v4516_v23 = vld [vmem:[%s4806_s2] ss:$0 sm:$0xff] }
 0x170   :  { %4885 = vst [vmem:[#allocation79_spill] sm:$0xff] %v4503_v30  ;;  %4886 = vst [vmem:[#allocation80_spill] sm:$0xff] %v4505_v31  ;;  %v4507_v34 = vpop.f32.mrb[63].mxu0  ;;  %v4509_v35 = vpop.f32.mrb[63].mxu1 }
 0x171   :  { %4887 = vst [vmem:[#allocation81_spill] sm:$0xff] %v4507_v34  ;;  %4888 = vst [vmem:[#allocation82_spill] sm:$0xff] %v4509_v35 }
 0x175   :  { %v3485_v42 = vpop.f32.mrb[64].mxu0  ;;  %v3613_v43 = vpop.f32.mrb[64].mxu1 }
 0x176   :  { %v2163_v11 = vmax.f32 %v4201_v54, %v3485_v42  ;;  %v2227_v18 = vmax.f32 %v4203_v55, %v3613_v43  ;;  %v1394_v10 = vpop.f32.mrb[65].mxu0  ;;  %v1906_v19 = vpop.f32.mrb[65].mxu1 }
 0x177   :  { %v2161_v30 = vmax.f32 %v4205_v56, %v1394_v10  ;;  %v2225_v31 = vmax.f32 %v4207_v57, %v1906_v19  ;;  %v3486_v34 = vpop.f32.mrb[66].mxu0  ;;  %v3614_v22 = vpop.f32.mrb[66].mxu1 }
 0x178   :  { %v2291_v35 = vmax.f32 %v2163_v11, %v2227_v18  ;;  %v2164_v7 = vmax.f32 %v4215_v60, %v3486_v34  ;;  %v2228_v54 = vmax.f32 %v4217_v61, %v3614_v22  ;;  %v1397_v42 = vpop.f32.mrb[67].mxu0  ;;  %v1909_v55 = vpop.f32.mrb[67].mxu1 }
 0x179   :  { %v2289_v43 = vmax.f32 %v2161_v30, %v2225_v31  ;;  %v2162_v6 = vmax.f32 %v4225_v0, %v1397_v42  ;;  %v2226_v63 = vmax.f32 %v4227_v1, %v1909_v55 }
 0x17a   :  { %v2361_v62 = vadd.f32 %v4516_v23, %v2291_v35  ;;  %v2292_v59 = vmax.f32 %v2164_v7, %v2228_v54 }
 0x17b   :  { %v2359_v56 = vadd.f32 %v4516_v23, %v2289_v43  ;;  %v2290_v57 = vmax.f32 %v2162_v6, %v2226_v63 }
 0x17c   :  { %v2362_v10 = vadd.f32 %v4516_v23, %v2292_v59  ;;  %v2425_v61 = vmax.f32 %v2361_v62, 0.0 }
 0x17d   :  { %v2360_v11 = vadd.f32 %v4516_v23, %v2290_v57  ;;  %v3489_v60 = vpop.f32.mrb[68].mxu0  ;;  %v3617_v18 = vpop.f32.mrb[68].mxu1  ;;  %v2423_v31 = vmax.f32 %v2359_v56, 0.0 }
 0x17e   :  { %v2426_v19 = vmax.f32 %v2362_v10, 0.0  ;;  %v2167_v22 = vmax.f32 %v4229_v2, %v3489_v60  ;;  %v2231_v0 = vmax.f32 %v4231_v3, %v3617_v18  ;;  %v1410_v30 = vpop.f32.mrb[69].mxu0  ;;  %v1922_v1 = vpop.f32.mrb[69].mxu1 }
 0x17f   :  { %v2424_v34 = vmax.f32 %v2360_v11, 0.0  ;;  %v2165_v7 = vmax.f32 %v4233_v4, %v1410_v30  ;;  %v2229_v63 = vmax.f32 %v4235_v5, %v1922_v1  ;;  %v3490_v6 = vpop.f32.mrb[70].mxu0  ;;  %v3618_v59 = vpop.f32.mrb[70].mxu1 }
 0x180   :  { %v3084_v35 = vpack.c.bf16 %v2426_v19, %v2425_v61  ;;  %v2295_v54 = vmax.f32 %v2167_v22, %v2231_v0  ;;  %v2168_v42 = vmax.f32 %v4243_v8, %v3490_v6  ;;  %v2232_v62 = vmax.f32 %v4245_v9, %v3618_v59  ;;  %v1413_v55 = vpop.f32.mrb[71].mxu0  ;;  %v1925_v2 = vpop.f32.mrb[71].mxu1 }
 0x181   :  { %v3079_v43 = vpack.c.bf16 %v2424_v34, %v2423_v31  ;;  %v2293_v3 = vmax.f32 %v2165_v7, %v2229_v63  ;;  %v2166_v57 = vmax.f32 %v4253_v12, %v1413_v55  ;;  %v2230_v56 = vmax.f32 %v4255_v13, %v1925_v2 }
 0x182   :  { %3236 = vst [vmem:[%s4807_s3 + $0x8] sm:$0xff] %v3084_v35   ;;  %v2365_v4 = vadd.f32 %v4516_v23, %v2295_v54  ;;  %v2296_v5 = vmax.f32 %v2168_v42, %v2232_v62 }
 0x183   :  { %3080 = vst [vmem:[%s4807_s3] sm:$0xff] %v3079_v43   ;;  %v2363_v8 = vadd.f32 %v4516_v23, %v2293_v3  ;;  %v2294_v9 = vmax.f32 %v2166_v57, %v2230_v56 }
 0x184   :  { %v2366_v10 = vadd.f32 %v4516_v23, %v2296_v5  ;;  %v2429_v60 = vmax.f32 %v2365_v4, 0.0 }
 0x185   :  { %v2364_v12 = vadd.f32 %v4516_v23, %v2294_v9  ;;  %v3493_v11 = vpop.f32.mrb[72].mxu0  ;;  %v3621_v13 = vpop.f32.mrb[72].mxu1  ;;  %v2427_v30 = vmax.f32 %v2363_v8, 0.0 }
 0x186   :  { %v2430_v18 = vmax.f32 %v2366_v10, 0.0  ;;  %v2171_v61 = vmax.f32 %v4257_v14, %v3493_v11  ;;  %v2235_v19 = vmax.f32 %v4259_v15, %v3621_v13  ;;  %v1426_v22 = vpop.f32.mrb[73].mxu0  ;;  %v1938_v0 = vpop.f32.mrb[73].mxu1 }
 0x187   :  { %v2428_v1 = vmax.f32 %v2364_v12, 0.0  ;;  %v2169_v31 = vmax.f32 %v4261_v16, %v1426_v22  ;;  %v2233_v34 = vmax.f32 %v4263_v17, %v1938_v0  ;;  %v3494_v7 = vpop.f32.mrb[74].mxu0  ;;  %v3622_v63 = vpop.f32.mrb[74].mxu1 }
 0x188   :  { %v3094_v6 = vpack.c.bf16 %v2430_v18, %v2429_v60  ;;  %v2299_v59 = vmax.f32 %v2171_v61, %v2235_v19  ;;  %v2172_v35 = vmax.f32 %v4271_v20, %v3494_v7  ;;  %v2236_v54 = vmax.f32 %v4273_v21, %v3622_v63  ;;  %v1429_v42 = vpop.f32.mrb[75].mxu0  ;;  %v1941_v14 = vpop.f32.mrb[75].mxu1 }
 0x189   :  { %v3089_v62 = vpack.c.bf16 %v2428_v1, %v2427_v30  ;;  %v2297_v15 = vmax.f32 %v2169_v31, %v2233_v34  ;;  %v2170_v55 = vmax.f32 %v4281_v24, %v1429_v42  ;;  %v2234_v2 = vmax.f32 %v4283_v25, %v1941_v14 }
 0x18a   :  { %3238 = vst [vmem:[%s4807_s3 + $0x18] sm:$0xff] %v3094_v6   ;;  %v2369_v16 = vadd.f32 %v4516_v23, %v2299_v59  ;;  %v2300_v17 = vmax.f32 %v2172_v35, %v2236_v54 }
 0x18b   :  { %3237 = vst [vmem:[%s4807_s3 + $0x10] sm:$0xff] %v3089_v62   ;;  %v2367_v20 = vadd.f32 %v4516_v23, %v2297_v15  ;;  %v2298_v21 = vmax.f32 %v2170_v55, %v2234_v2 }
 0x18c   :  { %v2370_v43 = vadd.f32 %v4516_v23, %v2300_v17  ;;  %v2433_v57 = vmax.f32 %v2369_v16, 0.0 }
 0x18d   :  { %v2368_v24 = vadd.f32 %v4516_v23, %v2298_v21  ;;  %v3497_v3 = vpop.f32.mrb[76].mxu0  ;;  %v3625_v25 = vpop.f32.mrb[76].mxu1  ;;  %v2431_v10 = vmax.f32 %v2367_v20, 0.0 }
 0x18e   :  { %v2434_v56 = vmax.f32 %v2370_v43, 0.0  ;;  %v2175_v4 = vmax.f32 %v4285_v26, %v3497_v3  ;;  %v2239_v5 = vmax.f32 %v4287_v27, %v3625_v25  ;;  %v1442_v8 = vpop.f32.mrb[77].mxu0  ;;  %v1954_v9 = vpop.f32.mrb[77].mxu1 }
 0x18f   :  { %v2432_v12 = vmax.f32 %v2368_v24, 0.0  ;;  %v2173_v11 = vmax.f32 %v4289_v28, %v1442_v8  ;;  %v2237_v13 = vmax.f32 %v4291_v29, %v1954_v9  ;;  %v3498_v60 = vpop.f32.mrb[78].mxu0  ;;  %v3626_v18 = vpop.f32.mrb[78].mxu1 }
 0x190   :  { %v3104_v61 = vpack.c.bf16 %v2434_v56, %v2433_v57  ;;  %v2303_v19 = vmax.f32 %v2175_v4, %v2239_v5  ;;  %v2176_v22 = vmax.f32 %v4299_v32, %v3498_v60  ;;  %v2240_v0 = vmax.f32 %v4301_v33, %v3626_v18  ;;  %v1445_v30 = vpop.f32.mrb[79].mxu0  ;;  %v1957_v26 = vpop.f32.mrb[79].mxu1 }
 0x191   :  { %v3099_v1 = vpack.c.bf16 %v2432_v12, %v2431_v10  ;;  %v2301_v27 = vmax.f32 %v2173_v11, %v2237_v13  ;;  %v2174_v31 = vmax.f32 %v4309_v36, %v1445_v30  ;;  %v2238_v34 = vmax.f32 %v4311_v37, %v1957_v26 }
 0x192   :  { %3240 = vst [vmem:[%s4807_s3 + $0x28] sm:$0xff] %v3104_v61   ;;  %v2373_v28 = vadd.f32 %v4516_v23, %v2303_v19  ;;  %v2304_v29 = vmax.f32 %v2176_v22, %v2240_v0 }
 0x193   :  { %3239 = vst [vmem:[%s4807_s3 + $0x20] sm:$0xff] %v3099_v1   ;;  %v2371_v32 = vadd.f32 %v4516_v23, %v2301_v27  ;;  %v2302_v33 = vmax.f32 %v2174_v31, %v2238_v34 }
 0x194   :  { %v2374_v7 = vadd.f32 %v4516_v23, %v2304_v29  ;;  %v2437_v6 = vmax.f32 %v2373_v28, 0.0  ;;  %v4889_v29 = vld [vmem:[#allocation2_spill] sm:$0xff] }
 0x195   :  { %v2372_v36 = vadd.f32 %v4516_v23, %v2302_v33  ;;  %v3501_v63 = vpop.f32.mrb[80].mxu0  ;;  %v3629_v37 = vpop.f32.mrb[80].mxu1  ;;  %v2435_v62 = vmax.f32 %v2371_v32, 0.0 }
 0x196   :  { %v2438_v59 = vmax.f32 %v2374_v7, 0.0  ;;  %v2179_v35 = vmax.f32 %v4313_v38, %v3501_v63  ;;  %v2243_v54 = vmax.f32 %v4315_v39, %v3629_v37  ;;  %v1458_v42 = vpop.f32.mrb[81].mxu0  ;;  %v1970_v14 = vpop.f32.mrb[81].mxu1 }
 0x197   :  { %v2436_v15 = vmax.f32 %v2372_v36, 0.0  ;;  %v2177_v55 = vmax.f32 %v4317_v40, %v1458_v42  ;;  %v2241_v2 = vmax.f32 %v4319_v41, %v1970_v14  ;;  %v3502_v16 = vpop.f32.mrb[82].mxu0  ;;  %v3630_v17 = vpop.f32.mrb[82].mxu1 }
 0x198   :  { %v3114_v20 = vpack.c.bf16 %v2438_v59, %v2437_v6  ;;  %v2307_v21 = vmax.f32 %v2179_v35, %v2243_v54  ;;  %v2180_v43 = vmax.f32 %v4327_v44, %v3502_v16  ;;  %v2244_v24 = vmax.f32 %v4329_v45, %v3630_v17  ;;  %v1461_v3 = vpop.f32.mrb[83].mxu0  ;;  %v1973_v38 = vpop.f32.mrb[83].mxu1  ;;  %v4890_v6 = vld [vmem:[#allocation3_spill] sm:$0xff]  ;;  %v4891_v35 = vld [vmem:[#allocation4_spill] sm:$0xff]  ;;  %v4893_v16 = vld [vmem:[#allocation6_spill] sm:$0xff] }
 0x199   :  { %v3109_v25 = vpack.c.bf16 %v2436_v15, %v2435_v62  ;;  %v2305_v39 = vmax.f32 %v2177_v55, %v2241_v2  ;;  %v2178_v57 = vmax.f32 %v4331_v46, %v1461_v3  ;;  %v2242_v56 = vmax.f32 %v4333_v47, %v1973_v38  ;;  %v4892_v55 = vld [vmem:[#allocation5_spill] sm:$0xff]  ;;  %v4894_v3 = vld [vmem:[#allocation7_spill] sm:$0xff] }
 0x19a   :  { %3242 = vst [vmem:[%s4807_s3 + $0x38] sm:$0xff] %v3114_v20   ;;  %v2377_v40 = vadd.f32 %v4516_v23, %v2307_v21  ;;  %v2308_v41 = vmax.f32 %v2180_v43, %v2244_v24 }
 0x19b   :  { %3241 = vst [vmem:[%s4807_s3 + $0x30] sm:$0xff] %v3109_v25   ;;  %v2375_v44 = vadd.f32 %v4516_v23, %v2305_v39  ;;  %v2306_v45 = vmax.f32 %v2178_v57, %v2242_v56  ;;  %v4895_v25 = vld [vmem:[#allocation8_spill] sm:$0xff] }
 0x19c   :  { %v2378_v4 = vadd.f32 %v4516_v23, %v2308_v41  ;;  %v2441_v8 = vmax.f32 %v2377_v40, 0.0 }
 0x19d   :  { %v2376_v46 = vadd.f32 %v4516_v23, %v2306_v45  ;;  %v3505_v5 = vpop.f32.mrb[84].mxu0  ;;  %v3633_v47 = vpop.f32.mrb[84].mxu1  ;;  %v2439_v60 = vmax.f32 %v2375_v44, 0.0  ;;  %v4896_v44 = vld [vmem:[#allocation9_spill] sm:$0xff] }
 0x19e   :  { %v2442_v9 = vmax.f32 %v2378_v4, 0.0  ;;  %v2183_v10 = vmax.f32 %v4335_v48, %v3505_v5  ;;  %v2247_v12 = vmax.f32 %v4337_v49, %v3633_v47  ;;  %v1474_v11 = vpop.f32.mrb[85].mxu0  ;;  %v1986_v13 = vpop.f32.mrb[85].mxu1  ;;  %v4897_v4 = vld [vmem:[#allocation10_spill] sm:$0xff] }
 0x19f   :  { %v2440_v18 = vmax.f32 %v2376_v46, 0.0  ;;  %v2181_v61 = vmax.f32 %v4339_v50, %v1474_v11  ;;  %v2245_v19 = vmax.f32 %v4341_v51, %v1986_v13  ;;  %v3506_v22 = vpop.f32.mrb[86].mxu0  ;;  %v3634_v0 = vpop.f32.mrb[86].mxu1 }
 0x1a0   :  { %v3124_v30 = vpack.c.bf16 %v2442_v9, %v2441_v8  ;;  %v2311_v26 = vmax.f32 %v2183_v10, %v2247_v12  ;;  %v2184_v1 = vmax.f32 %v4343_v52, %v3506_v22  ;;  %v2248_v27 = vmax.f32 %v4345_v53, %v3634_v0  ;;  %v1477_v31 = vpop.f32.mrb[87].mxu0  ;;  %v1989_v48 = vpop.f32.mrb[87].mxu1  ;;  %v4899_v22 = vld [vmem:[#allocation12_spill] sm:$0xff] }
 0x1a1   :  { %v3119_v34 = vpack.c.bf16 %v2440_v18, %v2439_v60  ;;  %v2309_v49 = vmax.f32 %v2181_v61, %v2245_v19  ;;  %v2182_v28 = vmax.f32 %v4347_v58, %v1477_v31  ;;  %v2246_v32 = vmax.f32 %v4889_v29, %v1989_v48  ;;  %v4898_v61 = vld [vmem:[#allocation11_spill] sm:$0xff]  ;;  %v4900_v31 = vld [vmem:[#allocation13_spill] sm:$0xff] }
 0x1a2   :  { %3244 = vst [vmem:[%s4807_s3 + $0x48] sm:$0xff] %v3124_v30   ;;  %v2381_v50 = vadd.f32 %v4516_v23, %v2311_v26  ;;  %v2312_v51 = vmax.f32 %v2184_v1, %v2248_v27 }
 0x1a3   :  { %3243 = vst [vmem:[%s4807_s3 + $0x40] sm:$0xff] %v3119_v34   ;;  %v2379_v52 = vadd.f32 %v4516_v23, %v2309_v49  ;;  %v2310_v53 = vmax.f32 %v2182_v28, %v2246_v32  ;;  %v4901_v34 = vld [vmem:[#allocation14_spill] sm:$0xff] }
 0x1a4   :  { %v2382_v33 = vadd.f32 %v4516_v23, %v2312_v51  ;;  %v2445_v63 = vmax.f32 %v2381_v50, 0.0  ;;  %v4902_v51 = vld [vmem:[#allocation15_spill] sm:$0xff] }
 0x1a5   :  { %v2380_v58 = vadd.f32 %v4516_v23, %v2310_v53  ;;  %v3509_v7 = vpop.f32.mrb[88].mxu0  ;;  %v3637_v36 = vpop.f32.mrb[88].mxu1  ;;  %v2443_v62 = vmax.f32 %v2379_v52, 0.0  ;;  %v4903_v53 = vld [vmem:[#allocation16_spill] sm:$0xff] }
 0x1a6   :  { %v2446_v37 = vmax.f32 %v2382_v33, 0.0  ;;  %v2187_v59 = vmax.f32 %v4890_v6, %v3509_v7  ;;  %v2251_v54 = vmax.f32 %v4891_v35, %v3637_v36  ;;  %v1490_v42 = vpop.f32.mrb[89].mxu0  ;;  %v2002_v14 = vpop.f32.mrb[89].mxu1 }
 0x1a7   :  { %v2444_v15 = vmax.f32 %v2380_v58, 0.0  ;;  %v2185_v2 = vmax.f32 %v4892_v55, %v1490_v42  ;;  %v2249_v17 = vmax.f32 %v4893_v16, %v2002_v14  ;;  %v3510_v20 = vpop.f32.mrb[90].mxu0  ;;  %v3638_v21 = vpop.f32.mrb[90].mxu1 }
 0x1a8   :  { %v3134_v43 = vpack.c.bf16 %v2446_v37, %v2445_v63  ;;  %v2315_v24 = vmax.f32 %v2187_v59, %v2251_v54  ;;  %v2188_v38 = vmax.f32 %v4894_v3, %v3510_v20  ;;  %v2252_v39 = vmax.f32 %v4895_v25, %v3638_v21  ;;  %v1493_v57 = vpop.f32.mrb[91].mxu0  ;;  %v2005_v56 = vpop.f32.mrb[91].mxu1  ;;  %v4904_v37 = vld [vmem:[#allocation17_spill] sm:$0xff]  ;;  %v4905_v59 = vld [vmem:[#allocation18_spill] sm:$0xff]  ;;  %v4906_v21 = vld [vmem:[#allocation19_spill] sm:$0xff] }
 0x1a9   :  { %v3129_v40 = vpack.c.bf16 %v2444_v15, %v2443_v62  ;;  %v2313_v41 = vmax.f32 %v2185_v2, %v2249_v17  ;;  %v2186_v45 = vmax.f32 %v4896_v44, %v1493_v57  ;;  %v2250_v46 = vmax.f32 %v4897_v4, %v2005_v56  ;;  %v4908_v56 = vld [vmem:[#allocation21_spill] sm:$0xff] }
 0x1aa   :  { %3246 = vst [vmem:[%s4807_s3 + $0x58] sm:$0xff] %v3134_v43   ;;  %v2385_v5 = vadd.f32 %v4516_v23, %v2315_v24  ;;  %v2316_v47 = vmax.f32 %v2188_v38, %v2252_v39  ;;  %v4907_v24 = vld [vmem:[#allocation20_spill] sm:$0xff] }
 0x1ab   :  { %3245 = vst [vmem:[%s4807_s3 + $0x50] sm:$0xff] %v3129_v40   ;;  %v2383_v8 = vadd.f32 %v4516_v23, %v2313_v41  ;;  %v2314_v9 = vmax.f32 %v2186_v45, %v2250_v46  ;;  %v4909_v41 = vld [vmem:[#allocation22_spill] sm:$0xff] }
 0x1ac   :  { %v2386_v10 = vadd.f32 %v4516_v23, %v2316_v47  ;;  %v2449_v60 = vmax.f32 %v2385_v5, 0.0  ;;  %v4910_v47 = vld [vmem:[#allocation23_spill] sm:$0xff] }
 0x1ad   :  { %v2384_v12 = vadd.f32 %v4516_v23, %v2314_v9  ;;  %v3513_v11 = vpop.f32.mrb[92].mxu0  ;;  %v3641_v13 = vpop.f32.mrb[92].mxu1  ;;  %v2447_v1 = vmax.f32 %v2383_v8, 0.0  ;;  %v4911_v9 = vld [vmem:[#allocation24_spill] sm:$0xff] }
 0x1ae   :  { %v2450_v18 = vmax.f32 %v2386_v10, 0.0  ;;  %v2191_v19 = vmax.f32 %v4898_v61, %v3513_v11  ;;  %v2255_v0 = vmax.f32 %v4899_v22, %v3641_v13  ;;  %v1506_v30 = vpop.f32.mrb[93].mxu0  ;;  %v2018_v26 = vpop.f32.mrb[93].mxu1 }
 0x1af   :  { %v2448_v27 = vmax.f32 %v2384_v12, 0.0  ;;  %v2189_v48 = vmax.f32 %v4900_v31, %v1506_v30  ;;  %v2253_v49 = vmax.f32 %v4901_v34, %v2018_v26  ;;  %v3514_v28 = vpop.f32.mrb[94].mxu0  ;;  %v3642_v29 = vpop.f32.mrb[94].mxu1 }
 0x1b0   :  { %v3144_v32 = vpack.c.bf16 %v2450_v18, %v2449_v60  ;;  %v2319_v50 = vmax.f32 %v2191_v19, %v2255_v0  ;;  %v2192_v52 = vmax.f32 %v4902_v51, %v3514_v28  ;;  %v2256_v33 = vmax.f32 %v4903_v53, %v3642_v29  ;;  %v1509_v58 = vpop.f32.mrb[95].mxu0  ;;  %v2021_v7 = vpop.f32.mrb[95].mxu1  ;;  %v4912_v18 = vld [vmem:[#allocation25_spill] sm:$0xff]  ;;  %v4913_v19 = vld [vmem:[#allocation26_spill] sm:$0xff]  ;;  %v4914_v29 = vld [vmem:[#allocation27_spill] sm:$0xff] }
 0x1b1   :  { %v3139_v36 = vpack.c.bf16 %v2448_v27, %v2447_v1  ;;  %v2317_v63 = vmax.f32 %v2189_v48, %v2253_v49  ;;  %v2190_v6 = vmax.f32 %v4904_v37, %v1509_v58  ;;  %v2254_v35 = vmax.f32 %v4905_v59, %v2021_v7  ;;  %v4916_v7 = vld [vmem:[#allocation29_spill] sm:$0xff] }
 0x1b2   :  { %3248 = vst [vmem:[%s4807_s3 + $0x68] sm:$0xff] %v3144_v32   ;;  %v2389_v54 = vadd.f32 %v4516_v23, %v2319_v50  ;;  %v2320_v42 = vmax.f32 %v2192_v52, %v2256_v33  ;;  %v4915_v50 = vld [vmem:[#allocation28_spill] sm:$0xff] }
 0x1b3   :  { %3247 = vst [vmem:[%s4807_s3 + $0x60] sm:$0xff] %v3139_v36   ;;  %v2387_v14 = vadd.f32 %v4516_v23, %v2317_v63  ;;  %v2318_v62 = vmax.f32 %v2190_v6, %v2254_v35  ;;  %v4917_v63 = vld [vmem:[#allocation30_spill] sm:$0xff] }
 0x1b4   :  { %v2390_v15 = vadd.f32 %v4516_v23, %v2320_v42  ;;  %v2453_v17 = vmax.f32 %v2389_v54, 0.0  ;;  %v4918_v42 = vld [vmem:[#allocation31_spill] sm:$0xff] }
 0x1b5   :  { %v2388_v55 = vadd.f32 %v4516_v23, %v2318_v62  ;;  %v3517_v2 = vpop.f32.mrb[96].mxu0  ;;  %v3645_v16 = vpop.f32.mrb[96].mxu1  ;;  %v2451_v39 = vmax.f32 %v2387_v14, 0.0  ;;  %v4919_v62 = vld [vmem:[#allocation32_spill] sm:$0xff] }
 0x1b6   :  { %v2454_v20 = vmax.f32 %v2390_v15, 0.0  ;;  %v2195_v43 = vmax.f32 %v4906_v21, %v3517_v2  ;;  %v2259_v3 = vmax.f32 %v4907_v24, %v3645_v16  ;;  %v1522_v38 = vpop.f32.mrb[97].mxu0  ;;  %v2034_v25 = vpop.f32.mrb[97].mxu1 }
 0x1b7   :  { %v2452_v57 = vmax.f32 %v2388_v55, 0.0  ;;  %v2193_v40 = vmax.f32 %v4908_v56, %v1522_v38  ;;  %v2257_v44 = vmax.f32 %v4909_v41, %v2034_v25  ;;  %v3518_v45 = vpop.f32.mrb[98].mxu0  ;;  %v3646_v4 = vpop.f32.mrb[98].mxu1 }
 0x1b8   :  { %v3154_v46 = vpack.c.bf16 %v2454_v20, %v2453_v17  ;;  %v2323_v5 = vmax.f32 %v2195_v43, %v2259_v3  ;;  %v2196_v8 = vmax.f32 %v4910_v47, %v3518_v45  ;;  %v2260_v10 = vmax.f32 %v4911_v9, %v3646_v4  ;;  %v1525_v12 = vpop.f32.mrb[99].mxu0  ;;  %v2037_v11 = vpop.f32.mrb[99].mxu1  ;;  %v4920_v20 = vld [vmem:[#allocation33_spill] sm:$0xff]  ;;  %v4921_v43 = vld [vmem:[#allocation34_spill] sm:$0xff]  ;;  %v4922_v4 = vld [vmem:[#allocation35_spill] sm:$0xff] }
 0x1b9   :  { %v3149_v13 = vpack.c.bf16 %v2452_v57, %v2451_v39  ;;  %v2321_v60 = vmax.f32 %v2193_v40, %v2257_v44  ;;  %v2194_v61 = vmax.f32 %v4912_v18, %v1525_v12  ;;  %v2258_v22 = vmax.f32 %v4913_v19, %v2037_v11  ;;  %v4924_v11 = vld [vmem:[#allocation37_spill] sm:$0xff] }
 0x1ba   :  { %3250 = vst [vmem:[%s4807_s3 + $0x78] sm:$0xff] %v3154_v46   ;;  %v2393_v0 = vadd.f32 %v4516_v23, %v2323_v5  ;;  %v2324_v30 = vmax.f32 %v2196_v8, %v2260_v10  ;;  %v4923_v5 = vld [vmem:[#allocation36_spill] sm:$0xff] }
 0x1bb   :  { %3249 = vst [vmem:[%s4807_s3 + $0x70] sm:$0xff] %v3149_v13   ;;  %v2391_v26 = vadd.f32 %v4516_v23, %v2321_v60  ;;  %v2322_v1 = vmax.f32 %v2194_v61, %v2258_v22  ;;  %v4925_v60 = vld [vmem:[#allocation38_spill] sm:$0xff] }
 0x1bc   :  { %v2394_v27 = vadd.f32 %v4516_v23, %v2324_v30  ;;  %v2457_v49 = vmax.f32 %v2393_v0, 0.0  ;;  %v4926_v30 = vld [vmem:[#allocation39_spill] sm:$0xff] }
 0x1bd   :  { %v2392_v31 = vadd.f32 %v4516_v23, %v2322_v1  ;;  %v3521_v48 = vpop.f32.mrb[100].mxu0  ;;  %v3649_v34 = vpop.f32.mrb[100].mxu1  ;;  %v2455_v33 = vmax.f32 %v2391_v26, 0.0  ;;  %v4927_v1 = vld [vmem:[#allocation40_spill] sm:$0xff] }
 0x1be   :  { %v2458_v28 = vmax.f32 %v2394_v27, 0.0  ;;  %v2199_v32 = vmax.f32 %v4914_v29, %v3521_v48  ;;  %v2263_v51 = vmax.f32 %v4915_v50, %v3649_v34  ;;  %v1538_v52 = vpop.f32.mrb[101].mxu0  ;;  %v2050_v53 = vpop.f32.mrb[101].mxu1 }
 0x1bf   :  { %v2456_v58 = vmax.f32 %v2392_v31, 0.0  ;;  %v2197_v36 = vmax.f32 %v4916_v7, %v1538_v52  ;;  %v2261_v37 = vmax.f32 %v4917_v63, %v2050_v53  ;;  %v3522_v6 = vpop.f32.mrb[102].mxu0  ;;  %v3650_v59 = vpop.f32.mrb[102].mxu1 }
 0x1c0   :  { %v3164_v35 = vpack.c.bf16 %v2458_v28, %v2457_v49  ;;  %v2327_v54 = vmax.f32 %v2199_v32, %v2263_v51  ;;  %v2200_v14 = vmax.f32 %v4918_v42, %v3522_v6  ;;  %v2264_v15 = vmax.f32 %v4919_v62, %v3650_v59  ;;  %v1541_v55 = vpop.f32.mrb[103].mxu0  ;;  %v2053_v2 = vpop.f32.mrb[103].mxu1  ;;  %v4928_v28 = vld [vmem:[#allocation41_spill] sm:$0xff]  ;;  %v4929_v32 = vld [vmem:[#allocation42_spill] sm:$0xff]  ;;  %v4930_v59 = vld [vmem:[#allocation43_spill] sm:$0xff] }
 0x1c1   :  { %v3159_v16 = vpack.c.bf16 %v2456_v58, %v2455_v33  ;;  %v2325_v17 = vmax.f32 %v2197_v36, %v2261_v37  ;;  %v2198_v21 = vmax.f32 %v4920_v20, %v1541_v55  ;;  %v2262_v24 = vmax.f32 %v4921_v43, %v2053_v2  ;;  %v4932_v2 = vld [vmem:[#allocation45_spill] sm:$0xff] }
 0x1c2   :  { %3252 = vst [vmem:[%s4807_s3 + $0x88] sm:$0xff] %v3164_v35   ;;  %v2397_v3 = vadd.f32 %v4516_v23, %v2327_v54  ;;  %v2328_v38 = vmax.f32 %v2200_v14, %v2264_v15  ;;  %v4931_v54 = vld [vmem:[#allocation44_spill] sm:$0xff] }
 0x1c3   :  { %3251 = vst [vmem:[%s4807_s3 + $0x80] sm:$0xff] %v3159_v16   ;;  %v2395_v25 = vadd.f32 %v4516_v23, %v2325_v17  ;;  %v2326_v39 = vmax.f32 %v2198_v21, %v2262_v24  ;;  %v4933_v17 = vld [vmem:[#allocation46_spill] sm:$0xff] }
 0x1c4   :  { %v2398_v57 = vadd.f32 %v4516_v23, %v2328_v38  ;;  %v2461_v44 = vmax.f32 %v2397_v3, 0.0  ;;  %v4934_v38 = vld [vmem:[#allocation47_spill] sm:$0xff] }
 0x1c5   :  { %v2396_v56 = vadd.f32 %v4516_v23, %v2326_v39  ;;  %v3525_v40 = vpop.f32.mrb[104].mxu0  ;;  %v3653_v41 = vpop.f32.mrb[104].mxu1  ;;  %v2459_v10 = vmax.f32 %v2395_v25, 0.0  ;;  %v4935_v39 = vld [vmem:[#allocation48_spill] sm:$0xff] }
 0x1c6   :  { %v2462_v45 = vmax.f32 %v2398_v57, 0.0  ;;  %v2203_v46 = vmax.f32 %v4922_v4, %v3525_v40  ;;  %v2267_v47 = vmax.f32 %v4923_v5, %v3653_v41  ;;  %v1554_v8 = vpop.f32.mrb[105].mxu0  ;;  %v2066_v9 = vpop.f32.mrb[105].mxu1 }
 0x1c7   :  { %v2460_v12 = vmax.f32 %v2396_v56, 0.0  ;;  %v2201_v13 = vmax.f32 %v4924_v11, %v1554_v8  ;;  %v2265_v18 = vmax.f32 %v4925_v60, %v2066_v9  ;;  %v3526_v61 = vpop.f32.mrb[106].mxu0  ;;  %v3654_v19 = vpop.f32.mrb[106].mxu1 }
 0x1c8   :  { %v3174_v22 = vpack.c.bf16 %v2462_v45, %v2461_v44  ;;  %v2331_v0 = vmax.f32 %v2203_v46, %v2267_v47  ;;  %v2204_v26 = vmax.f32 %v4926_v30, %v3526_v61  ;;  %v2268_v27 = vmax.f32 %v4927_v1, %v3654_v19  ;;  %v1557_v31 = vpop.f32.mrb[107].mxu0  ;;  %v2069_v48 = vpop.f32.mrb[107].mxu1  ;;  %v4936_v45 = vld [vmem:[#allocation49_spill] sm:$0xff]  ;;  %v4937_v46 = vld [vmem:[#allocation50_spill] sm:$0xff]  ;;  %v4938_v19 = vld [vmem:[#allocation51_spill] sm:$0xff] }
 0x1c9   :  { %v3169_v34 = vpack.c.bf16 %v2460_v12, %v2459_v10  ;;  %v2329_v49 = vmax.f32 %v2201_v13, %v2265_v18  ;;  %v2202_v29 = vmax.f32 %v4928_v28, %v1557_v31  ;;  %v2266_v50 = vmax.f32 %v4929_v32, %v2069_v48  ;;  %v4940_v48 = vld [vmem:[#allocation53_spill] sm:$0xff] }
 0x1ca   :  { %3254 = vst [vmem:[%s4807_s3 + $0x98] sm:$0xff] %v3174_v22   ;;  %v2401_v51 = vadd.f32 %v4516_v23, %v2331_v0  ;;  %v2332_v52 = vmax.f32 %v2204_v26, %v2268_v27  ;;  %v4939_v0 = vld [vmem:[#allocation52_spill] sm:$0xff] }
 0x1cb   :  { %3253 = vst [vmem:[%s4807_s3 + $0x90] sm:$0xff] %v3169_v34   ;;  %v2399_v53 = vadd.f32 %v4516_v23, %v2329_v49  ;;  %v2330_v33 = vmax.f32 %v2202_v29, %v2266_v50  ;;  %v4941_v49 = vld [vmem:[#allocation54_spill] sm:$0xff] }
 0x1cc   :  { %v2402_v58 = vadd.f32 %v4516_v23, %v2332_v52  ;;  %v2465_v37 = vmax.f32 %v2401_v51, 0.0  ;;  %v4942_v52 = vld [vmem:[#allocation55_spill] sm:$0xff] }
 0x1cd   :  { %v2400_v7 = vadd.f32 %v4516_v23, %v2330_v33  ;;  %v3529_v36 = vpop.f32.mrb[108].mxu0  ;;  %v3657_v63 = vpop.f32.mrb[108].mxu1  ;;  %v2463_v15 = vmax.f32 %v2399_v53, 0.0  ;;  %v4943_v33 = vld [vmem:[#allocation56_spill] sm:$0xff] }
 0x1ce   :  { %v2466_v6 = vmax.f32 %v2402_v58, 0.0  ;;  %v2207_v35 = vmax.f32 %v4930_v59, %v3529_v36  ;;  %v2271_v42 = vmax.f32 %v4931_v54, %v3657_v63  ;;  %v1570_v14 = vpop.f32.mrb[109].mxu0  ;;  %v2082_v62 = vpop.f32.mrb[109].mxu1 }
 0x1cf   :  { %v2464_v55 = vmax.f32 %v2400_v7, 0.0  ;;  %v2205_v16 = vmax.f32 %v4932_v2, %v1570_v14  ;;  %v2269_v20 = vmax.f32 %v4933_v17, %v2082_v62  ;;  %v3530_v21 = vpop.f32.mrb[110].mxu0  ;;  %v3658_v43 = vpop.f32.mrb[110].mxu1 }
 0x1d0   :  { %v3184_v24 = vpack.c.bf16 %v2466_v6, %v2465_v37  ;;  %v2335_v3 = vmax.f32 %v2207_v35, %v2271_v42  ;;  %v2208_v25 = vmax.f32 %v4934_v38, %v3530_v21  ;;  %v2272_v57 = vmax.f32 %v4935_v39, %v3658_v43  ;;  %v1573_v56 = vpop.f32.mrb[111].mxu0  ;;  %v2085_v40 = vpop.f32.mrb[111].mxu1  ;;  %v4944_v6 = vld [vmem:[#allocation57_spill] sm:$0xff]  ;;  %v4945_v35 = vld [vmem:[#allocation58_spill] sm:$0xff]  ;;  %v4946_v43 = vld [vmem:[#allocation59_spill] sm:$0xff] }
 0x1d1   :  { %v3179_v41 = vpack.c.bf16 %v2464_v55, %v2463_v15  ;;  %v2333_v44 = vmax.f32 %v2205_v16, %v2269_v20  ;;  %v2206_v4 = vmax.f32 %v4936_v45, %v1573_v56  ;;  %v2270_v5 = vmax.f32 %v4937_v46, %v2085_v40  ;;  %v4948_v40 = vld [vmem:[#allocation61_spill] sm:$0xff] }
 0x1d2   :  { %3256 = vst [vmem:[%s4807_s3 + $0xa8] sm:$0xff] %v3184_v24   ;;  %v2405_v47 = vadd.f32 %v4516_v23, %v2335_v3  ;;  %v2336_v8 = vmax.f32 %v2208_v25, %v2272_v57  ;;  %v4947_v3 = vld [vmem:[#allocation60_spill] sm:$0xff] }
 0x1d3   :  { %3255 = vst [vmem:[%s4807_s3 + $0xa0] sm:$0xff] %v3179_v41   ;;  %v2403_v9 = vadd.f32 %v4516_v23, %v2333_v44  ;;  %v2334_v10 = vmax.f32 %v2206_v4, %v2270_v5  ;;  %v4949_v44 = vld [vmem:[#allocation62_spill] sm:$0xff] }
 0x1d4   :  { %v2406_v12 = vadd.f32 %v4516_v23, %v2336_v8  ;;  %v2469_v18 = vmax.f32 %v2405_v47, 0.0  ;;  %v4950_v8 = vld [vmem:[#allocation63_spill] sm:$0xff] }
 0x1d5   :  { %v2404_v11 = vadd.f32 %v4516_v23, %v2334_v10  ;;  %v3533_v13 = vpop.f32.mrb[112].mxu0  ;;  %v3661_v60 = vpop.f32.mrb[112].mxu1  ;;  %v2467_v27 = vmax.f32 %v2403_v9, 0.0  ;;  %v4951_v10 = vld [vmem:[#allocation64_spill] sm:$0xff] }
 0x1d6   :  { %v2470_v61 = vmax.f32 %v2406_v12, 0.0  ;;  %v2211_v22 = vmax.f32 %v4938_v19, %v3533_v13  ;;  %v2275_v30 = vmax.f32 %v4939_v0, %v3661_v60  ;;  %v1586_v26 = vpop.f32.mrb[113].mxu0  ;;  %v2098_v1 = vpop.f32.mrb[113].mxu1 }
 0x1d7   :  { %v2468_v31 = vmax.f32 %v2404_v11, 0.0  ;;  %v2209_v34 = vmax.f32 %v4940_v48, %v1586_v26  ;;  %v2273_v28 = vmax.f32 %v4941_v49, %v2098_v1  ;;  %v3534_v29 = vpop.f32.mrb[114].mxu0  ;;  %v3662_v32 = vpop.f32.mrb[114].mxu1 }
 0x1d8   :  { %v3194_v50 = vpack.c.bf16 %v2470_v61, %v2469_v18  ;;  %v2339_v51 = vmax.f32 %v2211_v22, %v2275_v30  ;;  %v2212_v53 = vmax.f32 %v4942_v52, %v3534_v29  ;;  %v2276_v58 = vmax.f32 %v4943_v33, %v3662_v32  ;;  %v1589_v7 = vpop.f32.mrb[115].mxu0  ;;  %v2101_v36 = vpop.f32.mrb[115].mxu1  ;;  %v4952_v61 = vld [vmem:[#allocation65_spill] sm:$0xff]  ;;  %v4953_v22 = vld [vmem:[#allocation66_spill] sm:$0xff]  ;;  %v4954_v32 = vld [vmem:[#allocation67_spill] sm:$0xff] }
 0x1d9   :  { %v3189_v63 = vpack.c.bf16 %v2468_v31, %v2467_v27  ;;  %v2337_v37 = vmax.f32 %v2209_v34, %v2273_v28  ;;  %v2210_v59 = vmax.f32 %v4944_v6, %v1589_v7  ;;  %v2274_v54 = vmax.f32 %v4945_v35, %v2101_v36  ;;  %v4956_v36 = vld [vmem:[#allocation69_spill] sm:$0xff] }
 0x1da   :  { %3258 = vst [vmem:[%s4807_s3 + $0xb8] sm:$0xff] %v3194_v50   ;;  %v2409_v42 = vadd.f32 %v4516_v23, %v2339_v51  ;;  %v2340_v14 = vmax.f32 %v2212_v53, %v2276_v58  ;;  %v4955_v51 = vld [vmem:[#allocation68_spill] sm:$0xff] }
 0x1db   :  { %3257 = vst [vmem:[%s4807_s3 + $0xb0] sm:$0xff] %v3189_v63   ;;  %v2407_v62 = vadd.f32 %v4516_v23, %v2337_v37  ;;  %v2338_v15 = vmax.f32 %v2210_v59, %v2274_v54  ;;  %v4957_v37 = vld [vmem:[#allocation70_spill] sm:$0xff] }
 0x1dc   :  { %v2410_v55 = vadd.f32 %v4516_v23, %v2340_v14  ;;  %v2473_v20 = vmax.f32 %v2409_v42, 0.0  ;;  %v4958_v14 = vld [vmem:[#allocation71_spill] sm:$0xff] }
 0x1dd   :  { %v2408_v2 = vadd.f32 %v4516_v23, %v2338_v15  ;;  %v3537_v16 = vpop.f32.mrb[116].mxu0  ;;  %v3665_v17 = vpop.f32.mrb[116].mxu1  ;;  %v2471_v57 = vmax.f32 %v2407_v62, 0.0  ;;  %v4959_v15 = vld [vmem:[#allocation72_spill] sm:$0xff] }
 0x1de   :  { %v2474_v21 = vmax.f32 %v2410_v55, 0.0  ;;  %v2215_v24 = vmax.f32 %v4946_v43, %v3537_v16  ;;  %v2279_v38 = vmax.f32 %v4947_v3, %v3665_v17  ;;  %v1602_v25 = vpop.f32.mrb[117].mxu0  ;;  %v2114_v39 = vpop.f32.mrb[117].mxu1 }
 0x1df   :  { %v2472_v56 = vmax.f32 %v2408_v2, 0.0  ;;  %v2213_v41 = vmax.f32 %v4948_v40, %v1602_v25  ;;  %v2277_v45 = vmax.f32 %v4949_v44, %v2114_v39  ;;  %v3538_v4 = vpop.f32.mrb[118].mxu0  ;;  %v3666_v46 = vpop.f32.mrb[118].mxu1 }
 0x1e0   :  { %v3204_v5 = vpack.c.bf16 %v2474_v21, %v2473_v20  ;;  %v2343_v47 = vmax.f32 %v2215_v24, %v2279_v38  ;;  %v2216_v9 = vmax.f32 %v4950_v8, %v3538_v4  ;;  %v2280_v12 = vmax.f32 %v4951_v10, %v3666_v46  ;;  %v1605_v11 = vpop.f32.mrb[119].mxu0  ;;  %v2117_v13 = vpop.f32.mrb[119].mxu1  ;;  %v4960_v21 = vld [vmem:[#allocation73_spill] sm:$0xff]  ;;  %v4961_v24 = vld [vmem:[#allocation74_spill] sm:$0xff]  ;;  %v4962_v46 = vld [vmem:[#allocation75_spill] sm:$0xff] }
 0x1e1   :  { %v3199_v60 = vpack.c.bf16 %v2472_v56, %v2471_v57  ;;  %v2341_v18 = vmax.f32 %v2213_v41, %v2277_v45  ;;  %v2214_v19 = vmax.f32 %v4952_v61, %v1605_v11  ;;  %v2278_v0 = vmax.f32 %v4953_v22, %v2117_v13  ;;  %v4964_v13 = vld [vmem:[#allocation77_spill] sm:$0xff] }
 0x1e2   :  { %3260 = vst [vmem:[%s4807_s3 + $0xc8] sm:$0xff] %v3204_v5   ;;  %v2413_v30 = vadd.f32 %v4516_v23, %v2343_v47  ;;  %v2344_v26 = vmax.f32 %v2216_v9, %v2280_v12  ;;  %v4963_v47 = vld [vmem:[#allocation76_spill] sm:$0xff] }
 0x1e3   :  { %3259 = vst [vmem:[%s4807_s3 + $0xc0] sm:$0xff] %v3199_v60   ;;  %v2411_v1 = vadd.f32 %v4516_v23, %v2341_v18  ;;  %v2342_v27 = vmax.f32 %v2214_v19, %v2278_v0  ;;  %v4965_v18 = vld [vmem:[#allocation78_spill] sm:$0xff] }
 0x1e4   :  { %v2414_v31 = vadd.f32 %v4516_v23, %v2344_v26  ;;  %v2477_v28 = vmax.f32 %v2413_v30, 0.0  ;;  %v4966_v26 = vld [vmem:[#allocation79_spill] sm:$0xff] }
 0x1e5   :  { %v2412_v48 = vadd.f32 %v4516_v23, %v2342_v27  ;;  %v3541_v34 = vpop.f32.mrb[120].mxu0  ;;  %v3669_v49 = vpop.f32.mrb[120].mxu1  ;;  %v2475_v58 = vmax.f32 %v2411_v1, 0.0  ;;  %v4967_v27 = vld [vmem:[#allocation80_spill] sm:$0xff] }
 0x1e6   :  { %v2478_v29 = vmax.f32 %v2414_v31, 0.0  ;;  %v2219_v50 = vmax.f32 %v4954_v32, %v3541_v34  ;;  %v2283_v52 = vmax.f32 %v4955_v51, %v3669_v49  ;;  %v1618_v53 = vpop.f32.mrb[121].mxu0  ;;  %v2130_v33 = vpop.f32.mrb[121].mxu1 }
 0x1e7   :  { %v2476_v7 = vmax.f32 %v2412_v48, 0.0  ;;  %v2217_v63 = vmax.f32 %v4956_v36, %v1618_v53  ;;  %v2281_v6 = vmax.f32 %v4957_v37, %v2130_v33  ;;  %v3542_v59 = vpop.f32.mrb[122].mxu0  ;;  %v3670_v35 = vpop.f32.mrb[122].mxu1 }
 0x1e8   :  { %v3214_v54 = vpack.c.bf16 %v2478_v29, %v2477_v28  ;;  %v2347_v42 = vmax.f32 %v2219_v50, %v2283_v52  ;;  %v2220_v62 = vmax.f32 %v4958_v14, %v3542_v59  ;;  %v2284_v55 = vmax.f32 %v4959_v15, %v3670_v35  ;;  %v1621_v2 = vpop.f32.mrb[123].mxu0  ;;  %v2133_v16 = vpop.f32.mrb[123].mxu1  ;;  %v4968_v29 = vld [vmem:[#allocation81_spill] sm:$0xff]  ;;  %v4969_v50 = vld [vmem:[#allocation82_spill] sm:$0xff] }
 0x1e9   :  { %v3209_v17 = vpack.c.bf16 %v2476_v7, %v2475_v58  ;;  %v2345_v20 = vmax.f32 %v2217_v63, %v2281_v6  ;;  %v2218_v43 = vmax.f32 %v4960_v21, %v1621_v2  ;;  %v2282_v3 = vmax.f32 %v4961_v24, %v2133_v16 }
 0x1ea   :  { %3262 = vst [vmem:[%s4807_s3 + $0xd8] sm:$0xff] %v3214_v54   ;;  %v2417_v38 = vadd.f32 %v4516_v23, %v2347_v42  ;;  %v2348_v25 = vmax.f32 %v2220_v62, %v2284_v55 }
 0x1eb   :  { %3261 = vst [vmem:[%s4807_s3 + $0xd0] sm:$0xff] %v3209_v17   ;;  %v2415_v39 = vadd.f32 %v4516_v23, %v2345_v20  ;;  %v2346_v57 = vmax.f32 %v2218_v43, %v2282_v3 }
 0x1ec   :  { %v2418_v56 = vadd.f32 %v4516_v23, %v2348_v25  ;;  %v2481_v45 = vmax.f32 %v2417_v38, 0.0 }
 0x1ed   :  { %v2416_v40 = vadd.f32 %v4516_v23, %v2346_v57  ;;  %v3545_v41 = vpop.f32.mrb[124].mxu0  ;;  %v3673_v44 = vpop.f32.mrb[124].mxu1  ;;  %v2479_v12 = vmax.f32 %v2415_v39, 0.0 }
 0x1ee   :  { %v2482_v4 = vmax.f32 %v2418_v56, 0.0  ;;  %v2223_v5 = vmax.f32 %v4962_v46, %v3545_v41  ;;  %v2287_v8 = vmax.f32 %v4963_v47, %v3673_v44  ;;  %v1634_v9 = vpop.f32.mrb[125].mxu0  ;;  %v2146_v10 = vpop.f32.mrb[125].mxu1 }
 0x1ef   :  { %v2480_v11 = vmax.f32 %v2416_v40, 0.0  ;;  %v2221_v60 = vmax.f32 %v4964_v13, %v1634_v9  ;;  %v2285_v61 = vmax.f32 %v4965_v18, %v2146_v10  ;;  %v3546_v19 = vpop.f32.mrb[126].mxu0  ;;  %v3674_v22 = vpop.f32.mrb[126].mxu1 }
 0x1f0   :  { %v3224_v0 = vpack.c.bf16 %v2482_v4, %v2481_v45  ;;  %v2351_v30 = vmax.f32 %v2223_v5, %v2287_v8  ;;  %v2224_v1 = vmax.f32 %v4966_v26, %v3546_v19  ;;  %v2288_v31 = vmax.f32 %v4967_v27, %v3674_v22  ;;  %v1637_v48 = vpop.f32.mrb[127].mxu0  ;;  %v2149_v34 = vpop.f32.mrb[127].mxu1 }
 0x1f1   :  { %v3219_v49 = vpack.c.bf16 %v2480_v11, %v2479_v12  ;;  %v2349_v28 = vmax.f32 %v2221_v60, %v2285_v61  ;;  %v2222_v32 = vmax.f32 %v4968_v29, %v1637_v48  ;;  %v2286_v51 = vmax.f32 %v4969_v50, %v2149_v34 }
 0x1f2   :  { %3264 = vst [vmem:[%s4807_s3 + $0xe8] sm:$0xff] %v3224_v0   ;;  %v2421_v52 = vadd.f32 %v4516_v23, %v2351_v30  ;;  %v2352_v53 = vmax.f32 %v2224_v1, %v2288_v31 }
 0x1f3   :  { %3263 = vst [vmem:[%s4807_s3 + $0xe0] sm:$0xff] %v3219_v49   ;;  %v2419_v33 = vadd.f32 %v4516_v23, %v2349_v28  ;;  %v2350_v58 = vmax.f32 %v2222_v32, %v2286_v51 }
 0x1f4   :  { %v2422_v7 = vadd.f32 %v4516_v23, %v2352_v53  ;;  %v2485_v63 = vmax.f32 %v2421_v52, 0.0 }
 0x1f5   :  { %v2420_v36 = vadd.f32 %v4516_v23, %v2350_v58  ;;  %v2483_v6 = vmax.f32 %v2419_v33, 0.0 }
 0x1f6   :  { %v2486_v37 = vmax.f32 %v2422_v7, 0.0 }
 0x1f7   :  { %v2484_v59 = vmax.f32 %v2420_v36, 0.0 }
 0x1f8   :  { %v3234_v35 = vpack.c.bf16 %v2486_v37, %v2485_v63 }
 0x1f9   :  { %v3229_v54 = vpack.c.bf16 %v2484_v59, %v2483_v6 }
 0x1fa   :  { %3266 = vst [vmem:[%s4807_s3 + $0xf8] sm:$0xff] %v3234_v35  }
 0x1fb   :  { %3265 = vst [vmem:[%s4807_s3 + $0xf0] sm:$0xff] %v3229_v54  }

// kernel: conv_classifier_forward.5
= control target key start
LH: loop header
LB: loop body
LE: loop exit
PB: predicated region body
PF: predicated region fallthrough
CT: control target
= control target key end

     0   :  { %v1292_v0 = vmov 0   ;;  %s1726_s1 = inlined_call_operand.vmem [shape: bf16[256,128], index: 1, kind: input, shape index: {}]   ;;  %s1727_s0 = inlined_call_operand.vmem [shape: bf16[4,128,256], index: 0, kind: input, shape index: {}]   ;;  %s1728_s2 = inlined_call_operand.vmem [shape: f32[1,128], index: 2, kind: input, shape index: {}]   ;;  %s1729_s3 = inlined_call_operand.vmem [shape: bf16[128,128], index: 3, kind: output, shape index: {}]  }
   0x1   :  { %528 = vmatprep.subr.bf16.mxu0 %v1292_v0  ;;  %1147 = vmatprep.subr.bf16.mxu1 %v1292_v0  ;;  %v1180_v1 = vld [vmem:[%s1726_s1] sm:$0xff]   ;;  %v1181_v2 = vld [vmem:[%s1726_s1 + $0x8] sm:$0xff]   ;;  %v1182_v3 = vld [vmem:[%s1726_s1 + $0x10] sm:$0xff]  }
   0x2   :  { %529 = vmatpush1.bf16.msra.mxu0 %v1180_v1  ;;  %1163 = vmatpush1.bf16.msra.mxu1 %v1180_v1  ;;  %v1183_v4 = vld [vmem:[%s1726_s1 + $0x18] sm:$0xff]   ;;  %v1184_v5 = vld [vmem:[%s1726_s1 + $0x20] sm:$0xff]   ;;  %v1185_v7 = vld [vmem:[%s1726_s1 + $0x28] sm:$0xff]  }
   0x3   :  { %530 = vmatprep.subr.bf16.mxu0 %v1292_v0  ;;  %1148 = vmatprep.subr.bf16.mxu1 %v1292_v0  ;;  %v1198_v6 = vld [vmem:[%s1727_s0 + $0x4] ss:$8 sps:$4 sm:$0xff]   ;;  %v1186_v9 = vld [vmem:[%s1726_s1 + $0x30] sm:$0xff]   ;;  %v1187_v10 = vld [vmem:[%s1726_s1 + $0x38] sm:$0xff]  }
   0x4   :  { %v1201_v8 = vld [vmem:[%s1727_s0 + $0x104] ss:$8 sps:$4 sm:$0xff]   ;;  %560 = vmatprep.mubr.bf16.mxu0 %v1198_v6  ;;  %v1190_v13 = vld [vmem:[%s1726_s1 + $0x50] sm:$0xff]   ;;  %v1191_v14 = vld [vmem:[%s1726_s1 + $0x58] sm:$0xff]  }
   0x5   :  { %688 = vmatprep.mubr.bf16.mxu1 %v1201_v8  ;;  %v1188_v11 = vld [vmem:[%s1726_s1 + $0x40] sm:$0xff]   ;;  %v1189_v12 = vld [vmem:[%s1726_s1 + $0x48] sm:$0xff]   ;;  %v1194_v17 = vld [vmem:[%s1726_s1 + $0x70] sm:$0xff]  }
   0x6   :  { %531 = vmatpush1.bf16.msra.mxu0 %v1181_v2  ;;  %1164 = vmatpush1.bf16.msra.mxu1 %v1181_v2  ;;  %v1192_v15 = vld [vmem:[%s1726_s1 + $0x60] sm:$0xff]   ;;  %v1193_v16 = vld [vmem:[%s1726_s1 + $0x68] sm:$0xff]   ;;  %v1195_v18 = vld [vmem:[%s1726_s1 + $0x78] sm:$0xff]  }
   0x7   :  { %532 = vmatprep.subr.bf16.mxu0 %v1292_v0  ;;  %1149 = vmatprep.subr.bf16.mxu1 %v1292_v0  ;;  %v1196_v19 = vld [vmem:[%s1727_s0] ss:$8 sps:$4 sm:$0xff]   ;;  %v1202_v21 = vld [vmem:[%s1727_s0 + $0x14] ss:$8 sps:$4 sm:$0xff]   ;;  %v1206_v23 = vld [vmem:[%s1727_s0 + $0x10] ss:$8 sps:$4 sm:$0xff]  }
   0x8   :  { %v1199_v20 = vld [vmem:[%s1727_s0 + $0x100] ss:$8 sps:$4 sm:$0xff]   ;;  %v1204_v22 = vld [vmem:[%s1727_s0 + $0x114] ss:$8 sps:$4 sm:$0xff]   ;;  %v1207_v24 = vld [vmem:[%s1727_s0 + $0x110] ss:$8 sps:$4 sm:$0xff]  }
   0x9   :  { %v1208_v25 = vld [vmem:[%s1727_s0 + $0x24] ss:$8 sps:$4 sm:$0xff]   ;;  %v1212_v27 = vld [vmem:[%s1727_s0 + $0x20] ss:$8 sps:$4 sm:$0xff]   ;;  %v1214_v29 = vld [vmem:[%s1727_s0 + $0x34] ss:$8 sps:$4 sm:$0xff]  }
   0xa   :  { %533 = vmatpush1.bf16.msra.mxu0 %v1182_v3  ;;  %1165 = vmatpush1.bf16.msra.mxu1 %v1182_v3  ;;  %v1210_v26 = vld [vmem:[%s1727_s0 + $0x124] ss:$8 sps:$4 sm:$0xff]   ;;  %v1213_v28 = vld [vmem:[%s1727_s0 + $0x120] ss:$8 sps:$4 sm:$0xff]   ;;  %v1216_v30 = vld [vmem:[%s1727_s0 + $0x134] ss:$8 sps:$4 sm:$0xff]  }
   0xb   :  { %534 = vmatprep.subr.bf16.mxu0 %v1292_v0  ;;  %1150 = vmatprep.subr.bf16.mxu1 %v1292_v0  ;;  %v1218_v31 = vld [vmem:[%s1727_s0 + $0x30] ss:$8 sps:$4 sm:$0xff]   ;;  %v1220_v33 = vld [vmem:[%s1727_s0 + $0x44] ss:$8 sps:$4 sm:$0xff]   ;;  %v1224_v35 = vld [vmem:[%s1727_s0 + $0x40] ss:$8 sps:$4 sm:$0xff]  }
   0xc   :  { %v1219_v32 = vld [vmem:[%s1727_s0 + $0x130] ss:$8 sps:$4 sm:$0xff]   ;;  %v1222_v34 = vld [vmem:[%s1727_s0 + $0x144] ss:$8 sps:$4 sm:$0xff]   ;;  %v1225_v36 = vld [vmem:[%s1727_s0 + $0x140] ss:$8 sps:$4 sm:$0xff]  }
   0xd   :  { %v1226_v37 = vld [vmem:[%s1727_s0 + $0x54] ss:$8 sps:$4 sm:$0xff]   ;;  %v1230_v39 = vld [vmem:[%s1727_s0 + $0x50] ss:$8 sps:$4 sm:$0xff]   ;;  %v1232_v41 = vld [vmem:[%s1727_s0 + $0x64] ss:$8 sps:$4 sm:$0xff]  }
   0xe   :  { %535 = vmatpush1.bf16.msra.mxu0 %v1183_v4  ;;  %1166 = vmatpush1.bf16.msra.mxu1 %v1183_v4  ;;  %v1228_v38 = vld [vmem:[%s1727_s0 + $0x154] ss:$8 sps:$4 sm:$0xff]   ;;  %v1231_v40 = vld [vmem:[%s1727_s0 + $0x150] ss:$8 sps:$4 sm:$0xff]   ;;  %v1234_v42 = vld [vmem:[%s1727_s0 + $0x164] ss:$8 sps:$4 sm:$0xff]  }
   0xf   :  { %536 = vmatprep.subr.bf16.mxu0 %v1292_v0  ;;  %1151 = vmatprep.subr.bf16.mxu1 %v1292_v0  ;;  %v1236_v43 = vld [vmem:[%s1727_s0 + $0x60] ss:$8 sps:$4 sm:$0xff]   ;;  %v1238_v45 = vld [vmem:[%s1727_s0 + $0x74] ss:$8 sps:$4 sm:$0xff]   ;;  %v1242_v47 = vld [vmem:[%s1727_s0 + $0x70] ss:$8 sps:$4 sm:$0xff]  }
  0x10   :  { %v1237_v44 = vld [vmem:[%s1727_s0 + $0x160] ss:$8 sps:$4 sm:$0xff]   ;;  %v1240_v46 = vld [vmem:[%s1727_s0 + $0x174] ss:$8 sps:$4 sm:$0xff]   ;;  %v1243_v48 = vld [vmem:[%s1727_s0 + $0x170] ss:$8 sps:$4 sm:$0xff]  }
  0x11   :  { %v1244_v49 = vld [vmem:[%s1727_s0 + $0x84] ss:$8 sps:$4 sm:$0xff]   ;;  %v1248_v51 = vld [vmem:[%s1727_s0 + $0x80] ss:$8 sps:$4 sm:$0xff]   ;;  %v1250_v53 = vld [vmem:[%s1727_s0 + $0x94] ss:$8 sps:$4 sm:$0xff]  }
  0x12   :  { %537 = vmatpush1.bf16.msra.mxu0 %v1184_v5  ;;  %1167 = vmatpush1.bf16.msra.mxu1 %v1184_v5  ;;  %v1246_v50 = vld [vmem:[%s1727_s0 + $0x184] ss:$8 sps:$4 sm:$0xff]   ;;  %v1249_v52 = vld [vmem:[%s1727_s0 + $0x180] ss:$8 sps:$4 sm:$0xff]   ;;  %v1252_v54 = vld [vmem:[%s1727_s0 + $0x194] ss:$8 sps:$4 sm:$0xff]  }
  0x13   :  { %538 = vmatprep.subr.bf16.mxu0 %v1292_v0  ;;  %1152 = vmatprep.subr.bf16.mxu1 %v1292_v0  ;;  %v1254_v55 = vld [vmem:[%s1727_s0 + $0x90] ss:$8 sps:$4 sm:$0xff]   ;;  %v1256_v57 = vld [vmem:[%s1727_s0 + $0xa4] ss:$8 sps:$4 sm:$0xff]   ;;  %v1260_v59 = vld [vmem:[%s1727_s0 + $0xa0] ss:$8 sps:$4 sm:$0xff]  }
  0x14   :  { %v1255_v56 = vld [vmem:[%s1727_s0 + $0x190] ss:$8 sps:$4 sm:$0xff]   ;;  %v1258_v58 = vld [vmem:[%s1727_s0 + $0x1a4] ss:$8 sps:$4 sm:$0xff]   ;;  %v1261_v60 = vld [vmem:[%s1727_s0 + $0x1a0] ss:$8 sps:$4 sm:$0xff]  }
  0x15   :  { %v1262_v61 = vld [vmem:[%s1727_s0 + $0xb4] ss:$8 sps:$4 sm:$0xff]   ;;  %v1266_v63 = vld [vmem:[%s1727_s0 + $0xb0] ss:$8 sps:$4 sm:$0xff]   ;;  %v1268_v1 = vld [vmem:[%s1727_s0 + $0xc4] ss:$8 sps:$4 sm:$0xff]  }
  0x16   :  { %539 = vmatpush1.bf16.msra.mxu0 %v1185_v7  ;;  %1168 = vmatpush1.bf16.msra.mxu1 %v1185_v7  ;;  %v1264_v62 = vld [vmem:[%s1727_s0 + $0x1b4] ss:$8 sps:$4 sm:$0xff]   ;;  %v1270_v2 = vld [vmem:[%s1727_s0 + $0x1c4] ss:$8 sps:$4 sm:$0xff]   ;;  %v1272_v3 = vld [vmem:[%s1727_s0 + $0xc0] ss:$8 sps:$4 sm:$0xff]  }
  0x17   :  { %540 = vmatprep.subr.bf16.mxu0 %v1292_v0  ;;  %1153 = vmatprep.subr.bf16.mxu1 %v1292_v0  ;;  %v1273_v4 = vld [vmem:[%s1727_s0 + $0x1c0] ss:$8 sps:$4 sm:$0xff]   ;;  %v1274_v5 = vld [vmem:[%s1727_s0 + $0xd4] ss:$8 sps:$4 sm:$0xff]   ;;  %v1278_v7 = vld [vmem:[%s1727_s0 + $0xd0] ss:$8 sps:$4 sm:$0xff]  }
  0x18   :  { %v1276_v6 = vld [vmem:[%s1727_s0 + $0x1d4] ss:$8 sps:$4 sm:$0xff]   ;;  %v1279_v8 = vld [vmem:[%s1727_s0 + $0x1d0] ss:$8 sps:$4 sm:$0xff]  }
  0x1a   :  { %541 = vmatpush1.bf16.msra.mxu0 %v1186_v9  ;;  %1169 = vmatpush1.bf16.msra.mxu1 %v1186_v9  ;;  %v1280_v9 = vld [vmem:[%s1727_s0 + $0xe4] ss:$8 sps:$4 sm:$0xff]  }
  0x1b   :  { %542 = vmatprep.subr.bf16.mxu0 %v1292_v0  ;;  %1154 = vmatprep.subr.bf16.mxu1 %v1292_v0 }
  0x1e   :  { %543 = vmatpush1.bf16.msra.mxu0 %v1187_v10  ;;  %1170 = vmatpush1.bf16.msra.mxu1 %v1187_v10  ;;  %v1282_v10 = vld [vmem:[%s1727_s0 + $0x1e4] ss:$8 sps:$4 sm:$0xff]  }
  0x1f   :  { %544 = vmatprep.subr.bf16.mxu0 %v1292_v0  ;;  %1155 = vmatprep.subr.bf16.mxu1 %v1292_v0 }
  0x22   :  { %545 = vmatpush1.bf16.msra.mxu0 %v1188_v11  ;;  %1171 = vmatpush1.bf16.msra.mxu1 %v1188_v11  ;;  %v1284_v11 = vld [vmem:[%s1727_s0 + $0xe0] ss:$8 sps:$4 sm:$0xff]  }
  0x23   :  { %546 = vmatprep.subr.bf16.mxu0 %v1292_v0  ;;  %1156 = vmatprep.subr.bf16.mxu1 %v1292_v0 }
  0x26   :  { %547 = vmatpush1.bf16.msra.mxu0 %v1189_v12  ;;  %1172 = vmatpush1.bf16.msra.mxu1 %v1189_v12  ;;  %v1285_v12 = vld [vmem:[%s1727_s0 + $0x1e0] ss:$8 sps:$4 sm:$0xff]  }
  0x27   :  { %548 = vmatprep.subr.bf16.mxu0 %v1292_v0  ;;  %1157 = vmatprep.subr.bf16.mxu1 %v1292_v0 }
  0x2a   :  { %549 = vmatpush1.bf16.msra.mxu0 %v1190_v13  ;;  %1173 = vmatpush1.bf16.msra.mxu1 %v1190_v13  ;;  %v1286_v13 = vld [vmem:[%s1727_s0 + $0xf4] ss:$8 sps:$4 sm:$0xff]  }
  0x2b   :  { %550 = vmatprep.subr.bf16.mxu0 %v1292_v0  ;;  %1158 = vmatprep.subr.bf16.mxu1 %v1292_v0 }
  0x2e   :  { %551 = vmatpush1.bf16.msra.mxu0 %v1191_v14  ;;  %1174 = vmatpush1.bf16.msra.mxu1 %v1191_v14  ;;  %v1288_v14 = vld [vmem:[%s1727_s0 + $0x1f4] ss:$8 sps:$4 sm:$0xff]  }
  0x2f   :  { %552 = vmatprep.subr.bf16.mxu0 %v1292_v0  ;;  %1159 = vmatprep.subr.bf16.mxu1 %v1292_v0 }
  0x32   :  { %553 = vmatpush1.bf16.msra.mxu0 %v1192_v15  ;;  %1175 = vmatpush1.bf16.msra.mxu1 %v1192_v15  ;;  %v1290_v15 = vld [vmem:[%s1727_s0 + $0xf0] ss:$8 sps:$4 sm:$0xff]  }
  0x33   :  { %554 = vmatprep.subr.bf16.mxu0 %v1292_v0  ;;  %1160 = vmatprep.subr.bf16.mxu1 %v1292_v0 }
  0x36   :  { %555 = vmatpush1.bf16.msra.mxu0 %v1193_v16  ;;  %1176 = vmatpush1.bf16.msra.mxu1 %v1193_v16  ;;  %v1291_v16 = vld [vmem:[%s1727_s0 + $0x1f0] ss:$8 sps:$4 sm:$0xff]  }
  0x37   :  { %556 = vmatprep.subr.bf16.mxu0 %v1292_v0  ;;  %1161 = vmatprep.subr.bf16.mxu1 %v1292_v0 }
  0x3a   :  { %557 = vmatpush1.bf16.msra.mxu0 %v1194_v17  ;;  %1177 = vmatpush1.bf16.msra.mxu1 %v1194_v17 }
  0x3b   :  { %558 = vmatprep.subr.bf16.mxu0 %v1292_v0  ;;  %1162 = vmatprep.subr.bf16.mxu1 %v1292_v0  ;;  %v1267_v0 = vld [vmem:[%s1727_s0 + $0x1b0] ss:$8 sps:$4 sm:$0xff]  }
  0x3e   :  { %559 = vmatpush1.bf16.msra.mxu0 %v1195_v18  ;;  %1178 = vmatpush1.bf16.msra.mxu1 %v1195_v18 }
  0x41   :  { %561 = vmatmul.mubr.bf16.vlgmr.msra.gmra.mrb[0].mxu0 %v1196_v19  ;;  %689 = vmatmul.mubr.bf16.vlgmr.msra.gmra.mrb[0].mxu1 %v1199_v20 }
  0x42   :  { %568 = vmatprep.mubr.bf16.mxu0 %v1202_v21  ;;  %696 = vmatprep.mubr.bf16.mxu1 %v1204_v22 }
  0x49   :  { %569 = vmatmul.mubr.bf16.gmra.mrb[4].mxu0 %v1206_v23  ;;  %697 = vmatmul.mubr.bf16.gmra.mrb[4].mxu1 %v1207_v24 }
  0x4a   :  { %576 = vmatprep.mubr.bf16.mxu0 %v1208_v25  ;;  %704 = vmatprep.mubr.bf16.mxu1 %v1210_v26 }
  0x51   :  { %577 = vmatmul.mubr.bf16.gmra.mrb[8].mxu0 %v1212_v27  ;;  %705 = vmatmul.mubr.bf16.gmra.mrb[8].mxu1 %v1213_v28 }
  0x52   :  { %584 = vmatprep.mubr.bf16.mxu0 %v1214_v29  ;;  %712 = vmatprep.mubr.bf16.mxu1 %v1216_v30 }
  0x59   :  { %585 = vmatmul.mubr.bf16.gmra.mrb[12].mxu0 %v1218_v31  ;;  %713 = vmatmul.mubr.bf16.gmra.mrb[12].mxu1 %v1219_v32 }
  0x5a   :  { %592 = vmatprep.mubr.bf16.mxu0 %v1220_v33  ;;  %720 = vmatprep.mubr.bf16.mxu1 %v1222_v34 }
  0x61   :  { %593 = vmatmul.mubr.bf16.gmra.mrb[16].mxu0 %v1224_v35  ;;  %721 = vmatmul.mubr.bf16.gmra.mrb[16].mxu1 %v1225_v36 }
  0x62   :  { %600 = vmatprep.mubr.bf16.mxu0 %v1226_v37  ;;  %728 = vmatprep.mubr.bf16.mxu1 %v1228_v38 }
  0x69   :  { %601 = vmatmul.mubr.bf16.gmra.mrb[20].mxu0 %v1230_v39  ;;  %729 = vmatmul.mubr.bf16.gmra.mrb[20].mxu1 %v1231_v40 }
  0x6a   :  { %608 = vmatprep.mubr.bf16.mxu0 %v1232_v41  ;;  %736 = vmatprep.mubr.bf16.mxu1 %v1234_v42 }
  0x71   :  { %609 = vmatmul.mubr.bf16.gmra.mrb[24].mxu0 %v1236_v43  ;;  %737 = vmatmul.mubr.bf16.gmra.mrb[24].mxu1 %v1237_v44 }
  0x72   :  { %616 = vmatprep.mubr.bf16.mxu0 %v1238_v45  ;;  %744 = vmatprep.mubr.bf16.mxu1 %v1240_v46 }
  0x79   :  { %617 = vmatmul.mubr.bf16.gmra.mrb[28].mxu0 %v1242_v47  ;;  %745 = vmatmul.mubr.bf16.gmra.mrb[28].mxu1 %v1243_v48 }
  0x7a   :  { %624 = vmatprep.mubr.bf16.mxu0 %v1244_v49  ;;  %752 = vmatprep.mubr.bf16.mxu1 %v1246_v50 }
  0x81   :  { %625 = vmatmul.mubr.bf16.gmra.mrb[32].mxu0 %v1248_v51  ;;  %753 = vmatmul.mubr.bf16.gmra.mrb[32].mxu1 %v1249_v52 }
  0x82   :  { %632 = vmatprep.mubr.bf16.mxu0 %v1250_v53  ;;  %760 = vmatprep.mubr.bf16.mxu1 %v1252_v54 }
  0x89   :  { %633 = vmatmul.mubr.bf16.gmra.mrb[36].mxu0 %v1254_v55  ;;  %761 = vmatmul.mubr.bf16.gmra.mrb[36].mxu1 %v1255_v56 }
  0x8a   :  { %640 = vmatprep.mubr.bf16.mxu0 %v1256_v57  ;;  %768 = vmatprep.mubr.bf16.mxu1 %v1258_v58 }
  0x91   :  { %641 = vmatmul.mubr.bf16.gmra.mrb[40].mxu0 %v1260_v59  ;;  %769 = vmatmul.mubr.bf16.gmra.mrb[40].mxu1 %v1261_v60 }
  0x92   :  { %648 = vmatprep.mubr.bf16.mxu0 %v1262_v61  ;;  %776 = vmatprep.mubr.bf16.mxu1 %v1264_v62 }
  0x99   :  { %649 = vmatmul.mubr.bf16.gmra.mrb[44].mxu0 %v1266_v63  ;;  %777 = vmatmul.mubr.bf16.gmra.mrb[44].mxu1 %v1267_v0 }
  0x9a   :  { %656 = vmatprep.mubr.bf16.mxu0 %v1268_v1  ;;  %784 = vmatprep.mubr.bf16.mxu1 %v1270_v2 }
  0xa1   :  { %657 = vmatmul.mubr.bf16.gmra.mrb[48].mxu0 %v1272_v3  ;;  %785 = vmatmul.mubr.bf16.gmra.mrb[48].mxu1 %v1273_v4 }
  0xa2   :  { %664 = vmatprep.mubr.bf16.mxu0 %v1274_v5  ;;  %792 = vmatprep.mubr.bf16.mxu1 %v1276_v6 }
  0xa9   :  { %665 = vmatmul.mubr.bf16.gmra.mrb[52].mxu0 %v1278_v7  ;;  %793 = vmatmul.mubr.bf16.gmra.mrb[52].mxu1 %v1279_v8 }
  0xaa   :  { %672 = vmatprep.mubr.bf16.mxu0 %v1280_v9  ;;  %800 = vmatprep.mubr.bf16.mxu1 %v1282_v10 }
  0xb1   :  { %673 = vmatmul.mubr.bf16.gmra.mrb[56].mxu0 %v1284_v11  ;;  %801 = vmatmul.mubr.bf16.gmra.mrb[56].mxu1 %v1285_v12 }
  0xb2   :  { %680 = vmatprep.mubr.bf16.mxu0 %v1286_v13  ;;  %808 = vmatprep.mubr.bf16.mxu1 %v1288_v14 }
  0xb9   :  { %681 = vmatmul.mubr.bf16.gmra.mrb[60].mxu0 %v1290_v15  ;;  %809 = vmatmul.mubr.bf16.gmra.mrb[60].mxu1 %v1291_v16 }
 0x114   :  { %v1585_v17 = vpop.f32.mrb[0].mxu0  ;;  %v1587_v18 = vpop.f32.mrb[0].mxu1 }
 0x115   :  { %v564_v19 = vpop.f32.mrb[1].mxu0  ;;  %v692_v20 = vpop.f32.mrb[1].mxu1 }
 0x116   :  { %v1589_v21 = vpop.f32.mrb[2].mxu0  ;;  %v1591_v22 = vpop.f32.mrb[2].mxu1 }
 0x117   :  { %v567_v23 = vpop.f32.mrb[3].mxu0  ;;  %v695_v24 = vpop.f32.mrb[3].mxu1 }
 0x11c   :  { %v1593_v25 = vpop.f32.mrb[4].mxu0  ;;  %v1595_v26 = vpop.f32.mrb[4].mxu1 }
 0x11d   :  { %v572_v27 = vpop.f32.mrb[5].mxu0  ;;  %v700_v28 = vpop.f32.mrb[5].mxu1 }
 0x11e   :  { %v1597_v29 = vpop.f32.mrb[6].mxu0  ;;  %v1599_v30 = vpop.f32.mrb[6].mxu1 }
 0x11f   :  { %v575_v31 = vpop.f32.mrb[7].mxu0  ;;  %v703_v32 = vpop.f32.mrb[7].mxu1 }
 0x120   :  { %v1654_v31 = vld [vmem:[%s1728_s2] ss:$0 sm:$0xff] }
 0x124   :  { %v1601_v33 = vpop.f32.mrb[8].mxu0  ;;  %v1603_v34 = vpop.f32.mrb[8].mxu1 }
 0x125   :  { %v580_v35 = vpop.f32.mrb[9].mxu0  ;;  %v708_v36 = vpop.f32.mrb[9].mxu1 }
 0x126   :  { %v1605_v37 = vpop.f32.mrb[10].mxu0  ;;  %v1607_v38 = vpop.f32.mrb[10].mxu1 }
 0x127   :  { %v583_v39 = vpop.f32.mrb[11].mxu0  ;;  %v711_v40 = vpop.f32.mrb[11].mxu1 }
 0x12c   :  { %v1609_v41 = vpop.f32.mrb[12].mxu0  ;;  %v1611_v42 = vpop.f32.mrb[12].mxu1 }
 0x12d   :  { %v588_v43 = vpop.f32.mrb[13].mxu0  ;;  %v716_v44 = vpop.f32.mrb[13].mxu1 }
 0x12e   :  { %v1613_v45 = vpop.f32.mrb[14].mxu0  ;;  %v1615_v46 = vpop.f32.mrb[14].mxu1 }
 0x12f   :  { %v591_v47 = vpop.f32.mrb[15].mxu0  ;;  %v719_v48 = vpop.f32.mrb[15].mxu1 }
 0x134   :  { %v1617_v49 = vpop.f32.mrb[16].mxu0  ;;  %v1619_v50 = vpop.f32.mrb[16].mxu1 }
 0x135   :  { %v596_v51 = vpop.f32.mrb[17].mxu0  ;;  %v724_v52 = vpop.f32.mrb[17].mxu1 }
 0x136   :  { %v1621_v53 = vpop.f32.mrb[18].mxu0  ;;  %v1623_v54 = vpop.f32.mrb[18].mxu1 }
 0x137   :  { %v599_v55 = vpop.f32.mrb[19].mxu0  ;;  %v727_v56 = vpop.f32.mrb[19].mxu1 }
 0x13c   :  { %v1625_v57 = vpop.f32.mrb[20].mxu0  ;;  %v1627_v58 = vpop.f32.mrb[20].mxu1 }
 0x13d   :  { %v604_v59 = vpop.f32.mrb[21].mxu0  ;;  %v732_v60 = vpop.f32.mrb[21].mxu1 }
 0x13e   :  { %v1629_v61 = vpop.f32.mrb[22].mxu0  ;;  %v1631_v62 = vpop.f32.mrb[22].mxu1 }
 0x13f   :  { %v607_v63 = vpop.f32.mrb[23].mxu0  ;;  %v735_v0 = vpop.f32.mrb[23].mxu1 }
 0x144   :  { %v1633_v1 = vpop.f32.mrb[24].mxu0  ;;  %v1635_v2 = vpop.f32.mrb[24].mxu1 }
 0x145   :  { %v612_v3 = vpop.f32.mrb[25].mxu0  ;;  %v740_v4 = vpop.f32.mrb[25].mxu1 }
 0x146   :  { %v1637_v5 = vpop.f32.mrb[26].mxu0  ;;  %v1639_v6 = vpop.f32.mrb[26].mxu1 }
 0x147   :  { %v615_v7 = vpop.f32.mrb[27].mxu0  ;;  %v743_v8 = vpop.f32.mrb[27].mxu1 }
 0x14c   :  { %v1641_v9 = vpop.f32.mrb[28].mxu0  ;;  %v1643_v10 = vpop.f32.mrb[28].mxu1 }
 0x14d   :  { %v620_v11 = vpop.f32.mrb[29].mxu0  ;;  %v748_v12 = vpop.f32.mrb[29].mxu1 }
 0x14e   :  { %v1645_v13 = vpop.f32.mrb[30].mxu0  ;;  %v1647_v14 = vpop.f32.mrb[30].mxu1 }
 0x14f   :  { %v623_v15 = vpop.f32.mrb[31].mxu0  ;;  %v751_v16 = vpop.f32.mrb[31].mxu1 }
 0x154   :  { %v626_v19 = vpop.f32.mrb[32].mxu0  ;;  %v754_v20 = vpop.f32.mrb[32].mxu1 }
 0x155   :  { %v817_v23 = vmax.f32 %v1585_v17, %v626_v19  ;;  %v833_v24 = vmax.f32 %v1587_v18, %v754_v20  ;;  %v628_v27 = vpop.f32.mrb[33].mxu0  ;;  %v756_v28 = vpop.f32.mrb[33].mxu1 }
 0x156   :  { %v629_v32 = vpop.f32.mrb[34].mxu0  ;;  %v757_v35 = vpop.f32.mrb[34].mxu1 }
 0x157   :  { %v849_v36 = vmax.f32 %v817_v23, %v833_v24  ;;  %v818_v39 = vmax.f32 %v1589_v21, %v629_v32  ;;  %v834_v40 = vmax.f32 %v1591_v22, %v757_v35  ;;  %v631_v43 = vpop.f32.mrb[35].mxu0  ;;  %v759_v44 = vpop.f32.mrb[35].mxu1 }
 0x159   :  { %v871_v17 = vadd.f32 %v1654_v31, %v849_v36  ;;  %v850_v47 = vmax.f32 %v818_v39, %v834_v40 }
 0x15b   :  { %v872_v18 = vadd.f32 %v1654_v31, %v850_v47  ;;  %v887_v52 = vmax.f32 %v871_v17, 0.0 }
 0x15c   :  { %v634_v48 = vpop.f32.mrb[36].mxu0  ;;  %v762_v51 = vpop.f32.mrb[36].mxu1 }
 0x15d   :  { %v888_v55 = vmax.f32 %v872_v18, 0.0  ;;  %v819_v56 = vmax.f32 %v1593_v25, %v634_v48  ;;  %v835_v59 = vmax.f32 %v1595_v26, %v762_v51  ;;  %v636_v60 = vpop.f32.mrb[37].mxu0  ;;  %v764_v63 = vpop.f32.mrb[37].mxu1 }
 0x15e   :  { %v637_v21 = vpop.f32.mrb[38].mxu0  ;;  %v765_v0 = vpop.f32.mrb[38].mxu1 }
 0x15f   :  { %v1103_v22 = vpack.c.bf16 %v888_v55, %v887_v52  ;;  %v851_v3 = vmax.f32 %v819_v56, %v835_v59  ;;  %v820_v4 = vmax.f32 %v1597_v29, %v637_v21  ;;  %v836_v7 = vmax.f32 %v1599_v30, %v765_v0  ;;  %v639_v8 = vpop.f32.mrb[39].mxu0  ;;  %v767_v11 = vpop.f32.mrb[39].mxu1 }
 0x161   :  { %1104 = vst [vmem:[%s1729_s3] sm:$0xff] %v1103_v22   ;;  %v873_v25 = vadd.f32 %v1654_v31, %v851_v3  ;;  %v852_v12 = vmax.f32 %v820_v4, %v836_v7 }
 0x163   :  { %v874_v26 = vadd.f32 %v1654_v31, %v852_v12  ;;  %v889_v19 = vmax.f32 %v873_v25, 0.0 }
 0x164   :  { %v642_v15 = vpop.f32.mrb[40].mxu0  ;;  %v770_v16 = vpop.f32.mrb[40].mxu1 }
 0x165   :  { %v890_v20 = vmax.f32 %v874_v26, 0.0  ;;  %v821_v23 = vmax.f32 %v1601_v33, %v642_v15  ;;  %v837_v29 = vmax.f32 %v1603_v34, %v770_v16  ;;  %v644_v30 = vpop.f32.mrb[41].mxu0  ;;  %v772_v24 = vpop.f32.mrb[41].mxu1 }
 0x166   :  { %v645_v27 = vpop.f32.mrb[42].mxu0  ;;  %v773_v28 = vpop.f32.mrb[42].mxu1 }
 0x167   :  { %v1108_v32 = vpack.c.bf16 %v890_v20, %v889_v19  ;;  %v853_v35 = vmax.f32 %v821_v23, %v837_v29  ;;  %v822_v36 = vmax.f32 %v1605_v37, %v645_v27  ;;  %v838_v39 = vmax.f32 %v1607_v38, %v773_v28  ;;  %v647_v40 = vpop.f32.mrb[43].mxu0  ;;  %v775_v43 = vpop.f32.mrb[43].mxu1 }
 0x169   :  { %1140 = vst [vmem:[%s1729_s3 + $0x8] sm:$0xff] %v1108_v32   ;;  %v875_v33 = vadd.f32 %v1654_v31, %v853_v35  ;;  %v854_v44 = vmax.f32 %v822_v36, %v838_v39 }
 0x16b   :  { %v876_v34 = vadd.f32 %v1654_v31, %v854_v44  ;;  %v891_v18 = vmax.f32 %v875_v33, 0.0 }
 0x16c   :  { %v650_v17 = vpop.f32.mrb[44].mxu0  ;;  %v778_v47 = vpop.f32.mrb[44].mxu1 }
 0x16d   :  { %v892_v48 = vmax.f32 %v876_v34, 0.0  ;;  %v823_v51 = vmax.f32 %v1609_v41, %v650_v17  ;;  %v839_v37 = vmax.f32 %v1611_v42, %v778_v47  ;;  %v652_v38 = vpop.f32.mrb[45].mxu0  ;;  %v780_v52 = vpop.f32.mrb[45].mxu1 }
 0x16e   :  { %v653_v55 = vpop.f32.mrb[46].mxu0  ;;  %v781_v56 = vpop.f32.mrb[46].mxu1 }
 0x16f   :  { %v1113_v59 = vpack.c.bf16 %v892_v48, %v891_v18  ;;  %v855_v60 = vmax.f32 %v823_v51, %v839_v37  ;;  %v824_v63 = vmax.f32 %v1613_v45, %v653_v55  ;;  %v840_v21 = vmax.f32 %v1615_v46, %v781_v56  ;;  %v655_v0 = vpop.f32.mrb[47].mxu0  ;;  %v783_v22 = vpop.f32.mrb[47].mxu1 }
 0x171   :  { %1141 = vst [vmem:[%s1729_s3 + $0x10] sm:$0xff] %v1113_v59   ;;  %v877_v41 = vadd.f32 %v1654_v31, %v855_v60  ;;  %v856_v3 = vmax.f32 %v824_v63, %v840_v21 }
 0x173   :  { %v878_v42 = vadd.f32 %v1654_v31, %v856_v3  ;;  %v893_v8 = vmax.f32 %v877_v41, 0.0 }
 0x174   :  { %v658_v4 = vpop.f32.mrb[48].mxu0  ;;  %v786_v7 = vpop.f32.mrb[48].mxu1 }
 0x175   :  { %v894_v11 = vmax.f32 %v878_v42, 0.0  ;;  %v825_v25 = vmax.f32 %v1617_v49, %v658_v4  ;;  %v841_v45 = vmax.f32 %v1619_v50, %v786_v7  ;;  %v660_v46 = vpop.f32.mrb[49].mxu0  ;;  %v788_v12 = vpop.f32.mrb[49].mxu1 }
 0x176   :  { %v661_v26 = vpop.f32.mrb[50].mxu0  ;;  %v789_v15 = vpop.f32.mrb[50].mxu1 }
 0x177   :  { %v1118_v16 = vpack.c.bf16 %v894_v11, %v893_v8  ;;  %v857_v19 = vmax.f32 %v825_v25, %v841_v45  ;;  %v826_v20 = vmax.f32 %v1621_v53, %v661_v26  ;;  %v842_v23 = vmax.f32 %v1623_v54, %v789_v15  ;;  %v663_v29 = vpop.f32.mrb[51].mxu0  ;;  %v791_v30 = vpop.f32.mrb[51].mxu1 }
 0x179   :  { %1142 = vst [vmem:[%s1729_s3 + $0x18] sm:$0xff] %v1118_v16   ;;  %v879_v49 = vadd.f32 %v1654_v31, %v857_v19  ;;  %v858_v24 = vmax.f32 %v826_v20, %v842_v23 }
 0x17b   :  { %v880_v50 = vadd.f32 %v1654_v31, %v858_v24  ;;  %v895_v32 = vmax.f32 %v879_v49, 0.0 }
 0x17c   :  { %v666_v27 = vpop.f32.mrb[52].mxu0  ;;  %v794_v28 = vpop.f32.mrb[52].mxu1 }
 0x17d   :  { %v896_v35 = vmax.f32 %v880_v50, 0.0  ;;  %v827_v36 = vmax.f32 %v1625_v57, %v666_v27  ;;  %v843_v53 = vmax.f32 %v1627_v58, %v794_v28  ;;  %v668_v54 = vpop.f32.mrb[53].mxu0  ;;  %v796_v39 = vpop.f32.mrb[53].mxu1 }
 0x17e   :  { %v669_v40 = vpop.f32.mrb[54].mxu0  ;;  %v797_v43 = vpop.f32.mrb[54].mxu1 }
 0x17f   :  { %v1123_v33 = vpack.c.bf16 %v896_v35, %v895_v32  ;;  %v859_v44 = vmax.f32 %v827_v36, %v843_v53  ;;  %v828_v34 = vmax.f32 %v1629_v61, %v669_v40  ;;  %v844_v17 = vmax.f32 %v1631_v62, %v797_v43  ;;  %v671_v47 = vpop.f32.mrb[55].mxu0  ;;  %v799_v18 = vpop.f32.mrb[55].mxu1 }
 0x181   :  { %1143 = vst [vmem:[%s1729_s3 + $0x20] sm:$0xff] %v1123_v33   ;;  %v881_v57 = vadd.f32 %v1654_v31, %v859_v44  ;;  %v860_v48 = vmax.f32 %v828_v34, %v844_v17 }
 0x183   :  { %v882_v58 = vadd.f32 %v1654_v31, %v860_v48  ;;  %v897_v38 = vmax.f32 %v881_v57, 0.0 }
 0x184   :  { %v674_v51 = vpop.f32.mrb[56].mxu0  ;;  %v802_v37 = vpop.f32.mrb[56].mxu1 }
 0x185   :  { %v898_v52 = vmax.f32 %v882_v58, 0.0  ;;  %v829_v55 = vmax.f32 %v1633_v1, %v674_v51  ;;  %v845_v61 = vmax.f32 %v1635_v2, %v802_v37  ;;  %v676_v62 = vpop.f32.mrb[57].mxu0  ;;  %v804_v56 = vpop.f32.mrb[57].mxu1 }
 0x186   :  { %v677_v59 = vpop.f32.mrb[58].mxu0  ;;  %v805_v60 = vpop.f32.mrb[58].mxu1 }
 0x187   :  { %v1128_v63 = vpack.c.bf16 %v898_v52, %v897_v38  ;;  %v861_v21 = vmax.f32 %v829_v55, %v845_v61  ;;  %v830_v0 = vmax.f32 %v1637_v5, %v677_v59  ;;  %v846_v22 = vmax.f32 %v1639_v6, %v805_v60  ;;  %v679_v41 = vpop.f32.mrb[59].mxu0  ;;  %v807_v3 = vpop.f32.mrb[59].mxu1 }
 0x189   :  { %1144 = vst [vmem:[%s1729_s3 + $0x28] sm:$0xff] %v1128_v63   ;;  %v883_v1 = vadd.f32 %v1654_v31, %v861_v21  ;;  %v862_v42 = vmax.f32 %v830_v0, %v846_v22 }
 0x18b   :  { %v884_v2 = vadd.f32 %v1654_v31, %v862_v42  ;;  %v899_v8 = vmax.f32 %v883_v1, 0.0 }
 0x18c   :  { %v682_v4 = vpop.f32.mrb[60].mxu0  ;;  %v810_v7 = vpop.f32.mrb[60].mxu1 }
 0x18d   :  { %v900_v11 = vmax.f32 %v884_v2, 0.0  ;;  %v831_v25 = vmax.f32 %v1641_v9, %v682_v4  ;;  %v847_v5 = vmax.f32 %v1643_v10, %v810_v7  ;;  %v684_v6 = vpop.f32.mrb[61].mxu0  ;;  %v812_v45 = vpop.f32.mrb[61].mxu1 }
 0x18e   :  { %v685_v46 = vpop.f32.mrb[62].mxu0  ;;  %v813_v12 = vpop.f32.mrb[62].mxu1 }
 0x18f   :  { %v1133_v26 = vpack.c.bf16 %v900_v11, %v899_v8  ;;  %v863_v15 = vmax.f32 %v831_v25, %v847_v5  ;;  %v832_v16 = vmax.f32 %v1645_v13, %v685_v46  ;;  %v848_v19 = vmax.f32 %v1647_v14, %v813_v12  ;;  %v687_v20 = vpop.f32.mrb[63].mxu0  ;;  %v815_v23 = vpop.f32.mrb[63].mxu1 }
 0x191   :  { %1145 = vst [vmem:[%s1729_s3 + $0x30] sm:$0xff] %v1133_v26   ;;  %v885_v9 = vadd.f32 %v1654_v31, %v863_v15  ;;  %v864_v29 = vmax.f32 %v832_v16, %v848_v19 }
 0x193   :  { %v886_v10 = vadd.f32 %v1654_v31, %v864_v29  ;;  %v901_v30 = vmax.f32 %v885_v9, 0.0 }
 0x195   :  { %v902_v49 = vmax.f32 %v886_v10, 0.0 }
 0x197   :  { %v1138_v24 = vpack.c.bf16 %v902_v49, %v901_v30 }
 0x199   :  { %1146 = vst [vmem:[%s1729_s3 + $0x38] sm:$0xff] %v1138_v24  }

// kernel: conv_classifier_forward.6
= control target key start
LH: loop header
LB: loop body
LE: loop exit
PB: predicated region body
PF: predicated region fallthrough
CT: control target
= control target key end

     0   :  { %s1257_s1 = inlined_call_operand.vmem [shape: bf16[512,128], index: 1, kind: input, shape index: {}]   ;;  %s1258_s0 = inlined_call_operand.vmem [shape: bf16[4,32,512], index: 0, kind: input, shape index: {}]   ;;  %s1259_s2 = inlined_call_operand.vmem [shape: f32[1,128], index: 2, kind: input, shape index: {}]   ;;  %s1260_s3 = inlined_call_operand.vmem [shape: bf16[32,128], index: 3, kind: output, shape index: {}]  }
   0x1   :  { %v920_v0 = vld [vmem:[%s1257_s1 + $0x40] sm:$0xff]   ;;  %v924_v4 = vld [vmem:[%s1257_s1 + $0x48] sm:$0xff]   ;;  %v928_v8 = vld [vmem:[%s1257_s1 + $0x50] sm:$0xff]  }
   0x2   :  { %v921_v1 = vld [vmem:[%s1257_s1 + $0xc0] sm:$0xff]   ;;  %792 = vmatprep.subr.bf16.mxu0 %v920_v0  ;;  %v925_v5 = vld [vmem:[%s1257_s1 + $0xc8] sm:$0xff]   ;;  %v929_v9 = vld [vmem:[%s1257_s1 + $0xd0] sm:$0xff]  }
   0x3   :  { %v922_v2 = vld [vmem:[%s1257_s1] sm:$0xff]   ;;  %856 = vmatprep.subr.bf16.mxu1 %v921_v1  ;;  %v926_v6 = vld [vmem:[%s1257_s1 + $0x8] sm:$0xff]   ;;  %v930_v10 = vld [vmem:[%s1257_s1 + $0x10] sm:$0xff]  }
   0x4   :  { %v923_v3 = vld [vmem:[%s1257_s1 + $0x80] sm:$0xff]   ;;  %793 = vmatpush3.bf16.msra.mxu0 %v922_v2  ;;  %v927_v7 = vld [vmem:[%s1257_s1 + $0x88] sm:$0xff]   ;;  %v931_v11 = vld [vmem:[%s1257_s1 + $0x90] sm:$0xff]  }
   0x5   :  { %857 = vmatpush3.bf16.msra.mxu1 %v923_v3  ;;  %794 = vmatprep.subr.bf16.mxu0 %v924_v4  ;;  %v932_v12 = vld [vmem:[%s1257_s1 + $0x58] sm:$0xff]   ;;  %v936_v16 = vld [vmem:[%s1257_s1 + $0x60] sm:$0xff]   ;;  %v940_v20 = vld [vmem:[%s1257_s1 + $0x68] sm:$0xff]  }
   0x6   :  { %858 = vmatprep.subr.bf16.mxu1 %v925_v5  ;;  %v933_v13 = vld [vmem:[%s1257_s1 + $0xd8] sm:$0xff]   ;;  %v937_v17 = vld [vmem:[%s1257_s1 + $0xe0] sm:$0xff]   ;;  %v941_v21 = vld [vmem:[%s1257_s1 + $0xe8] sm:$0xff]  }
   0x7   :  { %v934_v14 = vld [vmem:[%s1257_s1 + $0x18] sm:$0xff]   ;;  %v938_v18 = vld [vmem:[%s1257_s1 + $0x20] sm:$0xff]   ;;  %v942_v22 = vld [vmem:[%s1257_s1 + $0x28] sm:$0xff]  }
   0x8   :  { %795 = vmatpush3.bf16.msra.mxu0 %v926_v6  ;;  %v935_v15 = vld [vmem:[%s1257_s1 + $0x98] sm:$0xff]   ;;  %v939_v19 = vld [vmem:[%s1257_s1 + $0xa0] sm:$0xff]   ;;  %v943_v23 = vld [vmem:[%s1257_s1 + $0xa8] sm:$0xff]  }
   0x9   :  { %859 = vmatpush3.bf16.msra.mxu1 %v927_v7  ;;  %796 = vmatprep.subr.bf16.mxu0 %v928_v8  ;;  %v944_v24 = vld [vmem:[%s1257_s1 + $0x70] sm:$0xff]   ;;  %v948_v28 = vld [vmem:[%s1257_s1 + $0x78] sm:$0xff]  }
   0xa   :  { %860 = vmatprep.subr.bf16.mxu1 %v929_v9  ;;  %v945_v25 = vld [vmem:[%s1257_s1 + $0xf0] sm:$0xff]   ;;  %v949_v29 = vld [vmem:[%s1257_s1 + $0xf8] sm:$0xff]  }
   0xb   :  { %v946_v26 = vld [vmem:[%s1257_s1 + $0x30] sm:$0xff]   ;;  %v950_v30 = vld [vmem:[%s1257_s1 + $0x38] sm:$0xff]  }
   0xc   :  { %797 = vmatpush3.bf16.msra.mxu0 %v930_v10  ;;  %v947_v27 = vld [vmem:[%s1257_s1 + $0xb0] sm:$0xff]   ;;  %v951_v31 = vld [vmem:[%s1257_s1 + $0xb8] sm:$0xff]  }
   0xd   :  { %861 = vmatpush3.bf16.msra.mxu1 %v931_v11  ;;  %798 = vmatprep.subr.bf16.mxu0 %v932_v12  ;;  %v952_v32 = vld [vmem:[%s1258_s0] ss:$16 sps:$4 sm:$0xff]   ;;  %v954_v33 = vld [vmem:[%s1258_s0 + $0x4] ss:$16 sps:$4 sm:$0xff]   ;;  %v955_v34 = vld [vmem:[%s1258_s0 + $0x8] ss:$16 sps:$4 sm:$0xff]  }
   0xe   :  { %862 = vmatprep.subr.bf16.mxu1 %v933_v13  ;;  %v957_v35 = vld [vmem:[%s1258_s0 + $0xc] ss:$16 sps:$4 sm:$0xff]   ;;  %496 = vmatprep.mubr.bf16.mxu0 %v954_v33  ;;  %v958_v36 = vld [vmem:[%s1258_s0 + $0x24] ss:$16 sps:$4 sm:$0xff]   ;;  %v962_v38 = vld [vmem:[%s1258_s0 + $0x20] ss:$16 sps:$4 sm:$0xff]  }
   0xf   :  { %593 = vmatprep.mubr.bf16.mxu1 %v957_v35  ;;  %v960_v37 = vld [vmem:[%s1258_s0 + $0x2c] ss:$16 sps:$4 sm:$0xff]   ;;  %v963_v39 = vld [vmem:[%s1258_s0 + $0x28] ss:$16 sps:$4 sm:$0xff]   ;;  %v964_v40 = vld [vmem:[%s1258_s0 + $0x44] ss:$16 sps:$4 sm:$0xff]  }
  0x10   :  { %799 = vmatpush3.bf16.msra.mxu0 %v934_v14  ;;  %v966_v41 = vld [vmem:[%s1258_s0 + $0x4c] ss:$16 sps:$4 sm:$0xff]   ;;  %v968_v42 = vld [vmem:[%s1258_s0 + $0x40] ss:$16 sps:$4 sm:$0xff]   ;;  %v969_v43 = vld [vmem:[%s1258_s0 + $0x48] ss:$16 sps:$4 sm:$0xff]  }
  0x11   :  { %863 = vmatpush3.bf16.msra.mxu1 %v935_v15  ;;  %800 = vmatprep.subr.bf16.mxu0 %v936_v16  ;;  %v970_v44 = vld [vmem:[%s1258_s0 + $0x64] ss:$16 sps:$4 sm:$0xff]   ;;  %v972_v45 = vld [vmem:[%s1258_s0 + $0x6c] ss:$16 sps:$4 sm:$0xff]   ;;  %v974_v46 = vld [vmem:[%s1258_s0 + $0x60] ss:$16 sps:$4 sm:$0xff]  }
  0x12   :  { %864 = vmatprep.subr.bf16.mxu1 %v937_v17  ;;  %v975_v47 = vld [vmem:[%s1258_s0 + $0x68] ss:$16 sps:$4 sm:$0xff]   ;;  %v976_v48 = vld [vmem:[%s1258_s0 + $0x84] ss:$16 sps:$4 sm:$0xff]   ;;  %v978_v49 = vld [vmem:[%s1258_s0 + $0x8c] ss:$16 sps:$4 sm:$0xff]  }
  0x13   :  { %v980_v50 = vld [vmem:[%s1258_s0 + $0x80] ss:$16 sps:$4 sm:$0xff]   ;;  %v981_v51 = vld [vmem:[%s1258_s0 + $0x88] ss:$16 sps:$4 sm:$0xff]   ;;  %v982_v52 = vld [vmem:[%s1258_s0 + $0xa4] ss:$16 sps:$4 sm:$0xff]  }
  0x14   :  { %801 = vmatpush3.bf16.msra.mxu0 %v938_v18  ;;  %v984_v53 = vld [vmem:[%s1258_s0 + $0xac] ss:$16 sps:$4 sm:$0xff]   ;;  %v986_v54 = vld [vmem:[%s1258_s0 + $0xa0] ss:$16 sps:$4 sm:$0xff]   ;;  %v987_v55 = vld [vmem:[%s1258_s0 + $0xa8] ss:$16 sps:$4 sm:$0xff]  }
  0x15   :  { %865 = vmatpush3.bf16.msra.mxu1 %v939_v19  ;;  %802 = vmatprep.subr.bf16.mxu0 %v940_v20  ;;  %v988_v56 = vld [vmem:[%s1258_s0 + $0xc4] ss:$16 sps:$4 sm:$0xff]   ;;  %v990_v57 = vld [vmem:[%s1258_s0 + $0xcc] ss:$16 sps:$4 sm:$0xff]   ;;  %v992_v58 = vld [vmem:[%s1258_s0 + $0xc0] ss:$16 sps:$4 sm:$0xff]  }
  0x16   :  { %866 = vmatprep.subr.bf16.mxu1 %v941_v21  ;;  %v993_v59 = vld [vmem:[%s1258_s0 + $0xc8] ss:$16 sps:$4 sm:$0xff]   ;;  %v994_v60 = vld [vmem:[%s1258_s0 + $0xe4] ss:$16 sps:$4 sm:$0xff]   ;;  %v996_v61 = vld [vmem:[%s1258_s0 + $0xec] ss:$16 sps:$4 sm:$0xff]  }
  0x17   :  { %v998_v62 = vld [vmem:[%s1258_s0 + $0xe0] ss:$16 sps:$4 sm:$0xff]   ;;  %v999_v63 = vld [vmem:[%s1258_s0 + $0xe8] ss:$16 sps:$4 sm:$0xff]  }
  0x18   :  { %803 = vmatpush3.bf16.msra.mxu0 %v942_v22 }
  0x19   :  { %867 = vmatpush3.bf16.msra.mxu1 %v943_v23  ;;  %804 = vmatprep.subr.bf16.mxu0 %v944_v24 }
  0x1a   :  { %868 = vmatprep.subr.bf16.mxu1 %v945_v25 }
  0x1c   :  { %805 = vmatpush3.bf16.msra.mxu0 %v946_v26 }
  0x1d   :  { %869 = vmatpush3.bf16.msra.mxu1 %v947_v27  ;;  %806 = vmatprep.subr.bf16.mxu0 %v948_v28 }
  0x1e   :  { %870 = vmatprep.subr.bf16.mxu1 %v949_v29 }
  0x20   :  { %807 = vmatpush3.bf16.msra.mxu0 %v950_v30 }
  0x21   :  { %871 = vmatpush3.bf16.msra.mxu1 %v951_v31 }
  0x23   :  { %497 = vmatmul.mubr.bf16.vlgmr.msra.gmra.mrb[0].mxu0 %v952_v32 }
  0x24   :  { %594 = vmatmul.mubr.bf16.vlgmr.msra.gmra.mrb[0].mxu1 %v955_v34  ;;  %504 = vmatprep.mubr.bf16.mxu0 %v958_v36 }
  0x25   :  { %601 = vmatprep.mubr.bf16.mxu1 %v960_v37 }
  0x2b   :  { %505 = vmatmul.mubr.bf16.gmra.mrb[4].mxu0 %v962_v38 }
  0x2c   :  { %602 = vmatmul.mubr.bf16.gmra.mrb[4].mxu1 %v963_v39  ;;  %512 = vmatprep.mubr.bf16.mxu0 %v964_v40 }
  0x2d   :  { %609 = vmatprep.mubr.bf16.mxu1 %v966_v41 }
  0x33   :  { %513 = vmatmul.mubr.bf16.gmra.mrb[8].mxu0 %v968_v42 }
  0x34   :  { %610 = vmatmul.mubr.bf16.gmra.mrb[8].mxu1 %v969_v43  ;;  %520 = vmatprep.mubr.bf16.mxu0 %v970_v44 }
  0x35   :  { %617 = vmatprep.mubr.bf16.mxu1 %v972_v45 }
  0x3b   :  { %521 = vmatmul.mubr.bf16.gmra.mrb[12].mxu0 %v974_v46 }
  0x3c   :  { %618 = vmatmul.mubr.bf16.gmra.mrb[12].mxu1 %v975_v47  ;;  %528 = vmatprep.mubr.bf16.mxu0 %v976_v48 }
  0x3d   :  { %625 = vmatprep.mubr.bf16.mxu1 %v978_v49 }
  0x43   :  { %529 = vmatmul.mubr.bf16.gmra.mrb[16].mxu0 %v980_v50 }
  0x44   :  { %626 = vmatmul.mubr.bf16.gmra.mrb[16].mxu1 %v981_v51  ;;  %536 = vmatprep.mubr.bf16.mxu0 %v982_v52 }
  0x45   :  { %633 = vmatprep.mubr.bf16.mxu1 %v984_v53 }
  0x4b   :  { %537 = vmatmul.mubr.bf16.gmra.mrb[20].mxu0 %v986_v54 }
  0x4c   :  { %634 = vmatmul.mubr.bf16.gmra.mrb[20].mxu1 %v987_v55  ;;  %544 = vmatprep.mubr.bf16.mxu0 %v988_v56 }
  0x4d   :  { %641 = vmatprep.mubr.bf16.mxu1 %v990_v57 }
  0x53   :  { %545 = vmatmul.mubr.bf16.gmra.mrb[24].mxu0 %v992_v58 }
  0x54   :  { %642 = vmatmul.mubr.bf16.gmra.mrb[24].mxu1 %v993_v59  ;;  %552 = vmatprep.mubr.bf16.mxu0 %v994_v60 }
  0x55   :  { %649 = vmatprep.mubr.bf16.mxu1 %v996_v61 }
  0x5b   :  { %553 = vmatmul.mubr.bf16.gmra.mrb[28].mxu0 %v998_v62 }
  0x5c   :  { %650 = vmatmul.mubr.bf16.gmra.mrb[28].mxu1 %v999_v63 }
  0xf6   :  { %v808_v0 = vpop.f32.mrb[0].mxu0 }
  0xf7   :  { %v872_v1 = vpop.f32.mrb[0].mxu1  ;;  %v809_v2 = vpop.f32.mrb[1].mxu0 }
  0xf8   :  { %v810_v3 = vadd.f32 %v809_v2, %v808_v0  ;;  %v873_v4 = vpop.f32.mrb[1].mxu1  ;;  %v811_v5 = vpop.f32.mrb[2].mxu0 }
  0xf9   :  { %v874_v6 = vadd.f32 %v873_v4, %v872_v1  ;;  %v875_v7 = vpop.f32.mrb[2].mxu1  ;;  %v812_v8 = vpop.f32.mrb[3].mxu0 }
  0xfa   :  { %v813_v9 = vadd.f32 %v812_v8, %v811_v5  ;;  %v876_v10 = vpop.f32.mrb[3].mxu1 }
  0xfb   :  { %v1212_v11 = vadd.f32 %v874_v6, %v810_v3  ;;  %v877_v12 = vadd.f32 %v876_v10, %v875_v7 }
  0xfd   :  { %v1214_v13 = vadd.f32 %v877_v12, %v813_v9 }
  0xfe   :  { %v814_v14 = vpop.f32.mrb[4].mxu0 }
  0xff   :  { %v878_v15 = vpop.f32.mrb[4].mxu1  ;;  %v815_v16 = vpop.f32.mrb[5].mxu0 }
 0x100   :  { %v816_v17 = vadd.f32 %v815_v16, %v814_v14  ;;  %v879_v18 = vpop.f32.mrb[5].mxu1  ;;  %v817_v19 = vpop.f32.mrb[6].mxu0 }
 0x101   :  { %v880_v20 = vadd.f32 %v879_v18, %v878_v15  ;;  %v881_v21 = vpop.f32.mrb[6].mxu1  ;;  %v818_v22 = vpop.f32.mrb[7].mxu0 }
 0x102   :  { %v819_v23 = vadd.f32 %v818_v22, %v817_v19  ;;  %v882_v24 = vpop.f32.mrb[7].mxu1 }
 0x103   :  { %v1216_v25 = vadd.f32 %v880_v20, %v816_v17  ;;  %v883_v26 = vadd.f32 %v882_v24, %v881_v21 }
 0x105   :  { %v1218_v27 = vadd.f32 %v883_v26, %v819_v23 }
 0x106   :  { %v820_v28 = vpop.f32.mrb[8].mxu0 }
 0x107   :  { %v884_v29 = vpop.f32.mrb[8].mxu1  ;;  %v821_v30 = vpop.f32.mrb[9].mxu0 }
 0x108   :  { %v822_v31 = vadd.f32 %v821_v30, %v820_v28  ;;  %v885_v32 = vpop.f32.mrb[9].mxu1  ;;  %v823_v33 = vpop.f32.mrb[10].mxu0 }
 0x109   :  { %v886_v34 = vadd.f32 %v885_v32, %v884_v29  ;;  %v887_v35 = vpop.f32.mrb[10].mxu1  ;;  %v824_v36 = vpop.f32.mrb[11].mxu0 }
 0x10a   :  { %v825_v37 = vadd.f32 %v824_v36, %v823_v33  ;;  %v888_v38 = vpop.f32.mrb[11].mxu1 }
 0x10b   :  { %v1220_v39 = vadd.f32 %v886_v34, %v822_v31  ;;  %v889_v40 = vadd.f32 %v888_v38, %v887_v35 }
 0x10d   :  { %v658_v41 = vmax.f32 %v1212_v11, %v1220_v39  ;;  %v1224_v42 = vadd.f32 %v889_v40, %v825_v37 }
 0x10e   :  { %v826_v43 = vpop.f32.mrb[12].mxu0 }
 0x10f   :  { %v659_v44 = vmax.f32 %v1214_v13, %v1224_v42  ;;  %v890_v45 = vpop.f32.mrb[12].mxu1  ;;  %v827_v46 = vpop.f32.mrb[13].mxu0 }
 0x110   :  { %v828_v47 = vadd.f32 %v827_v46, %v826_v43  ;;  %v891_v48 = vpop.f32.mrb[13].mxu1  ;;  %v829_v49 = vpop.f32.mrb[14].mxu0 }
 0x111   :  { %v892_v50 = vadd.f32 %v891_v48, %v890_v45  ;;  %v893_v51 = vpop.f32.mrb[14].mxu1  ;;  %v830_v52 = vpop.f32.mrb[15].mxu0 }
 0x112   :  { %v831_v53 = vadd.f32 %v830_v52, %v829_v49  ;;  %v894_v54 = vpop.f32.mrb[15].mxu1 }
 0x113   :  { %v1228_v55 = vadd.f32 %v892_v50, %v828_v47  ;;  %v895_v56 = vadd.f32 %v894_v54, %v893_v51  ;;  %v772_v47 = vld [vmem:[%s1259_s2] ss:$0 sm:$0xff] }
 0x115   :  { %v660_v57 = vmax.f32 %v1216_v25, %v1228_v55  ;;  %v1232_v58 = vadd.f32 %v895_v56, %v831_v53 }
 0x116   :  { %v832_v59 = vpop.f32.mrb[16].mxu0 }
 0x117   :  { %v661_v60 = vmax.f32 %v1218_v27, %v1232_v58  ;;  %v896_v61 = vpop.f32.mrb[16].mxu1  ;;  %v833_v62 = vpop.f32.mrb[17].mxu0 }
 0x118   :  { %v834_v63 = vadd.f32 %v833_v62, %v832_v59  ;;  %v897_v0 = vpop.f32.mrb[17].mxu1  ;;  %v835_v1 = vpop.f32.mrb[18].mxu0 }
 0x119   :  { %v898_v2 = vadd.f32 %v897_v0, %v896_v61  ;;  %v899_v3 = vpop.f32.mrb[18].mxu1  ;;  %v836_v4 = vpop.f32.mrb[19].mxu0 }
 0x11a   :  { %v837_v5 = vadd.f32 %v836_v4, %v835_v1  ;;  %v900_v6 = vpop.f32.mrb[19].mxu1 }
 0x11b   :  { %v628_v7 = vadd.f32 %v898_v2, %v834_v63  ;;  %v901_v8 = vadd.f32 %v900_v6, %v899_v3 }
 0x11d   :  { %v631_v9 = vadd.f32 %v901_v8, %v837_v5 }
 0x11e   :  { %v838_v10 = vpop.f32.mrb[20].mxu0 }
 0x11f   :  { %v902_v12 = vpop.f32.mrb[20].mxu1  ;;  %v839_v14 = vpop.f32.mrb[21].mxu0 }
 0x120   :  { %v840_v15 = vadd.f32 %v839_v14, %v838_v10  ;;  %v903_v16 = vpop.f32.mrb[21].mxu1  ;;  %v841_v17 = vpop.f32.mrb[22].mxu0 }
 0x121   :  { %v904_v18 = vadd.f32 %v903_v16, %v902_v12  ;;  %v905_v19 = vpop.f32.mrb[22].mxu1  ;;  %v842_v20 = vpop.f32.mrb[23].mxu0 }
 0x122   :  { %v843_v21 = vadd.f32 %v842_v20, %v841_v17  ;;  %v906_v22 = vpop.f32.mrb[23].mxu1 }
 0x123   :  { %v636_v23 = vadd.f32 %v904_v18, %v840_v15  ;;  %v907_v24 = vadd.f32 %v906_v22, %v905_v19 }
 0x125   :  { %v639_v26 = vadd.f32 %v907_v24, %v843_v21 }
 0x126   :  { %v844_v28 = vpop.f32.mrb[24].mxu0 }
 0x127   :  { %v908_v29 = vpop.f32.mrb[24].mxu1  ;;  %v845_v30 = vpop.f32.mrb[25].mxu0 }
 0x128   :  { %v846_v31 = vadd.f32 %v845_v30, %v844_v28  ;;  %v909_v32 = vpop.f32.mrb[25].mxu1  ;;  %v847_v33 = vpop.f32.mrb[26].mxu0 }
 0x129   :  { %v910_v34 = vadd.f32 %v909_v32, %v908_v29  ;;  %v911_v35 = vpop.f32.mrb[26].mxu1  ;;  %v848_v36 = vpop.f32.mrb[27].mxu0 }
 0x12a   :  { %v849_v37 = vadd.f32 %v848_v36, %v847_v33  ;;  %v912_v38 = vpop.f32.mrb[27].mxu1 }
 0x12b   :  { %v644_v40 = vadd.f32 %v910_v34, %v846_v31  ;;  %v913_v43 = vadd.f32 %v912_v38, %v911_v35 }
 0x12d   :  { %v662_v45 = vmax.f32 %v628_v7, %v644_v40  ;;  %v647_v46 = vadd.f32 %v913_v43, %v849_v37 }
 0x12e   :  { %v850_v48 = vpop.f32.mrb[28].mxu0 }
 0x12f   :  { %v666_v49 = vmax.f32 %v658_v41, %v662_v45  ;;  %v663_v50 = vmax.f32 %v631_v9, %v647_v46  ;;  %v914_v51 = vpop.f32.mrb[28].mxu1  ;;  %v851_v52 = vpop.f32.mrb[29].mxu0 }
 0x130   :  { %v852_v53 = vadd.f32 %v851_v52, %v850_v48  ;;  %v915_v54 = vpop.f32.mrb[29].mxu1  ;;  %v853_v56 = vpop.f32.mrb[30].mxu0 }
 0x131   :  { %v676_v59 = vadd.f32 %v772_v47, %v666_v49  ;;  %v667_v61 = vmax.f32 %v659_v44, %v663_v50  ;;  %v916_v62 = vadd.f32 %v915_v54, %v914_v51  ;;  %v917_v63 = vpop.f32.mrb[30].mxu1  ;;  %v854_v0 = vpop.f32.mrb[31].mxu0 }
 0x132   :  { %v855_v1 = vadd.f32 %v854_v0, %v853_v56  ;;  %v918_v2 = vpop.f32.mrb[31].mxu1 }
 0x133   :  { %v677_v3 = vadd.f32 %v772_v47, %v667_v61  ;;  %v652_v4 = vadd.f32 %v916_v62, %v852_v53  ;;  %v919_v11 = vadd.f32 %v918_v2, %v917_v63  ;;  %v680_v39 = vmax.f32 %v676_v59, 0.0 }
 0x135   :  { %v681_v41 = vmax.f32 %v677_v3, 0.0  ;;  %v664_v5 = vmax.f32 %v636_v23, %v652_v4  ;;  %v655_v6 = vadd.f32 %v919_v11, %v855_v1 }
 0x137   :  { %v784_v7 = vpack.c.bf16 %v681_v41, %v680_v39  ;;  %v668_v8 = vmax.f32 %v660_v57, %v664_v5  ;;  %v665_v9 = vmax.f32 %v639_v26, %v655_v6 }
 0x139   :  { %785 = vst [vmem:[%s1260_s3] sm:$0xff] %v784_v7   ;;  %v678_v13 = vadd.f32 %v772_v47, %v668_v8  ;;  %v669_v42 = vmax.f32 %v661_v60, %v665_v9 }
 0x13b   :  { %v679_v44 = vadd.f32 %v772_v47, %v669_v42  ;;  %v682_v10 = vmax.f32 %v678_v13, 0.0 }
 0x13d   :  { %v683_v12 = vmax.f32 %v679_v44, 0.0 }
 0x13f   :  { %v789_v14 = vpack.c.bf16 %v683_v12, %v682_v10 }
 0x141   :  { %791 = vst [vmem:[%s1260_s3 + $0x8] sm:$0xff] %v789_v14  }

// kernel: conv_classifier_forward.7
= control target key start
LH: loop header
LB: loop body
LE: loop exit
PB: predicated region body
PF: predicated region fallthrough
CT: control target
= control target key end

     0   :  { %v2958_v39 = vmov 0.0   ;;  %vm2959_vm0 = vmmov 0   ;;  %s3884_s0 = inlined_call_operand.vmem [shape: bf16[4,8,896], index: 0, kind: input, shape index: {}]   ;;  %s3885_s1 = inlined_call_operand.vmem [shape: bf16[896,128], index: 1, kind: input, shape index: {}]   ;;  %s3886_s2 = inlined_call_operand.vmem [shape: f32[1,128], index: 2, kind: input, shape index: {}]   ;;  %s3887_s3 = inlined_call_operand.vmem [shape: bf16[4,128,128], index: 3, kind: input, shape index: {}]   ;;  %s3888_s4 = inlined_call_operand.vmem [shape: f32[1,128], index: 4, kind: input, shape index: {}]   ;;  %s3889_s5 = inlined_call_operand.vmem [shape: bf16[128,256], index: 5, kind: input, shape index: {}]   ;;  %s3890_s6 = inlined_call_operand.vmem [shape: f32[1,256], index: 6, kind: input, shape index: {}]   ;;  %s3891_s7 = inlined_call_operand.vmem [shape: bf16[256,128], index: 7, kind: input, shape index: {}]   ;;  %s3892_s8 = inlined_call_operand.vmem [shape: f32[1,128], index: 8, kind: input, shape index: {}]   ;;  %s3893_s9 = inlined_call_operand.hbm [shape: f32[2,128], index: 9, kind: output, shape index: {}]  }
   0x1   :  { %v3015_v0 = vld [vmem:[%s3885_s1 + $0x40] sm:$0xff]   ;;  %v3038_v4 = vld [vmem:[%s3885_s1 + $0x48] sm:$0xff]   ;;  %v3062_v8 = vld [vmem:[%s3885_s1 + $0x50] sm:$0xff]  }
   0x2   :  { %v3020_v1 = vld [vmem:[%s3885_s1 + $0xc0] sm:$0xff]   ;;  %2243 = vmatprep.subr.bf16.mxu0 %v3015_v0  ;;  %v3044_v5 = vld [vmem:[%s3885_s1 + $0xc8] sm:$0xff]   ;;  %v3068_v9 = vld [vmem:[%s3885_s1 + $0xd0] sm:$0xff]  }
   0x3   :  { %v3026_v2 = vld [vmem:[%s3885_s1] sm:$0xff]   ;;  %2265 = vmatprep.subr.bf16.mxu1 %v3020_v1  ;;  %v3050_v6 = vld [vmem:[%s3885_s1 + $0x8] sm:$0xff]   ;;  %v3074_v10 = vld [vmem:[%s3885_s1 + $0x10] sm:$0xff]  }
   0x4   :  { %v3032_v3 = vld [vmem:[%s3885_s1 + $0x80] sm:$0xff]   ;;  %2244 = vmatpush3.bf16.msra.mxu0 %v3026_v2  ;;  %v3056_v7 = vld [vmem:[%s3885_s1 + $0x88] sm:$0xff]   ;;  %v3080_v11 = vld [vmem:[%s3885_s1 + $0x90] sm:$0xff]  }
   0x5   :  { %2266 = vmatpush3.bf16.msra.mxu1 %v3032_v3  ;;  %2245 = vmatprep.subr.bf16.mxu0 %v3038_v4  ;;  %v3086_v12 = vld [vmem:[%s3885_s1 + $0x58] sm:$0xff]   ;;  %v3110_v16 = vld [vmem:[%s3885_s1 + $0x60] sm:$0xff]   ;;  %v3134_v20 = vld [vmem:[%s3885_s1 + $0x68] sm:$0xff]  }
   0x6   :  { %2267 = vmatprep.subr.bf16.mxu1 %v3044_v5  ;;  %v3092_v13 = vld [vmem:[%s3885_s1 + $0xd8] sm:$0xff]   ;;  %v3116_v17 = vld [vmem:[%s3885_s1 + $0xe0] sm:$0xff]   ;;  %v3140_v21 = vld [vmem:[%s3885_s1 + $0xe8] sm:$0xff]  }
   0x7   :  { %v3098_v14 = vld [vmem:[%s3885_s1 + $0x18] sm:$0xff]   ;;  %v3122_v18 = vld [vmem:[%s3885_s1 + $0x20] sm:$0xff]   ;;  %v3146_v22 = vld [vmem:[%s3885_s1 + $0x28] sm:$0xff]  }
   0x8   :  { %2246 = vmatpush3.bf16.msra.mxu0 %v3050_v6  ;;  %v3104_v15 = vld [vmem:[%s3885_s1 + $0x98] sm:$0xff]   ;;  %v3128_v19 = vld [vmem:[%s3885_s1 + $0xa0] sm:$0xff]   ;;  %v3152_v23 = vld [vmem:[%s3885_s1 + $0xa8] sm:$0xff]  }
   0x9   :  { %2268 = vmatpush3.bf16.msra.mxu1 %v3056_v7  ;;  %2247 = vmatprep.subr.bf16.mxu0 %v3062_v8  ;;  %v3158_v24 = vld [vmem:[%s3885_s1 + $0x70] sm:$0xff]   ;;  %v3182_v28 = vld [vmem:[%s3885_s1 + $0x78] sm:$0xff]   ;;  %v34_v32 = vld [vmem:[%s3884_s0] sm:$0xff] }
   0xa   :  { %2269 = vmatprep.subr.bf16.mxu1 %v3068_v9  ;;  %v3164_v25 = vld [vmem:[%s3885_s1 + $0xf0] sm:$0xff]   ;;  %v3188_v29 = vld [vmem:[%s3885_s1 + $0xf8] sm:$0xff]   ;;  %v35_v33 = vld [vmem:[%s3884_s0 + $0x8] sm:$0xff]  ;;  %v2044_v34 = vcombine.low %v34_v32, %v34_v32  ;;  %v2045_v35 = vcombine.high %v34_v32, %v34_v32 }
   0xb   :  { %v3170_v26 = vld [vmem:[%s3885_s1 + $0x30] sm:$0xff]   ;;  %v3194_v30 = vld [vmem:[%s3885_s1 + $0x38] sm:$0xff]   ;;  %v2046_v36 = vcombine.low %v35_v33, %v35_v33  ;;  %v2047_v37 = vcombine.high %v35_v33, %v35_v33  ;;  %v3213_v38 = vld [vmem:[%s3885_s1 + $0x140] sm:$0xff]  }
   0xc   :  { %2248 = vmatpush3.bf16.msra.mxu0 %v3074_v10  ;;  %v3176_v27 = vld [vmem:[%s3885_s1 + $0xb0] sm:$0xff]   ;;  %v3200_v31 = vld [vmem:[%s3885_s1 + $0xb8] sm:$0xff]   ;;  %v3219_v40 = vld [vmem:[%s3885_s1 + $0x100] sm:$0xff]   ;;  %556 = vmatprep.mubr.bf16.mxu0 %v2045_v35 }
   0xd   :  { %2270 = vmatpush3.bf16.msra.mxu1 %v3080_v11  ;;  %2249 = vmatprep.subr.bf16.mxu0 %v3086_v12  ;;  %v3224_v41 = vld [vmem:[%s3885_s1 + $0x180] sm:$0xff]   ;;  %v3229_v42 = vld [vmem:[%s3885_s1 + $0x148] sm:$0xff]   ;;  %v3249_v45 = vld [vmem:[%s3885_s1 + $0x150] sm:$0xff]  }
   0xe   :  { %2271 = vmatprep.subr.bf16.mxu1 %v3092_v13  ;;  %596 = vmatprep.mubr.bf16.mxu1 %v2047_v37  ;;  %v3236_v43 = vld [vmem:[%s3885_s1 + $0x108] sm:$0xff]   ;;  %v3257_v46 = vld [vmem:[%s3885_s1 + $0x190] sm:$0xff]   ;;  %v3270_v48 = vld [vmem:[%s3885_s1 + $0x158] sm:$0xff]  }
   0xf   :  { %v3243_v44 = vld [vmem:[%s3885_s1 + $0x188] sm:$0xff]   ;;  %v3264_v47 = vld [vmem:[%s3885_s1 + $0x110] sm:$0xff]   ;;  %v3276_v49 = vld [vmem:[%s3885_s1 + $0x198] sm:$0xff]  }
  0x10   :  { %2250 = vmatpush3.bf16.msra.mxu0 %v3098_v14  ;;  %v3283_v50 = vld [vmem:[%s3885_s1 + $0x118] sm:$0xff]   ;;  %v3289_v51 = vld [vmem:[%s3885_s1 + $0x160] sm:$0xff]   ;;  %v3308_v54 = vld [vmem:[%s3885_s1 + $0x168] sm:$0xff]  }
  0x11   :  { %2272 = vmatpush3.bf16.msra.mxu1 %v3104_v15  ;;  %2251 = vmatprep.subr.bf16.mxu0 %v3110_v16  ;;  %v3295_v52 = vld [vmem:[%s3885_s1 + $0x1a0] sm:$0xff]   ;;  %v3314_v55 = vld [vmem:[%s3885_s1 + $0x1a8] sm:$0xff]   ;;  %v3327_v57 = vld [vmem:[%s3885_s1 + $0x170] sm:$0xff]  }
  0x12   :  { %2273 = vmatprep.subr.bf16.mxu1 %v3116_v17  ;;  %v3302_v53 = vld [vmem:[%s3885_s1 + $0x120] sm:$0xff]   ;;  %v3321_v56 = vld [vmem:[%s3885_s1 + $0x128] sm:$0xff]   ;;  %v36_v58 = vld [vmem:[%s3884_s0 + $0x10] sm:$0xff] }
  0x13   :  { %v3336_v59 = vld [vmem:[%s3885_s1 + $0x1b0] sm:$0xff]   ;;  %v2049_v60 = vcombine.high %v36_v58, %v36_v58  ;;  %v3349_v62 = vld [vmem:[%s3885_s1 + $0x178] sm:$0xff]   ;;  %v2048_v35 = vcombine.low %v36_v58, %v36_v58 }
  0x14   :  { %2252 = vmatpush3.bf16.msra.mxu0 %v3122_v18  ;;  %v3343_v61 = vld [vmem:[%s3885_s1 + $0x130] sm:$0xff]   ;;  %v3354_v63 = vld [vmem:[%s3885_s1 + $0x1b8] sm:$0xff]  }
  0x15   :  { %2274 = vmatpush3.bf16.msra.mxu1 %v3128_v19  ;;  %2253 = vmatprep.subr.bf16.mxu0 %v3134_v20  ;;  %v3359_v32 = vld [vmem:[%s3885_s1 + $0x138] sm:$0xff]   ;;  %v40_v58 = vld [vmem:[%s3884_s0 + $0x2c] sm:$0xff] }
  0x16   :  { %2275 = vmatprep.subr.bf16.mxu1 %v3140_v21  ;;  %v2827_v33 = vld [vmem:[%s3884_s0 + $0x18] ss:$0 sps:$4 sm:$0xff]  }
  0x18   :  { %2254 = vmatpush3.bf16.msra.mxu0 %v3146_v22 }
  0x19   :  { %2276 = vmatpush3.bf16.msra.mxu1 %v3152_v23  ;;  %2255 = vmatprep.subr.bf16.mxu0 %v3158_v24 }
  0x1a   :  { %2277 = vmatprep.subr.bf16.mxu1 %v3164_v25 }
  0x1c   :  { %2256 = vmatpush3.bf16.msra.mxu0 %v3170_v26 }
  0x1d   :  { %2278 = vmatpush3.bf16.msra.mxu1 %v3176_v27  ;;  %2257 = vmatprep.subr.bf16.mxu0 %v3182_v28 }
  0x1e   :  { %2279 = vmatprep.subr.bf16.mxu1 %v3188_v29 }
  0x20   :  { %2258 = vmatpush3.bf16.msra.mxu0 %v3194_v30 }
  0x21   :  { %2280 = vmatpush3.bf16.msra.mxu1 %v3200_v31  ;;  %2287 = vmatprep.subr.bf16.mxu0 %v3213_v38 }
  0x22   :  { %2601 = vmatprep.subr.bf16.mxu1 %v2958_v39 }
  0x23   :  { %557 = vmatmul.mubr.bf16.vlgmr.msra.gmra.mrb[0].mxu0 %v2044_v34  ;;  %v38_v34 = vld [vmem:[%s3884_s0 + $0x1c] sm:$0xff] }
  0x24   :  { %597 = vmatmul.mubr.bf16.vlgmr.msra.gmra.mrb[0].mxu1 %v2046_v36  ;;  %2288 = vmatpush3.bf16.msra.mxu0 %v3219_v40  ;;  %v39_v36 = vld [vmem:[%s3884_s0 + $0x24] sm:$0xff]  ;;  %v2108_v37 = vcombine.high %v38_v34, %v38_v34 }
  0x25   :  { %2602 = vmatpush3.bf16.msra.mxu1 %v3224_v41  ;;  %2289 = vmatprep.subr.bf16.mxu0 %v3229_v42 }
  0x26   :  { %2603 = vmatprep.subr.bf16.mxu1 %v2958_v39  ;;  %2617 = vmatprep.mubr.msk.bf16.mxu1 %vm2959_vm0, %v2958_v39 }
  0x27   :  { %636 = vmatprep.mubr.bf16.mxu0 %v2049_v60  ;;  %v2110_v60 = vcombine.high %v39_v36, %v39_v36 }
  0x28   :  { %2290 = vmatpush3.bf16.msra.mxu0 %v3236_v43 }
  0x29   :  { %2604 = vmatpush3.bf16.msra.mxu1 %v3243_v44  ;;  %2291 = vmatprep.subr.bf16.mxu0 %v3249_v45 }
  0x2a   :  { %2605 = vmatprep.subr.bf16.mxu1 %v2958_v39 }
  0x2c   :  { %2292 = vmatpush3.bf16.msra.mxu0 %v3264_v47 }
  0x2d   :  { %2606 = vmatpush3.bf16.msra.mxu1 %v3257_v46  ;;  %2293 = vmatprep.subr.bf16.mxu0 %v3270_v48 }
  0x2e   :  { %2607 = vmatprep.subr.bf16.mxu1 %v2958_v39 }
  0x30   :  { %2294 = vmatpush3.bf16.msra.mxu0 %v3283_v50 }
  0x31   :  { %2608 = vmatpush3.bf16.msra.mxu1 %v3276_v49  ;;  %2295 = vmatprep.subr.bf16.mxu0 %v3289_v51 }
  0x32   :  { %2609 = vmatprep.subr.bf16.mxu1 %v2958_v39 }
  0x34   :  { %2296 = vmatpush3.bf16.msra.mxu0 %v3302_v53 }
  0x35   :  { %2610 = vmatpush3.bf16.msra.mxu1 %v3295_v52  ;;  %2297 = vmatprep.subr.bf16.mxu0 %v3308_v54 }
  0x36   :  { %2611 = vmatprep.subr.bf16.mxu1 %v2958_v39 }
  0x38   :  { %2298 = vmatpush3.bf16.msra.mxu0 %v3321_v56 }
  0x39   :  { %2612 = vmatpush3.bf16.msra.mxu1 %v3314_v55  ;;  %2299 = vmatprep.subr.bf16.mxu0 %v3327_v57 }
  0x3a   :  { %2613 = vmatprep.subr.bf16.mxu1 %v2958_v39 }
  0x3c   :  { %2300 = vmatpush3.bf16.msra.mxu0 %v3343_v61 }
  0x3d   :  { %2614 = vmatpush3.bf16.msra.mxu1 %v3336_v59  ;;  %2301 = vmatprep.subr.bf16.mxu0 %v3349_v62 }
  0x3e   :  { %2615 = vmatprep.subr.bf16.mxu1 %v2958_v39 }
  0x40   :  { %2302 = vmatpush3.bf16.msra.mxu0 %v3359_v32 }
  0x41   :  { %2616 = vmatpush3.bf16.msra.mxu1 %v3354_v63  ;;  %2318 = vmatprep.subr.bf16.mxu0 %v3015_v0 }
  0x42   :  { %2340 = vmatprep.subr.bf16.mxu1 %v3020_v1 }
  0x43   :  { %637 = vmatmul.mubr.bf16.vlgmr.msra.gmra.mrb[4].mxu0 %v2048_v35  ;;  %v2107_v35 = vcombine.low %v38_v34, %v38_v34 }
  0x44   :  { %2618 = vmatmul.mubr.bf16.vlgmr.msra.gmra.mrb[4].mxu1 %v2827_v33  ;;  %2319 = vmatpush3.bf16.msra.mxu0 %v3026_v2  ;;  %v2109_v33 = vcombine.low %v39_v36, %v39_v36 }
  0x45   :  { %2341 = vmatpush3.bf16.msra.mxu1 %v3032_v3  ;;  %2320 = vmatprep.subr.bf16.mxu0 %v3038_v4 }
  0x46   :  { %2342 = vmatprep.subr.bf16.mxu1 %v3044_v5  ;;  %741 = vmatprep.mubr.bf16.mxu0 %v2108_v37  ;;  %v2112_v37 = vcombine.high %v40_v58, %v40_v58 }
  0x47   :  { %781 = vmatprep.mubr.bf16.mxu1 %v2110_v60 }
  0x48   :  { %2321 = vmatpush3.bf16.msra.mxu0 %v3050_v6 }
  0x49   :  { %2343 = vmatpush3.bf16.msra.mxu1 %v3056_v7  ;;  %2322 = vmatprep.subr.bf16.mxu0 %v3062_v8 }
  0x4a   :  { %2344 = vmatprep.subr.bf16.mxu1 %v3068_v9 }
  0x4c   :  { %2323 = vmatpush3.bf16.msra.mxu0 %v3074_v10 }
  0x4d   :  { %2345 = vmatpush3.bf16.msra.mxu1 %v3080_v11  ;;  %2324 = vmatprep.subr.bf16.mxu0 %v3086_v12 }
  0x4e   :  { %2346 = vmatprep.subr.bf16.mxu1 %v3092_v13 }
  0x50   :  { %2325 = vmatpush3.bf16.msra.mxu0 %v3098_v14 }
  0x51   :  { %2347 = vmatpush3.bf16.msra.mxu1 %v3104_v15  ;;  %2326 = vmatprep.subr.bf16.mxu0 %v3110_v16 }
  0x52   :  { %2348 = vmatprep.subr.bf16.mxu1 %v3116_v17 }
  0x54   :  { %2327 = vmatpush3.bf16.msra.mxu0 %v3122_v18 }
  0x55   :  { %2349 = vmatpush3.bf16.msra.mxu1 %v3128_v19  ;;  %2328 = vmatprep.subr.bf16.mxu0 %v3134_v20 }
  0x56   :  { %2350 = vmatprep.subr.bf16.mxu1 %v3140_v21 }
  0x58   :  { %2329 = vmatpush3.bf16.msra.mxu0 %v3146_v22 }
  0x59   :  { %2351 = vmatpush3.bf16.msra.mxu1 %v3152_v23  ;;  %2330 = vmatprep.subr.bf16.mxu0 %v3158_v24 }
  0x5a   :  { %2352 = vmatprep.subr.bf16.mxu1 %v3164_v25 }
  0x5c   :  { %2331 = vmatpush3.bf16.msra.mxu0 %v3170_v26 }
  0x5d   :  { %2353 = vmatpush3.bf16.msra.mxu1 %v3176_v27  ;;  %2332 = vmatprep.subr.bf16.mxu0 %v3182_v28 }
  0x5e   :  { %2354 = vmatprep.subr.bf16.mxu1 %v3188_v29 }
  0x60   :  { %2333 = vmatpush3.bf16.msra.mxu0 %v3194_v30 }
  0x61   :  { %2355 = vmatpush3.bf16.msra.mxu1 %v3200_v31  ;;  %2362 = vmatprep.subr.bf16.mxu0 %v3213_v38 }
  0x62   :  { %2621 = vmatprep.subr.bf16.mxu1 %v2958_v39 }
  0x63   :  { %14 = vsyncpa [#allocation3], 0  ;;  %742 = vmatmul.mubr.bf16.vlgmr.msra.gmra.mrb[8].mxu0 %v2107_v35  ;;  %v2834_v34 = vld [vmem:[%s3884_s0 + $0x34] ss:$0 sps:$4 sm:$0xff]   ;;  %v42_v36 = vld [vmem:[%s3884_s0 + $0x38] sm:$0xff]  ;;  %v2111_v60 = vcombine.low %v40_v58, %v40_v58  ;;  %vm2017_vm1 = vcmask 1041408  }
  0x64   :  { %782 = vmatmul.mubr.bf16.vlgmr.msra.gmra.mrb[8].mxu1 %v2109_v33  ;;  %2363 = vmatpush3.bf16.msra.mxu0 %v3219_v40  ;;  %v43_v33 = vld [vmem:[%s3884_s0 + $0x40] sm:$0xff]  ;;  %v2115_v35 = vcombine.high %v42_v36, %v42_v36 }
  0x65   :  { %2622 = vmatpush3.bf16.msra.mxu1 %v3224_v41  ;;  %2364 = vmatprep.subr.bf16.mxu0 %v3229_v42  ;;  %v2926_v58 = vld [vmem:[%s3885_s1 + $0x40] sm:$0xff]  }
  0x66   :  { %2623 = vmatprep.subr.bf16.mxu1 %v2958_v39  ;;  %821 = vmatprep.mubr.bf16.mxu0 %v2112_v37  ;;  %v2117_v37 = vcombine.high %v43_v33, %v43_v33 }
  0x67   :  { %2637 = vmatprep.mubr.msk.bf16.mxu1 %vm2959_vm0, %v2958_v39 }
  0x68   :  { %2365 = vmatpush3.bf16.msra.mxu0 %v3236_v43 }
  0x69   :  { %2624 = vmatpush3.bf16.msra.mxu1 %v3243_v44  ;;  %2366 = vmatprep.subr.bf16.mxu0 %v3249_v45 }
  0x6a   :  { %2625 = vmatprep.subr.bf16.mxu1 %v2958_v39 }
  0x6c   :  { %2367 = vmatpush3.bf16.msra.mxu0 %v3264_v47 }
  0x6d   :  { %2626 = vmatpush3.bf16.msra.mxu1 %v3257_v46  ;;  %2368 = vmatprep.subr.bf16.mxu0 %v3270_v48 }
  0x6e   :  { %2627 = vmatprep.subr.bf16.mxu1 %v2958_v39 }
  0x70   :  { %2369 = vmatpush3.bf16.msra.mxu0 %v3283_v50 }
  0x71   :  { %2628 = vmatpush3.bf16.msra.mxu1 %v3276_v49  ;;  %2370 = vmatprep.subr.bf16.mxu0 %v3289_v51 }
  0x72   :  { %2629 = vmatprep.subr.bf16.mxu1 %v2958_v39 }
  0x74   :  { %2371 = vmatpush3.bf16.msra.mxu0 %v3302_v53 }
  0x75   :  { %2630 = vmatpush3.bf16.msra.mxu1 %v3295_v52  ;;  %2372 = vmatprep.subr.bf16.mxu0 %v3308_v54 }
  0x76   :  { %2631 = vmatprep.subr.bf16.mxu1 %v2958_v39 }
  0x78   :  { %2373 = vmatpush3.bf16.msra.mxu0 %v3321_v56 }
  0x79   :  { %2632 = vmatpush3.bf16.msra.mxu1 %v3314_v55  ;;  %2374 = vmatprep.subr.bf16.mxu0 %v3327_v57 }
  0x7a   :  { %2633 = vmatprep.subr.bf16.mxu1 %v2958_v39 }
  0x7c   :  { %2375 = vmatpush3.bf16.msra.mxu0 %v3343_v61 }
  0x7d   :  { %2634 = vmatpush3.bf16.msra.mxu1 %v3336_v59  ;;  %2376 = vmatprep.subr.bf16.mxu0 %v3349_v62 }
  0x7e   :  { %2635 = vmatprep.subr.bf16.mxu1 %v2958_v39 }
  0x80   :  { %2377 = vmatpush3.bf16.msra.mxu0 %v3359_v32 }
  0x81   :  { %2636 = vmatpush3.bf16.msra.mxu1 %v3354_v63  ;;  %2393 = vmatprep.subr.bf16.mxu0 %v3015_v0  ;;  %v2116_v0 = vcombine.low %v43_v33, %v43_v33  ;;  %v2928_v33 = vld [vmem:[%s3885_s1] sm:$0xff]  }
  0x82   :  { %2415 = vmatprep.subr.bf16.mxu1 %v3020_v1  ;;  %v44_v1 = vld [vmem:[%s3884_s0 + $0x48] sm:$0xff] }
  0x83   :  { %822 = vmatmul.mubr.bf16.vlgmr.msra.gmra.mrb[12].mxu0 %v2111_v60  ;;  %v2927_v60 = vld [vmem:[%s3885_s1 + $0x80] sm:$0xff]  }
  0x84   :  { %2638 = vmatmul.mubr.bf16.vlgmr.msra.gmra.mrb[12].mxu1 %v2834_v34  ;;  %2394 = vmatpush3.bf16.msra.mxu0 %v3026_v2  ;;  %v2114_v2 = vcombine.low %v42_v36, %v42_v36 }
  0x85   :  { %2416 = vmatpush3.bf16.msra.mxu1 %v3032_v3  ;;  %2395 = vmatprep.subr.bf16.mxu0 %v3038_v4  ;;  %v2119_v3 = vcombine.high %v44_v1, %v44_v1  ;;  %v2841_v4 = vld [vmem:[%s3884_s0 + $0x50] ss:$0 sps:$4 sm:$0xff]  }
  0x86   :  { %2417 = vmatprep.subr.bf16.mxu1 %v3044_v5  ;;  %926 = vmatprep.mubr.bf16.mxu0 %v2115_v35  ;;  %v46_v5 = vld [vmem:[%s3884_s0 + $0x54] sm:$0xff]  ;;  %v2929_v35 = vld [vmem:[%s3885_s1 + $0xc8] sm:$0xff]  }
  0x87   :  { %966 = vmatprep.mubr.bf16.mxu1 %v2117_v37  ;;  %v2122_v34 = vcombine.high %v46_v5, %v46_v5  ;;  %v2930_v37 = vld [vmem:[%s3885_s1 + $0x48] sm:$0xff]  }
  0x88   :  { %2396 = vmatpush3.bf16.msra.mxu0 %v3050_v6  ;;  %v2118_v6 = vcombine.low %v44_v1, %v44_v1  ;;  %v2932_v1 = vld [vmem:[%s3885_s1 + $0x8] sm:$0xff]  }
  0x89   :  { %2418 = vmatpush3.bf16.msra.mxu1 %v3056_v7  ;;  %2397 = vmatprep.subr.bf16.mxu0 %v3062_v8  ;;  %v47_v7 = vld [vmem:[%s3884_s0 + $0x5c] sm:$0xff] }
  0x8a   :  { %2419 = vmatprep.subr.bf16.mxu1 %v3068_v9  ;;  %v2925_v8 = vld [vmem:[%s3885_s1 + $0xc0] sm:$0xff]   ;;  %v2124_v36 = vcombine.high %v47_v7, %v47_v7 }
  0x8c   :  { %2398 = vmatpush3.bf16.msra.mxu0 %v3074_v10 }
  0x8d   :  { %2420 = vmatpush3.bf16.msra.mxu1 %v3080_v11  ;;  %2399 = vmatprep.subr.bf16.mxu0 %v3086_v12 }
  0x8e   :  { %2421 = vmatprep.subr.bf16.mxu1 %v3092_v13 }
  0x90   :  { %2400 = vmatpush3.bf16.msra.mxu0 %v3098_v14 }
  0x91   :  { %2422 = vmatpush3.bf16.msra.mxu1 %v3104_v15  ;;  %2401 = vmatprep.subr.bf16.mxu0 %v3110_v16 }
  0x92   :  { %2423 = vmatprep.subr.bf16.mxu1 %v3116_v17 }
  0x94   :  { %2402 = vmatpush3.bf16.msra.mxu0 %v3122_v18 }
  0x95   :  { %2424 = vmatpush3.bf16.msra.mxu1 %v3128_v19  ;;  %2403 = vmatprep.subr.bf16.mxu0 %v3134_v20 }
  0x96   :  { %2425 = vmatprep.subr.bf16.mxu1 %v3140_v21 }
  0x98   :  { %2404 = vmatpush3.bf16.msra.mxu0 %v3146_v22 }
  0x99   :  { %2426 = vmatpush3.bf16.msra.mxu1 %v3152_v23  ;;  %2405 = vmatprep.subr.bf16.mxu0 %v3158_v24 }
  0x9a   :  { %2427 = vmatprep.subr.bf16.mxu1 %v3164_v25 }
  0x9c   :  { %2406 = vmatpush3.bf16.msra.mxu0 %v3170_v26 }
  0x9d   :  { %2428 = vmatpush3.bf16.msra.mxu1 %v3176_v27  ;;  %2407 = vmatprep.subr.bf16.mxu0 %v3182_v28 }
  0x9e   :  { %2429 = vmatprep.subr.bf16.mxu1 %v3188_v29 }
  0xa0   :  { %2408 = vmatpush3.bf16.msra.mxu0 %v3194_v30 }
  0xa1   :  { %2430 = vmatpush3.bf16.msra.mxu1 %v3200_v31  ;;  %2437 = vmatprep.subr.bf16.mxu0 %v3213_v38 }
  0xa2   :  { %2641 = vmatprep.subr.bf16.mxu1 %v2958_v39 }
  0xa3   :  { %927 = vmatmul.mubr.bf16.vlgmr.msra.gmra.mrb[16].mxu0 %v2114_v2  ;;  %v2933_v2 = vld [vmem:[%s3885_s1 + $0x50] sm:$0xff]  }
  0xa4   :  { %967 = vmatmul.mubr.bf16.vlgmr.msra.gmra.mrb[16].mxu1 %v2116_v0  ;;  %2438 = vmatpush3.bf16.msra.mxu0 %v3219_v40  ;;  %v2931_v0 = vld [vmem:[%s3885_s1 + $0x88] sm:$0xff]  }
  0xa5   :  { %2642 = vmatpush3.bf16.msra.mxu1 %v3224_v41  ;;  %2439 = vmatprep.subr.bf16.mxu0 %v3229_v42 }
  0xa6   :  { %2643 = vmatprep.subr.bf16.mxu1 %v2958_v39  ;;  %1006 = vmatprep.mubr.bf16.mxu0 %v2119_v3 }
  0xa7   :  { %2657 = vmatprep.mubr.msk.bf16.mxu1 %vm2959_vm0, %v2958_v39 }
  0xa8   :  { %2440 = vmatpush3.bf16.msra.mxu0 %v3236_v43 }
  0xa9   :  { %2644 = vmatpush3.bf16.msra.mxu1 %v3243_v44  ;;  %2441 = vmatprep.subr.bf16.mxu0 %v3249_v45 }
  0xaa   :  { %2645 = vmatprep.subr.bf16.mxu1 %v2958_v39 }
  0xac   :  { %2442 = vmatpush3.bf16.msra.mxu0 %v3264_v47 }
  0xad   :  { %2646 = vmatpush3.bf16.msra.mxu1 %v3257_v46  ;;  %2443 = vmatprep.subr.bf16.mxu0 %v3270_v48 }
  0xae   :  { %2647 = vmatprep.subr.bf16.mxu1 %v2958_v39 }
  0xb0   :  { %2444 = vmatpush3.bf16.msra.mxu0 %v3283_v50 }
  0xb1   :  { %2648 = vmatpush3.bf16.msra.mxu1 %v3276_v49  ;;  %2445 = vmatprep.subr.bf16.mxu0 %v3289_v51 }
  0xb2   :  { %2649 = vmatprep.subr.bf16.mxu1 %v2958_v39 }
  0xb4   :  { %2446 = vmatpush3.bf16.msra.mxu0 %v3302_v53 }
  0xb5   :  { %2650 = vmatpush3.bf16.msra.mxu1 %v3295_v52  ;;  %2447 = vmatprep.subr.bf16.mxu0 %v3308_v54 }
  0xb6   :  { %2651 = vmatprep.subr.bf16.mxu1 %v2958_v39 }
  0xb8   :  { %2448 = vmatpush3.bf16.msra.mxu0 %v3321_v56 }
  0xb9   :  { %2652 = vmatpush3.bf16.msra.mxu1 %v3314_v55  ;;  %2449 = vmatprep.subr.bf16.mxu0 %v3327_v57 }
  0xba   :  { %2653 = vmatprep.subr.bf16.mxu1 %v2958_v39 }
  0xbc   :  { %2450 = vmatpush3.bf16.msra.mxu0 %v3343_v61 }
  0xbd   :  { %2654 = vmatpush3.bf16.msra.mxu1 %v3336_v59  ;;  %2451 = vmatprep.subr.bf16.mxu0 %v3349_v62 }
  0xbe   :  { %2655 = vmatprep.subr.bf16.mxu1 %v2958_v39 }
  0xc0   :  { %2452 = vmatpush3.bf16.msra.mxu0 %v3359_v32 }
  0xc1   :  { %2656 = vmatpush3.bf16.msra.mxu1 %v3354_v63  ;;  %2468 = vmatprep.subr.bf16.mxu0 %v2926_v58 }
  0xc2   :  { %2490 = vmatprep.subr.bf16.mxu1 %v2925_v8 }
  0xc3   :  { %1007 = vmatmul.mubr.bf16.vlgmr.msra.gmra.mrb[20].mxu0 %v2118_v6  ;;  %v2857_v6 = vld [vmem:[%s3887_s3 + $0x20] sm:$0xff]  }
  0xc4   :  { %2658 = vmatmul.mubr.bf16.vlgmr.msra.gmra.mrb[20].mxu1 %v2841_v4  ;;  %2469 = vmatpush3.bf16.msra.mxu0 %v2928_v33 }
  0xc5   :  { %2491 = vmatpush3.bf16.msra.mxu1 %v2927_v60  ;;  %2470 = vmatprep.subr.bf16.mxu0 %v2930_v37  ;;  %v2858_v60 = vld [vmem:[%s3887_s3 + $0x60] sm:$0xff]   ;;  %v2859_v37 = vld [vmem:[%s3887_s3 + $0x28] sm:$0xff]  }
  0xc6   :  { %2492 = vmatprep.subr.bf16.mxu1 %v2929_v35  ;;  %1111 = vmatprep.mubr.bf16.mxu0 %v2122_v34 }
  0xc7   :  { %1151 = vmatprep.mubr.bf16.mxu1 %v2124_v36 }
  0xc8   :  { %2471 = vmatpush3.bf16.msra.mxu0 %v2932_v1  ;;  %v2860_v1 = vld [vmem:[%s3887_s3 + $0x68] sm:$0xff]  }
  0xc9   :  { %2493 = vmatpush3.bf16.msra.mxu1 %v2931_v0  ;;  %2472 = vmatprep.subr.bf16.mxu0 %v2933_v2 }
  0xca   :  { %2494 = vmatprep.subr.bf16.mxu1 %v3068_v9  ;;  %v2123_v9 = vcombine.low %v47_v7, %v47_v7 }
  0xcc   :  { %2473 = vmatpush3.bf16.msra.mxu0 %v3074_v10  ;;  %v48_v10 = vld [vmem:[%s3884_s0 + $0x64] sm:$0xff] }
  0xcd   :  { %2495 = vmatpush3.bf16.msra.mxu1 %v3080_v11  ;;  %2474 = vmatprep.subr.bf16.mxu0 %v3086_v12  ;;  %v2121_v11 = vcombine.low %v46_v5, %v46_v5  ;;  %v2126_v12 = vcombine.high %v48_v10, %v48_v10 }
  0xce   :  { %2496 = vmatprep.subr.bf16.mxu1 %v3092_v13 }
  0xd0   :  { %2475 = vmatpush3.bf16.msra.mxu0 %v3098_v14 }
  0xd1   :  { %2497 = vmatpush3.bf16.msra.mxu1 %v3104_v15  ;;  %2476 = vmatprep.subr.bf16.mxu0 %v3110_v16 }
  0xd2   :  { %2498 = vmatprep.subr.bf16.mxu1 %v3116_v17 }
  0xd4   :  { %2477 = vmatpush3.bf16.msra.mxu0 %v3122_v18 }
  0xd5   :  { %2499 = vmatpush3.bf16.msra.mxu1 %v3128_v19  ;;  %2478 = vmatprep.subr.bf16.mxu0 %v3134_v20 }
  0xd6   :  { %2500 = vmatprep.subr.bf16.mxu1 %v3140_v21 }
  0xd8   :  { %2479 = vmatpush3.bf16.msra.mxu0 %v3146_v22 }
  0xd9   :  { %2501 = vmatpush3.bf16.msra.mxu1 %v3152_v23  ;;  %2480 = vmatprep.subr.bf16.mxu0 %v3158_v24  ;;  %v2848_v24 = vld [vmem:[%s3884_s0 + $0x6c] ss:$0 sps:$4 sm:$0xff]  }
  0xda   :  { %2502 = vmatprep.subr.bf16.mxu1 %v3164_v25  ;;  %v2125_v25 = vcombine.low %v48_v10, %v48_v10  ;;  %v2862_v10 = vld [vmem:[%s3887_s3 + $0x70] sm:$0xff]  }
  0xdc   :  { %2481 = vmatpush3.bf16.msra.mxu0 %v3170_v26 }
  0xdd   :  { %2503 = vmatpush3.bf16.msra.mxu1 %v3176_v27  ;;  %2482 = vmatprep.subr.bf16.mxu0 %v3182_v28 }
  0xde   :  { %2504 = vmatprep.subr.bf16.mxu1 %v3188_v29 }
  0xe0   :  { %2483 = vmatpush3.bf16.msra.mxu0 %v3194_v30 }
  0xe1   :  { %2505 = vmatpush3.bf16.msra.mxu1 %v3200_v31  ;;  %2512 = vmatprep.subr.bf16.mxu0 %v3213_v38 }
  0xe2   :  { %2661 = vmatprep.subr.bf16.mxu1 %v2958_v39 }
  0xe3   :  { %1112 = vmatmul.mubr.bf16.vlgmr.msra.gmra.mrb[24].mxu0 %v2121_v11  ;;  %v2863_v11 = vld [vmem:[%s3887_s3 + $0x38] sm:$0xff]  }
  0xe4   :  { %1152 = vmatmul.mubr.bf16.vlgmr.msra.gmra.mrb[24].mxu1 %v2123_v9  ;;  %2513 = vmatpush3.bf16.msra.mxu0 %v3219_v40  ;;  %v2861_v9 = vld [vmem:[%s3887_s3 + $0x30] sm:$0xff]  }
  0xe5   :  { %2662 = vmatpush3.bf16.msra.mxu1 %v3224_v41  ;;  %2514 = vmatprep.subr.bf16.mxu0 %v3229_v42 }
  0xe6   :  { %2663 = vmatprep.subr.bf16.mxu1 %v2958_v39  ;;  %1191 = vmatprep.mubr.bf16.mxu0 %v2126_v12  ;;  %v2864_v12 = vld [vmem:[%s3887_s3 + $0x78] sm:$0xff]  }
  0xe7   :  { %2677 = vmatprep.mubr.msk.bf16.mxu1 %vm2959_vm0, %v2958_v39 }
  0xe8   :  { %2515 = vmatpush3.bf16.msra.mxu0 %v3236_v43 }
  0xe9   :  { %2664 = vmatpush3.bf16.msra.mxu1 %v3243_v44  ;;  %2516 = vmatprep.subr.bf16.mxu0 %v3249_v45 }
  0xea   :  { %2665 = vmatprep.subr.bf16.mxu1 %v2958_v39 }
  0xec   :  { %2517 = vmatpush3.bf16.msra.mxu0 %v3264_v47 }
  0xed   :  { %2666 = vmatpush3.bf16.msra.mxu1 %v3257_v46  ;;  %2518 = vmatprep.subr.bf16.mxu0 %v3270_v48 }
  0xee   :  { %2667 = vmatprep.subr.bf16.mxu1 %v2958_v39 }
  0xf0   :  { %2519 = vmatpush3.bf16.msra.mxu0 %v3283_v50 }
  0xf1   :  { %2668 = vmatpush3.bf16.msra.mxu1 %v3276_v49  ;;  %2520 = vmatprep.subr.bf16.mxu0 %v3289_v51 }
  0xf2   :  { %2669 = vmatprep.subr.bf16.mxu1 %v2958_v39 }
  0xf4   :  { %2521 = vmatpush3.bf16.msra.mxu0 %v3302_v53 }
  0xf5   :  { %2670 = vmatpush3.bf16.msra.mxu1 %v3295_v52  ;;  %2522 = vmatprep.subr.bf16.mxu0 %v3308_v54 }
  0xf6   :  { %2671 = vmatprep.subr.bf16.mxu1 %v2958_v39  ;;  %v2259_v13 = vpop.f32.mrb[0].mxu0 }
  0xf7   :  { %v2281_v14 = vpop.f32.mrb[0].mxu1  ;;  %v2260_v15 = vpop.f32.mrb[1].mxu0 }
  0xf8   :  { %v2282_v16 = vpop.f32.mrb[1].mxu1  ;;  %v2261_v17 = vadd.f32 %v2260_v15, %v2259_v13  ;;  %v2262_v19 = vpop.f32.mrb[2].mxu0  ;;  %2523 = vmatpush3.bf16.msra.mxu0 %v3321_v56  ;;  %v2850_v56 = vld [vmem:[%s3887_s3 + $0x40] sm:$0xff]  }
  0xf9   :  { %v2283_v18 = vadd.f32 %v2282_v16, %v2281_v14  ;;  %2672 = vmatpush3.bf16.msra.mxu1 %v3314_v55  ;;  %v2284_v20 = vpop.f32.mrb[2].mxu1  ;;  %v2263_v21 = vpop.f32.mrb[3].mxu0  ;;  %2524 = vmatprep.subr.bf16.mxu0 %v3327_v57  ;;  %v2849_v55 = vld [vmem:[%s3887_s3] sm:$0xff]   ;;  %v2851_v57 = vld [vmem:[%s3887_s3 + $0x8] sm:$0xff]  }
  0xfa   :  { %v2285_v22 = vpop.f32.mrb[3].mxu1  ;;  %2673 = vmatprep.subr.bf16.mxu1 %v2958_v39 }
  0xfb   :  { %v599_v23 = vadd.f32 %v2283_v18, %v2261_v17 }
  0xfc   :  { %2525 = vmatpush3.bf16.msra.mxu0 %v3343_v61  ;;  %v2853_v61 = vld [vmem:[%s3887_s3 + $0x10] sm:$0xff]  }
  0xfd   :  { %2674 = vmatpush3.bf16.msra.mxu1 %v3336_v59  ;;  %2526 = vmatprep.subr.bf16.mxu0 %v3349_v62  ;;  %v2852_v59 = vld [vmem:[%s3887_s3 + $0x48] sm:$0xff]   ;;  %v2854_v62 = vld [vmem:[%s3887_s3 + $0x50] sm:$0xff]  }
  0xfe   :  { %2675 = vmatprep.subr.bf16.mxu1 %v2958_v39 }
 0x100   :  { %2527 = vmatpush3.bf16.msra.mxu0 %v3359_v32  ;;  %v2856_v32 = vld [vmem:[%s3887_s3 + $0x58] sm:$0xff]  }
 0x101   :  { %2676 = vmatpush3.bf16.msra.mxu1 %v3354_v63  ;;  %2681 = vmatprep.subr.bf16.mxu0 %v2958_v39  ;;  %v2855_v63 = vld [vmem:[%s3887_s3 + $0x18] sm:$0xff]  }
 0x102   :  { %2701 = vmatprep.subr.bf16.mxu1 %v2958_v39 }
 0x103   :  { %1192 = vmatmul.mubr.bf16.vlgmr.msra.gmra.mrb[28].mxu0 %v2125_v25 }
 0x104   :  { %2678 = vmatmul.mubr.bf16.vlgmr.msra.gmra.mrb[28].mxu1 %v2848_v24  ;;  %2697 = vmatprep.mubr.msk.bf16.mxu0 %vm2959_vm0, %v2958_v39 }
 0x105   :  { %2717 = vmatprep.mubr.msk.bf16.mxu1 %vm2959_vm0, %v2958_v39  ;;  %2702 = vmatpush3.bf16.msra.mxu1 %v2849_v55 }
 0x106   :  { %2682 = vmatpush3.bf16.msra.mxu0 %v2850_v56  ;;  %2703 = vmatprep.subr.bf16.mxu1 %v2958_v39 }
 0x107   :  { %2683 = vmatprep.subr.bf16.mxu0 %v2958_v39 }
 0x109   :  { %2704 = vmatpush3.bf16.msra.mxu1 %v2851_v57 }
 0x10a   :  { %2684 = vmatpush3.bf16.msra.mxu0 %v2852_v59  ;;  %2705 = vmatprep.subr.bf16.mxu1 %v2958_v39 }
 0x10b   :  { %2685 = vmatprep.subr.bf16.mxu0 %v2958_v39 }
 0x10d   :  { %2706 = vmatpush3.bf16.msra.mxu1 %v2853_v61 }
 0x10e   :  { %2686 = vmatpush3.bf16.msra.mxu0 %v2854_v62  ;;  %2707 = vmatprep.subr.bf16.mxu1 %v2958_v39 }
 0x10f   :  { %2687 = vmatprep.subr.bf16.mxu0 %v2958_v39 }
 0x111   :  { %2708 = vmatpush3.bf16.msra.mxu1 %v2855_v63 }
 0x112   :  { %2709 = vmatprep.subr.bf16.mxu1 %v2958_v39  ;;  %2688 = vmatpush3.bf16.msra.mxu0 %v2856_v32 }
 0x113   :  { %2689 = vmatprep.subr.bf16.mxu0 %v2958_v39 }
 0x115   :  { %2710 = vmatpush3.bf16.msra.mxu1 %v2857_v6 }
 0x116   :  { %v2303_v27 = vpop.f32.mrb[4].mxu0  ;;  %2711 = vmatprep.subr.bf16.mxu1 %v2958_v39  ;;  %2690 = vmatpush3.bf16.msra.mxu0 %v2858_v60 }
 0x117   :  { %v678_v26 = vpop.f32.mrb[4].mxu1  ;;  %v2304_v29 = vpop.f32.mrb[5].mxu0  ;;  %2691 = vmatprep.subr.bf16.mxu0 %v2958_v39 }
 0x118   :  { %v2619_v28 = vpop.f32.mrb[5].mxu1  ;;  %v2305_v31 = vadd.f32 %v2304_v29, %v2303_v27  ;;  %v2306_v38 = vpop.f32.mrb[6].mxu0 }
 0x119   :  { %v681_v30 = vpop.f32.mrb[6].mxu1  ;;  %v2307_v41 = vpop.f32.mrb[7].mxu0  ;;  %2712 = vmatpush3.bf16.msra.mxu1 %v2859_v37  ;;  %v2869_v37 = vld [vmem:[%s3887_s3 + $0xd0] sm:$0xff]  }
 0x11a   :  { %v2620_v40 = vpop.f32.mrb[7].mxu1  ;;  %v639_v42 = vadd.f32 %v2305_v31, %v599_v23  ;;  %2713 = vmatprep.subr.bf16.mxu1 %v2958_v39  ;;  %2692 = vmatpush3.bf16.msra.mxu0 %v2860_v1  ;;  %v2871_v1 = vld [vmem:[%s3887_s3 + $0xd8] sm:$0xff]  }
 0x11b   :  { %2693 = vmatprep.subr.bf16.mxu0 %v2958_v39 }
 0x11c   :  { %v3628_v43 = vadd.f32 %v678_v26, %v639_v42 }
 0x11d   :  { %2714 = vmatpush3.bf16.msra.mxu1 %v2861_v9  ;;  %v2873_v9 = vld [vmem:[%s3887_s3 + $0xe0] sm:$0xff]  }
 0x11e   :  { %2715 = vmatprep.subr.bf16.mxu1 %v2958_v39  ;;  %2694 = vmatpush3.bf16.msra.mxu0 %v2862_v10  ;;  %v2874_v10 = vld [vmem:[%s3887_s3 + $0xa0] sm:$0xff]  }
 0x11f   :  { %2695 = vmatprep.subr.bf16.mxu0 %v2958_v39 }
 0x121   :  { %2716 = vmatpush3.bf16.msra.mxu1 %v2863_v11  ;;  %v2875_v11 = vld [vmem:[%s3887_s3 + $0xe8] sm:$0xff]  }
 0x122   :  { %2741 = vmatprep.subr.bf16.mxu1 %v2958_v39  ;;  %2696 = vmatpush3.bf16.msra.mxu0 %v2864_v12  ;;  %v2876_v12 = vld [vmem:[%s3887_s3 + $0xa8] sm:$0xff]  }
 0x123   :  { %2721 = vmatprep.subr.bf16.mxu0 %v2958_v39 }
 0x136   :  { %v2334_v45 = vpop.f32.mrb[8].mxu0 }
 0x137   :  { %v2356_v44 = vpop.f32.mrb[8].mxu1  ;;  %v2335_v47 = vpop.f32.mrb[9].mxu0 }
 0x138   :  { %v2357_v46 = vpop.f32.mrb[9].mxu1  ;;  %v2336_v50 = vadd.f32 %v2335_v47, %v2334_v45  ;;  %v2337_v51 = vpop.f32.mrb[10].mxu0 }
 0x139   :  { %v2358_v48 = vadd.f32 %v2357_v46, %v2356_v44  ;;  %v2359_v49 = vpop.f32.mrb[10].mxu1  ;;  %v2338_v53 = vpop.f32.mrb[11].mxu0 }
 0x13a   :  { %v2360_v52 = vpop.f32.mrb[11].mxu1 }
 0x13b   :  { %v784_v54 = vadd.f32 %v2358_v48, %v2336_v50 }
 0x156   :  { %v2378_v4 = vpop.f32.mrb[12].mxu0 }
 0x157   :  { %v863_v3 = vpop.f32.mrb[12].mxu1  ;;  %v2379_v7 = vpop.f32.mrb[13].mxu0 }
 0x158   :  { %v2639_v5 = vpop.f32.mrb[13].mxu1  ;;  %v2380_v58 = vadd.f32 %v2379_v7, %v2378_v4  ;;  %v2381_v34 = vpop.f32.mrb[14].mxu0 }
 0x159   :  { %v866_v8 = vpop.f32.mrb[14].mxu1  ;;  %v2382_v33 = vpop.f32.mrb[15].mxu0  ;;  %v2128_v5 = vld [vmem:[%s3886_s2] ss:$0 sm:$0xff] }
 0x15a   :  { %v2640_v36 = vpop.f32.mrb[15].mxu1  ;;  %v824_v35 = vadd.f32 %v2380_v58, %v784_v54  ;;  %v2865_v58 = vld [vmem:[%s3887_s3 + $0xc0] sm:$0xff]   ;;  %v2867_v33 = vld [vmem:[%s3887_s3 + $0xc8] sm:$0xff]  }
 0x15b   :  { %v2866_v36 = vld [vmem:[%s3887_s3 + $0x80] sm:$0xff]  }
 0x15c   :  { %v3673_v0 = vadd.f32 %v863_v3, %v824_v35  ;;  %v2868_v35 = vld [vmem:[%s3887_s3 + $0x88] sm:$0xff]  }
 0x15e   :  { %v1239_v2 = vmax.f32 %v3628_v43, %v3673_v0  ;;  %v2870_v0 = vld [vmem:[%s3887_s3 + $0x90] sm:$0xff]  }
 0x176   :  { %v2409_v14 = vpop.f32.mrb[16].mxu0 }
 0x177   :  { %v2431_v13 = vpop.f32.mrb[16].mxu1  ;;  %v2410_v16 = vpop.f32.mrb[17].mxu0 }
 0x178   :  { %v2432_v15 = vpop.f32.mrb[17].mxu1  ;;  %v2411_v19 = vadd.f32 %v2410_v16, %v2409_v14  ;;  %v2412_v20 = vpop.f32.mrb[18].mxu0  ;;  %v2878_v14 = vld [vmem:[%s3887_s3 + $0xb0] sm:$0xff]   ;;  %v2880_v16 = vld [vmem:[%s3887_s3 + $0xb8] sm:$0xff]  }
 0x179   :  { %v2433_v17 = vadd.f32 %v2432_v15, %v2431_v13  ;;  %v2434_v18 = vpop.f32.mrb[18].mxu1  ;;  %v2413_v22 = vpop.f32.mrb[19].mxu0  ;;  %v2877_v13 = vld [vmem:[%s3887_s3 + $0xf0] sm:$0xff]   ;;  %v2879_v15 = vld [vmem:[%s3887_s3 + $0xf8] sm:$0xff]   ;;  %v2883_v20 = vld [vmem:[%s3889_s5 + $0x4] ss:$8 sps:$4 sm:$0xff]  }
 0x17a   :  { %v2435_v21 = vpop.f32.mrb[19].mxu1  ;;  %v2889_v22 = vld [vmem:[%s3889_s5 + $0x24] ss:$8 sps:$4 sm:$0xff]  }
 0x17b   :  { %v969_v23 = vadd.f32 %v2433_v17, %v2411_v19  ;;  %v2881_v19 = vld [vmem:[%s3889_s5] ss:$8 sps:$4 sm:$0xff]   ;;  %v2886_v21 = vld [vmem:[%s3889_s5 + $0x14] ss:$8 sps:$4 sm:$0xff]  }
 0x196   :  { %v2453_v25 = vpop.f32.mrb[20].mxu0 }
 0x197   :  { %v1048_v24 = vpop.f32.mrb[20].mxu1  ;;  %v2454_v27 = vpop.f32.mrb[21].mxu0 }
 0x198   :  { %v2659_v26 = vpop.f32.mrb[21].mxu1  ;;  %v2455_v29 = vadd.f32 %v2454_v27, %v2453_v25  ;;  %v2456_v30 = vpop.f32.mrb[22].mxu0  ;;  %v2890_v25 = vld [vmem:[%s3889_s5 + $0x30] ss:$8 sps:$4 sm:$0xff]   ;;  %v2893_v27 = vld [vmem:[%s3889_s5 + $0x40] ss:$8 sps:$4 sm:$0xff]  }
 0x199   :  { %v1051_v28 = vpop.f32.mrb[22].mxu1  ;;  %v2457_v38 = vpop.f32.mrb[23].mxu0  ;;  %v2895_v26 = vld [vmem:[%s3889_s5 + $0x44] ss:$8 sps:$4 sm:$0xff]  }
 0x19a   :  { %v2660_v31 = vpop.f32.mrb[23].mxu1  ;;  %v1009_v40 = vadd.f32 %v2455_v29, %v969_v23  ;;  %v2887_v23 = vld [vmem:[%s3889_s5 + $0x20] ss:$8 sps:$4 sm:$0xff]   ;;  %v2898_v28 = vld [vmem:[%s3889_s5 + $0x54] ss:$8 sps:$4 sm:$0xff]  }
 0x19b   :  { %v2896_v29 = vld [vmem:[%s3889_s5 + $0x50] ss:$8 sps:$4 sm:$0xff]   ;;  %v2901_v30 = vld [vmem:[%s3889_s5 + $0x64] ss:$8 sps:$4 sm:$0xff]   ;;  %v2899_v31 = vld [vmem:[%s3889_s5 + $0x60] ss:$8 sps:$4 sm:$0xff]  }
 0x19c   :  { %v1049_v41 = vadd.f32 %v1048_v24, %v1009_v40  ;;  %v2892_v24 = vld [vmem:[%s3889_s5 + $0x34] ss:$8 sps:$4 sm:$0xff]   ;;  %v2902_v40 = vld [vmem:[%s3889_s5 + $0x70] ss:$8 sps:$4 sm:$0xff]  }
 0x19d   :  { %v2904_v38 = vld [vmem:[%s3889_s5 + $0x74] ss:$8 sps:$4 sm:$0xff]  }
 0x1b6   :  { %v2484_v43 = vpop.f32.mrb[24].mxu0 }
 0x1b7   :  { %v2506_v42 = vpop.f32.mrb[24].mxu1  ;;  %v2485_v45 = vpop.f32.mrb[25].mxu0 }
 0x1b8   :  { %v2507_v44 = vpop.f32.mrb[25].mxu1  ;;  %v2486_v48 = vadd.f32 %v2485_v45, %v2484_v43  ;;  %v2487_v49 = vpop.f32.mrb[26].mxu0  ;;  %v2906_v43 = vld [vmem:[%s3891_s7] sm:$0xff]   ;;  %v2908_v45 = vld [vmem:[%s3891_s7 + $0x8] sm:$0xff]  }
 0x1b9   :  { %v2508_v46 = vadd.f32 %v2507_v44, %v2506_v42  ;;  %v2509_v47 = vpop.f32.mrb[26].mxu1  ;;  %v2488_v51 = vpop.f32.mrb[27].mxu0  ;;  %v2905_v42 = vld [vmem:[%s3891_s7 + $0x40] sm:$0xff]   ;;  %v2907_v44 = vld [vmem:[%s3891_s7 + $0x48] sm:$0xff]   ;;  %v2912_v49 = vld [vmem:[%s3891_s7 + $0x18] sm:$0xff]  }
 0x1ba   :  { %v2510_v50 = vpop.f32.mrb[27].mxu1  ;;  %v2910_v47 = vld [vmem:[%s3891_s7 + $0x10] sm:$0xff]   ;;  %v2914_v51 = vld [vmem:[%s3891_s7 + $0x20] sm:$0xff]  }
 0x1bb   :  { %v1154_v52 = vadd.f32 %v2508_v46, %v2486_v48  ;;  %v2909_v46 = vld [vmem:[%s3891_s7 + $0x50] sm:$0xff]   ;;  %v2911_v48 = vld [vmem:[%s3891_s7 + $0x58] sm:$0xff]   ;;  %v2913_v50 = vld [vmem:[%s3891_s7 + $0x60] sm:$0xff]  }
 0x1d6   :  { %v2528_v54 = vpop.f32.mrb[28].mxu0 }
 0x1d7   :  { %v1233_v53 = vpop.f32.mrb[28].mxu1  ;;  %v2529_v56 = vpop.f32.mrb[29].mxu0 }
 0x1d8   :  { %v2679_v55 = vpop.f32.mrb[29].mxu1  ;;  %v2530_v59 = vadd.f32 %v2529_v56, %v2528_v54  ;;  %v2531_v61 = vpop.f32.mrb[30].mxu0 }
 0x1d9   :  { %v1236_v57 = vpop.f32.mrb[30].mxu1  ;;  %v2532_v63 = vpop.f32.mrb[31].mxu0 }
 0x1da   :  { %v2680_v62 = vpop.f32.mrb[31].mxu1  ;;  %v1194_v32 = vadd.f32 %v2530_v59, %v1154_v52  ;;  %v2915_v52 = vld [vmem:[%s3891_s7 + $0x68] sm:$0xff]  }
 0x1dc   :  { %v1234_v3 = vadd.f32 %v1233_v53, %v1194_v32  ;;  %v2916_v53 = vld [vmem:[%s3891_s7 + $0x28] sm:$0xff]  }
 0x1de   :  { %v1240_v4 = vmax.f32 %v1049_v41, %v1234_v3  ;;  %v2960_v41 = vmov 0  }
 0x1e0   :  { %v1241_v6 = vmax.f32 %v1239_v2, %v1240_v4  ;;  %v2872_v2 = vld [vmem:[%s3887_s3 + $0x98] sm:$0xff]  }
 0x1e2   :  { %v1248_v7 = vadd.f32 %v2128_v5, %v1241_v6 }
 0x1e4   :  { %v1249_v8 = vmax.f32 %v1248_v7, 0.0 }
 0x1e6   :  { %v1250_v34 = vpack.c.bf16 %v1249_v8, %v1249_v8 }
 0x1e8   :  { %2718 = vmatmul.mubr.bf16.vlgmr.msra.gmra.mrb[32].mxu1 %v1250_v34  ;;  %v1285_v60 = vrot.slane %v1250_v34, 1  ;;  %v1588_v17 = vrot.slane %v1250_v34, 3  ;;  %v1480_v18 = vrot.slane %v1250_v34, 2  ;;  %v2209_v34 = vld [vmem:[%s3888_s4] ss:$0 sm:$0xff] }
 0x1e9   :  { %2742 = vmatpush3.bf16.msra.mxu1 %v2865_v58  ;;  %2757 = vmatprep.mubr.msk.bf16.mxu1 %vm2959_vm0, %v2958_v39 }
 0x1ea   :  { %2698 = vmatmul.mubr.bf16.vlgmr.msra.gmra.mrb[32].mxu0 %v1285_v60  ;;  %2743 = vmatprep.subr.bf16.mxu1 %v2958_v39 }
 0x1eb   :  { %2722 = vmatpush3.bf16.msra.mxu0 %v2866_v36  ;;  %2737 = vmatprep.mubr.msk.bf16.mxu0 %vm2959_vm0, %v2958_v39 }
 0x1ec   :  { %2723 = vmatprep.subr.bf16.mxu0 %v2958_v39 }
 0x1ed   :  { %2744 = vmatpush3.bf16.msra.mxu1 %v2867_v33 }
 0x1ee   :  { %2745 = vmatprep.subr.bf16.mxu1 %v2958_v39 }
 0x1ef   :  { %2724 = vmatpush3.bf16.msra.mxu0 %v2868_v35 }
 0x1f0   :  { %2725 = vmatprep.subr.bf16.mxu0 %v2958_v39 }
 0x1f1   :  { %2746 = vmatpush3.bf16.msra.mxu1 %v2869_v37 }
 0x1f2   :  { %2747 = vmatprep.subr.bf16.mxu1 %v2958_v39 }
 0x1f3   :  { %2726 = vmatpush3.bf16.msra.mxu0 %v2870_v0 }
 0x1f4   :  { %2727 = vmatprep.subr.bf16.mxu0 %v2958_v39 }
 0x1f5   :  { %2748 = vmatpush3.bf16.msra.mxu1 %v2871_v1  ;;  %v2917_v1 = vld [vmem:[%s3891_s7 + $0x70] sm:$0xff]  }
 0x1f6   :  { %2749 = vmatprep.subr.bf16.mxu1 %v2958_v39 }
 0x1f7   :  { %2728 = vmatpush3.bf16.msra.mxu0 %v2872_v2  ;;  %v2918_v2 = vld [vmem:[%s3891_s7 + $0x30] sm:$0xff]  }
 0x1f8   :  { %2729 = vmatprep.subr.bf16.mxu0 %v2958_v39 }
 0x1f9   :  { %2750 = vmatpush3.bf16.msra.mxu1 %v2873_v9  ;;  %v2919_v9 = vld [vmem:[%s3891_s7 + $0x78] sm:$0xff]  }
 0x1fa   :  { %2751 = vmatprep.subr.bf16.mxu1 %v2958_v39 }
 0x1fb   :  { %2730 = vmatpush3.bf16.msra.mxu0 %v2874_v10  ;;  %v2920_v10 = vld [vmem:[%s3891_s7 + $0x38] sm:$0xff]  }
 0x1fc   :  { %2731 = vmatprep.subr.bf16.mxu0 %v2958_v39 }
 0x1fd   :  { %2752 = vmatpush3.bf16.msra.mxu1 %v2875_v11  ;;  %v1707_v11 = vlaneseq }
 0x1fe   :  { %2753 = vmatprep.subr.bf16.mxu1 %v2958_v39 }
 0x1ff   :  { %2732 = vmatpush3.bf16.msra.mxu0 %v2876_v12  ;;  %v1708_v12 = vshrl.u32 %v1707_v11, 7 }
 0x200   :  { %2733 = vmatprep.subr.bf16.mxu0 %v2958_v39 }
 0x201   :  { %2754 = vmatpush3.bf16.msra.mxu1 %v2877_v13  ;;  %v1709_v13 = vsub.s32 0, %v1708_v12 }
 0x202   :  { %2755 = vmatprep.subr.bf16.mxu1 %v2958_v39 }
 0x203   :  { %2734 = vmatpush3.bf16.msra.mxu0 %v2878_v14  ;;  %v1705_v14 = vld [vmem:[%s3890_s6] sm:$0x3]  ;;  %s2961_s6 = smov [#allocation2]  }
 0x204   :  { %2735 = vmatprep.subr.bf16.mxu0 %v2958_v39  ;;  %v2884_v39 = vld [vmem:[%s3889_s5 + $0x10] ss:$8 sps:$4 sm:$0xff]   ;;  %s2036_s11 = sshll.u32 %s2961_s6, 4  ;;  %s2037_s11 = int_to_ptr.vmem [resolvable:$true] %s2036_s11 }
 0x205   :  { %2756 = vmatpush3.bf16.msra.mxu1 %v2879_v15  ;;  %v1713_v15 = vsub.s32 1, %v1708_v12  ;;  %p2939_p1 = scmp.lt.s32.totalorder %s2037_s11, %s2037_s11 }
 0x206   :  { %2579 = vmatprep.subr.bf16.mxu1 %v2905_v42 }
 0x207   :  { %2736 = vmatpush3.bf16.msra.mxu0 %v2880_v16  ;;  %v1710_v16 = vrot.slane %v1705_v14, %v1709_v13 }
 0x208   :  { %2758 = vmatmul.mubr.bf16.vlgmr.msra.gmra.mrb[36].mxu1 %v1588_v17  ;;  %1797 = vmatprep.subr.bf16.mxu0 %v2883_v20  ;;  %v1714_v17 = vrot.slane %v1705_v14, %v1713_v15 }
 0x209   :  { %2580 = vmatpush3.bf16.msra.mxu1 %v2906_v43 }
 0x20a   :  { %2738 = vmatmul.mubr.bf16.vlgmr.msra.gmra.mrb[36].mxu0 %v1480_v18  ;;  %2581 = vmatprep.subr.bf16.mxu1 %v2907_v44 }
 0x20b   :  { %1798 = vmatpush1.bf16.msra.mxu0 %v2881_v19  ;;  %1829 = vmatprep.mubr.bf16.mxu0 %v2960_v41 }
 0x20c   :  { %1799 = vmatprep.subr.bf16.mxu0 %v2886_v21 }
 0x20d   :  { %2582 = vmatpush3.bf16.msra.mxu1 %v2908_v45 }
 0x20e   :  { %2583 = vmatprep.subr.bf16.mxu1 %v2909_v46 }
 0x20f   :  { %1800 = vmatpush1.bf16.msra.mxu0 %v2884_v39 }
 0x210   :  { %1801 = vmatprep.subr.bf16.mxu0 %v2889_v22 }
 0x211   :  { %2584 = vmatpush3.bf16.msra.mxu1 %v2910_v47 }
 0x212   :  { %2585 = vmatprep.subr.bf16.mxu1 %v2911_v48 }
 0x213   :  { %1802 = vmatpush1.bf16.msra.mxu0 %v2887_v23 }
 0x214   :  { %1803 = vmatprep.subr.bf16.mxu0 %v2892_v24 }
 0x215   :  { %2586 = vmatpush3.bf16.msra.mxu1 %v2912_v49 }
 0x216   :  { %2587 = vmatprep.subr.bf16.mxu1 %v2913_v50 }
 0x217   :  { %1804 = vmatpush1.bf16.msra.mxu0 %v2890_v25 }
 0x218   :  { %1805 = vmatprep.subr.bf16.mxu0 %v2895_v26 }
 0x219   :  { %2588 = vmatpush3.bf16.msra.mxu1 %v2914_v51 }
 0x21a   :  { %2589 = vmatprep.subr.bf16.mxu1 %v2915_v52 }
 0x21b   :  { %1806 = vmatpush1.bf16.msra.mxu0 %v2893_v27 }
 0x21c   :  { %1807 = vmatprep.subr.bf16.mxu0 %v2898_v28 }
 0x21d   :  { %2590 = vmatpush3.bf16.msra.mxu1 %v2916_v53 }
 0x21e   :  { %2591 = vmatprep.subr.bf16.mxu1 %v2917_v1 }
 0x21f   :  { %1808 = vmatpush1.bf16.msra.mxu0 %v2896_v29  ;;  %v2226_v29 = vld [vmem:[%s3892_s8] ss:$0 sm:$0xff]  ;;  %s2934_s8 = scalar_lea.vmem %s2037_s11, 32 }
 0x220   :  { %1809 = vmatprep.subr.bf16.mxu0 %v2901_v30  ;;  %p2935_p0 = scmp.ne.s32.totalorder %s2037_s11, %s2934_s8  ;;  %p2940_p2 = scmp.lt.s32.totalorder %s2934_s8, %s2934_s8 }
 0x221   :  { %2592 = vmatpush3.bf16.msra.mxu1 %v2918_v2 }
 0x222   :  { %2593 = vmatprep.subr.bf16.mxu1 %v2919_v9  ;;  %p2941_p3 = por %p2940_p2, %p2939_p1 }
 0x223   :  { %1810 = vmatpush1.bf16.msra.mxu0 %v2899_v31 }
 0x224   :  { %1811 = vmatprep.subr.bf16.mxu0 %v2904_v38  ;;  %p2942_p4 = pnand %p2941_p3, %p2935_p0 }
 0x225   :  { %2594 = vmatpush3.bf16.msra.mxu1 %v2920_v10 }
 0x227   :  { %1812 = vmatpush1.bf16.msra.mxu0 %v2902_v40 }
 0x2bb   :  { %v1457_v54 = vpop.f32.mrb[32].mxu1 }
 0x2bc   :  { %v2719_v55 = vpop.f32.mrb[33].mxu1 }
 0x2bd   :  { %v1369_v56 = vpop.f32.mrb[32].mxu0  ;;  %v1460_v57 = vpop.f32.mrb[34].mxu1 }
 0x2be   :  { %v1458_v59 = vadd.f32 %v1457_v54, %v1369_v56  ;;  %v2699_v61 = vpop.f32.mrb[33].mxu0  ;;  %v2720_v62 = vpop.f32.mrb[35].mxu1 }
 0x2bf   :  { %v1372_v63 = vpop.f32.mrb[34].mxu0 }
 0x2c0   :  { %v2700_v32 = vpop.f32.mrb[35].mxu0 }
 0x2db   :  { %v1672_v3 = vpop.f32.mrb[36].mxu1 }
 0x2dc   :  { %v2759_v4 = vpop.f32.mrb[37].mxu1 }
 0x2dd   :  { %v1564_v5 = vpop.f32.mrb[36].mxu0  ;;  %v1675_v6 = vpop.f32.mrb[38].mxu1 }
 0x2de   :  { %v1570_v7 = vadd.f32 %v1564_v5, %v1458_v59  ;;  %v2739_v8 = vpop.f32.mrb[37].mxu0  ;;  %v2760_v58 = vpop.f32.mrb[39].mxu1 }
 0x2df   :  { %v1567_v36 = vpop.f32.mrb[38].mxu0 }
 0x2e0   :  { %v1678_v60 = vadd.f32 %v1672_v3, %v1570_v7  ;;  %v2740_v33 = vpop.f32.mrb[39].mxu0 }
 0x2e2   :  { %v1686_v35 = vadd.f32 %v2209_v34, %v1678_v60 }
 0x2e4   :  { %v1687_v37 = vmax.f32 %v1686_v35, 0.0 }
 0x2e6   :  { %v1688_v0 = vpack.c.bf16 %v1687_v37, %v1687_v37 }
 0x2e8   :  { %1830 = vmatmul.mubr.bf16.vlgmr.msra.gmra.mrb[40].mxu0 %v1688_v0 }
 0x3bb   :  { %v1831_v18 = vpop.f32.mrb[40].mxu0 }
 0x3bc   :  { %v1832_v19 = vadd.f32 %v1831_v18, %v1710_v16  ;;  %v1833_v20 = vpop.f32.mrb[41].mxu0 }
 0x3bd   :  { %v1834_v21 = vadd.f32 %v1833_v20, %v1714_v17  ;;  %v1835_v39 = vpop.f32.mrb[42].mxu0 }
 0x3be   :  { %v1838_v22 = vmax.f32 %v1832_v19, 0.0  ;;  %v1836_v23 = vpop.f32.mrb[43].mxu0 }
 0x3bf   :  { %v1839_v24 = vmax.f32 %v1834_v21, 0.0 }
 0x3c0   :  { %v1840_v26 = vpack.c.bf16 %v1838_v22, %v1838_v22 }
 0x3c1   :  { %v1841_v25 = vpack.c.bf16 %v1839_v24, %v1839_v24 }
 0x3c3   :  { %2009 = vmatprep.mubr.bf16.mxu1 %v1841_v25 }
 0x3c4   :  { %2010 = vmatmul.mubr.bf16.vlgmr.msra.gmra.mrb[40].mxu1 %v1840_v26 }
 0x497   :  { %v2595_v27 = vpop.f32.mrb[40].mxu1 }
 0x498   :  { %v2596_v28 = vpop.f32.mrb[41].mxu1 }
 0x499   :  { %v2597_v30 = vadd.f32 %v2596_v28, %v2595_v27  ;;  %v2598_v31 = vpop.f32.mrb[42].mxu1 }
 0x49a   :  { %v2599_v38 = vpop.f32.mrb[43].mxu1 }
 0x49b   :  { %v2012_v40 = vadd.f32 %v2597_v30, %v2226_v29 }
 0x49d   :  { %v2018_v41 = vsel %vm2017_vm1, %v2012_v40, -inf }
 0x49e   :  { %2019 = vmax.xlane.f32.xlu0 %v2018_v41 }
 0x52b   :  { %v2020_v42 = vpop.xlane.xlu0 %2019 }
 0x52c   :  { %v2021_v43 = vsub.f32 %v2012_v40, %v2020_v42 }
 0x52e   :  { %v2022_v44 = vmul.f32 1.442695, %v2021_v43 }
 0x530   :  { %2921 = vpow2.f32 %v2022_v44 }
 0x53a   :  { %v2922_v45 = vpop.eup %2921 }
 0x53b   :  { %v2024_v46 = vsel %vm2017_vm1, %v2922_v45, 0.0 }
 0x53c   :  { %2025 = vadd.xlane.f32.xlu0 %v2024_v46 }
 0x5c9   :  { %v2026_v47 = vpop.xlane.xlu0 %2025 }
 0x5ca   :  { %2923 = vrcp.f32 %v2026_v47 }
 0x5d4   :  { %v2924_v48 = vpop.eup %2923 }
 0x5d5   :  { %v2028_v49 = vmul.f32 %v2924_v48, %v2922_v45 }
 0x5d7   :  { %2029 = vst [vmem:[#allocation2] sm:$0x3] %v2028_v49 }
 0x5d8   :  { %2945 = shalt.err (!%p2942_p4)
}
 0x5d9   :  { %s2946_s14 = scalar_lea.hbm %s3893_s9, 32 }
 0x5da   :  { %p2947_p5 = scmp.ne.s32.totalorder %s3893_s9, %s2946_s14  ;;  %p2950_p6 = scmp.lt.u32.totalorder %s2946_s14, %s3893_s9 }
 0x5dc   :  { %p2952_p7 = pnand %p2950_p6, %p2947_p5 }
 0x5de   :  { %2955 = shalt.err (!%p2952_p7)
}
 0x5df   :  { %2039 = dma.vmem_to_hbm [thread:$0]  %s2037_s11, 32, %s3893_s9, [#allocation3]  }
 0x5e0   :  { %2956 = dma.done.wait [#allocation3], 32  }
 0x5e1   :  { %2957 = vsyncadd [#allocation3], 4294967264 }
 0x5e2   :  { %2043 = vsyncpa [#allocation3], 1 }

</bundles_post_ra>
